<compile_context>
chip_gen: v7x
topology: tpu7x:2x2x1
jax: 0.10.0
libtpu: 0.0.40
codegen_flags: <defaults>
</compile_context>

<pallas_src>
import jax
import jax.numpy as jnp
from jax.experimental import pallas as pl
from jax.experimental.pallas import tpu as pltpu


def _round_up(x, m):
    return (x + m - 1) // m * m


def _vmem_capacity_bytes():
    try:
        return int(pltpu.get_tpu_info().vmem_capacity_bytes)
    except Exception:
        return 64 * 1024 * 1024  # conservative default: v7x per-core VMEM


# --------------------------------------------------------------------------------
# Kernels
# --------------------------------------------------------------------------------

def _rgcn_fused_kernel(a_ref, h_ref, wr_ref, wself_ref, b_ref, out_ref):
    """Relation reduction folded into the kernel body (small R).

    Grid: (node_tiles,)  [parallel]
      a_ref:     (R, TN, Np) bf16  rows of every A_r for this node tile
      h_ref:     (Np, Dp)    bf16  all (padded) node features   (grid-constant)
      wr_ref:    (R, Dp, Dp) bf16  all relation weights          (grid-constant)
      wself_ref: (Dp, Dp)    bf16                                (grid-constant)
      b_ref:     (1, Dp)     f32                                 (grid-constant)
      out_ref:   (TN, Dp)    bf16
    """
    i = pl.program_id(0)
    tn = out_ref.shape[0]
    num_rel = a_ref.shape[0]

    row0 = pl.multiple_of(i * tn, tn)
    h_tile = h_ref[pl.ds(row0, tn), :]
    # Self-loop + bias first; accumulator lives in vregs (no VMEM scratch).
    acc = jnp.dot(h_tile, wself_ref[...], preferred_element_type=jnp.float32) + b_ref[...]
    for r in range(num_rel):  # static unroll; this path is used only for R <= 8
        tmp = jnp.dot(a_ref[r], h_ref[...], preferred_element_type=jnp.float32)
        acc = acc + jnp.dot(tmp.astype(jnp.bfloat16), wr_ref[r],
                            preferred_element_type=jnp.float32)
    # activation = F.relu ; dropout = 0 -> identity
    out_ref[...] = jnp.maximum(acc, 0.0).astype(out_ref.dtype)


def _rgcn_reduction_kernel(a_ref, h_ref, wr_ref, wself_ref, b_ref, out_ref, acc_ref):
    """Relations as the last ("arbitrary") grid axis; f32 VMEM accumulator.

    Grid: (node_tiles [parallel], relations [arbitrary / reduction]).
      a_ref:     (TN, Np)  bf16   rows of A_r for this node tile
      h_ref:     (Np, Dp)  bf16   all (padded) node features (grid-constant)
      wr_ref:    (Dp, Dp)  bf16   W_r
      wself_ref: (Dp, Dp)  bf16   W_self (grid-constant)
      b_ref:     (1,  Dp)  f32    bias   (grid-constant)
      out_ref:   (TN, Dp)  bf16
      acc_ref:   (TN, Dp)  f32    accumulator, persistent across the relation axis
    """
    i = pl.program_id(0)
    r = pl.program_id(1)
    tn = out_ref.shape[0]

    @pl.when(r == 0)
    def _init():
        row0 = pl.multiple_of(i * tn, tn)
        h_tile = h_ref[pl.ds(row0, tn), :]
        acc_ref[...] = (
            jnp.dot(h_tile, wself_ref[...], preferred_element_type=jnp.float32)
            + b_ref[...]
        )

    tmp = jnp.dot(a_ref[...], h_ref[...], preferred_element_type=jnp.float32)
    acc_ref[...] += jnp.dot(tmp.astype(jnp.bfloat16), wr_ref[...],
                            preferred_element_type=jnp.float32)

    @pl.when(r == pl.num_programs(1) - 1)
    def _finalize():
        out_ref[...] = jnp.maximum(acc_ref[...], 0.0).astype(out_ref.dtype)


# --------------------------------------------------------------------------------
# pallas_call construction
# --------------------------------------------------------------------------------

def _build_rgcn_call(*, R, Np, Dp, tn, fuse_relations, buffer_constants,
                     vmem_limit_bytes):
    n_tiles = Np // tn
    # Single-buffer the grid-constant blocks (their index_maps never change).
    const_kwargs = {"pipeline_mode": pl.Buffered(1)} if buffer_constants else {}

    flops = 2 * R * Np * Np * Dp + 2 * R * Np * Dp * Dp + 2 * Np * Dp * Dp
    out_bytes = Np * Dp * 2  # bf16 output

    if fuse_relations:
        bytes_accessed = (R * Np * Np * 2      # adjacency (bf16), read once
                          + Np * Dp * 2        # h, constant index_map -> DMA'd once
                          + R * Dp * Dp * 2 + Dp * Dp * 2 + Dp * 4
                          + out_bytes)
        grid = (n_tiles,)
        in_specs = [
            pl.BlockSpec((R, tn, Np), lambda i: (0, i, 0)),                       # all A_r rows
            pl.BlockSpec((Np, Dp), lambda i: (0, 0), **const_kwargs),             # h (full)
            pl.BlockSpec((R, Dp, Dp), lambda i: (0, 0, 0), **const_kwargs),       # all W_r
            pl.BlockSpec((Dp, Dp), lambda i: (0, 0), **const_kwargs),             # W_self
            pl.BlockSpec((1, Dp), lambda i: (0, 0), **const_kwargs),              # bias
        ]
        out_specs = pl.BlockSpec((tn, Dp), lambda i: (i, 0))
        scratch_shapes = ()
        kernel = _rgcn_fused_kernel
        dim_sem = ("parallel",)
    else:
        bytes_accessed = (R * Np * Np * 2
                          + Np * Dp * 2                     # h DMA'd once (constant map)
                          + n_tiles * R * Dp * Dp * 2       # W_r refetched per node tile
                          + Dp * Dp * 2 + Dp * 4
                          + out_bytes)
        grid = (n_tiles, R)                                 # relation axis last (reduction)
        in_specs = [
            pl.BlockSpec((pl.Squeezed(), tn, Np), lambda i, r: (r, i, 0)),        # A_r rows
            pl.BlockSpec((Np, Dp), lambda i, r: (0, 0), **const_kwargs),          # h (full)
            pl.BlockSpec((pl.Squeezed(), Dp, Dp), lambda i, r: (r, 0, 0)),        # W_r
            pl.BlockSpec((Dp, Dp), lambda i, r: (0, 0), **const_kwargs),          # W_self
            pl.BlockSpec((1, Dp), lambda i, r: (0, 0), **const_kwargs),           # bias
        ]
        out_specs = pl.BlockSpec((tn, Dp), lambda i, r: (i, 0))
        scratch_shapes = (pltpu.VMEM((tn, Dp), jnp.float32),)
        kernel = _rgcn_reduction_kernel
        dim_sem = ("parallel", "arbitrary")

    return pl.pallas_call(
        kernel,
        out_shape=jax.ShapeDtypeStruct((Np, Dp), jnp.bfloat16),
        grid_spec=pltpu.PrefetchScalarGridSpec(
            num_scalar_prefetch=0,
            grid=grid,
            in_specs=in_specs,
            out_specs=out_specs,
            scratch_shapes=scratch_shapes,
        ),
        compiler_params=pltpu.CompilerParams(
            dimension_semantics=dim_sem,
            vmem_limit_bytes=vmem_limit_bytes,
        ),
        cost_estimate=pl.CostEstimate(flops=flops, transcendentals=0,
                                      bytes_accessed=bytes_accessed),
    )


def rgcn_layer(adj_p, h_p, w_rel_p, w_self_p, bias_p, *, tn, fuse_relations,
               vmem_limit_bytes):
    """All inputs already padded:
       adj_p (R,Np,Np) bf16, h_p (Np,Dp) bf16, w_rel_p (R,Dp,Dp) bf16,
       w_self_p (Dp,Dp) bf16, bias_p (1,Dp) f32.  Returns (Np,Dp) bf16."""
    R, Np, _ = adj_p.shape
    Dp = h_p.shape[1]

    if R == 0:  # degenerate: no relations -> self-loop + bias only
        out = jnp.maximum(
            jnp.dot(h_p.astype(jnp.float32), w_self_p.astype(jnp.float32)) + bias_p,
            0.0)
        return out.astype(jnp.bfloat16)

    args = (adj_p, h_p, w_rel_p, w_self_p, bias_p)
    try:
        call = _build_rgcn_call(R=R, Np=Np, Dp=Dp, tn=tn,
                                fuse_relations=fuse_relations,
                                buffer_constants=True,
                                vmem_limit_bytes=vmem_limit_bytes)
        return call(*args)
    except Exception:
        # TODO(synk): pipeline_mode=pl.Buffered(1) (single-buffering the grid-constant
        # h / W / bias blocks) is not accepted by this jax build; fall back to the
        # default double-buffered specs, which are known-good.
        call = _build_rgcn_call(R=R, Np=Np, Dp=Dp, tn=tn,
                                fuse_relations=fuse_relations,
                                buffer_constants=False,
                                vmem_limit_bytes=vmem_limit_bytes)
        return call(*args)


# --------------------------------------------------------------------------------
# Module
# --------------------------------------------------------------------------------

class GNN:
    """JAX/Pallas port of SIFT-X GNN (concrete R-GCN layers)."""

    def __init__(self, h_dim, num_relations, num_hidden_layers=1, dropout=0, key=None):
        self.h_dim = h_dim
        self.num_relations = num_relations
        self.dropout = dropout
        self._fuse_override = None  # None = auto; True/False forces a kernel path
        key = key if key is not None else jax.random.PRNGKey(0)

        self.layers = []
        for _ in range(num_hidden_layers):
            key, k1, k2, k3 = jax.random.split(key, 4)
            scale = 1.0 / jnp.sqrt(h_dim)
            self.layers.append(dict(
                w_rel=jax.random.normal(k1, (num_relations, h_dim, h_dim),
                                        jnp.float32) * scale,
                w_self=jax.random.normal(k2, (h_dim, h_dim), jnp.float32) * scale,
                bias=jax.random.normal(k3, (h_dim,), jnp.float32) * 0.01,
            ))

        # Weight padding / bf16 casts hoisted out of the per-call layer loop.
        D = h_dim
        self._Dp = Dp = _round_up(max(D, 1), 128)     # lane-dense feature dim
        self._layers_padded = []
        for layer in self.layers:
            w_rel_p = jnp.pad(layer["w_rel"], ((0, 0), (0, Dp - D), (0, Dp - D))
                              ).astype(jnp.bfloat16)
            w_self_p = jnp.pad(layer["w_self"], ((0, Dp - D), (0, Dp - D))
                               ).astype(jnp.bfloat16)
            bias_p = jnp.pad(layer["bias"], (0, Dp - D)
                             ).astype(jnp.float32).reshape(1, Dp)
            self._layers_padded.append((w_rel_p, w_self_p, bias_p))

    def __call__(self, graph_adj, initial_embeddings):
        # graph_adj: (R, N, N) dense normalized per-relation adjacency
        R, N, _ = graph_adj.shape
        if initial_embeddings.shape[0] != N:
            raise ValueError("Node embedding initialization shape mismatch")
        if not self.layers:
            return initial_embeddings

        D, Dp = self.h_dim, self._Dp
        cap = _vmem_capacity_bytes()
        budget = int(cap * 0.55)   # leave headroom for Mosaic internal scratch

        # Node tile: prefer 256 (fills the 256-wide MXU on v6e/v7x) when the
        # reduction-path footprint fits the per-generation VMEM budget; else 128,
        # else the full (8-aligned) extent for tiny graphs.
        tn = None
        for cand in (256, 128):
            if N >= cand:
                Np_c = _round_up(N, cand)
                need_c = (2 * cand * Np_c * 2 + 2 * Np_c * Dp * 2
                          + 4 * Dp * Dp * 2 + 2 * cand * Dp * 2 + cand * Dp * 4)
                if need_c <= budget:
                    tn = cand
                    break
        if tn is None:
            tn = 128 if N >= 128 else _round_up(max(N, 8), 8)
        # TODO(synk): K-tile the Np contraction (third grid axis / emit_pipeline)
        #             so very large graphs fit v7x's 64 MiB VMEM instead of relying
        #             on the full-Np A tile and resident h.
        Np = _round_up(N, tn)

        # Choose relation-reduction strategy (fold relations in-kernel when small).
        fused_need = (2 * R * tn * Np * 2 + 2 * Np * Dp * 2 + 2 * R * Dp * Dp * 2
                      + 2 * Dp * Dp * 2 + 2 * tn * Dp * 2)
        reduction_need = (2 * tn * Np * 2 + 2 * Np * Dp * 2 + 4 * Dp * Dp * 2
                          + 2 * tn * Dp * 2 + tn * Dp * 4)
        fuse = (R <= 8) and (fused_need <= budget)
        if self._fuse_override is not None:
            fuse = bool(self._fuse_override)
        need = fused_need if fuse else reduction_need
        vmem_limit = int(min(cap * 0.85, max(2 * need + (8 << 20), 32 << 20)))

        # Pad once (zeros in padded rows/cols never leak into real rows/cols),
        # cast the HBM-bound adjacency and features to bf16.
        # TODO(synk): quantize A to int8 (v5e/v6e) / fp8 (v7x) with per-row scales
        #             for large HBM-bound graphs (accuracy validation required).
        adj_p = jnp.pad(graph_adj, ((0, 0), (0, Np - N), (0, Np - N))
                        ).astype(jnp.bfloat16)
        h_p = jnp.pad(initial_embeddings, ((0, Np - N), (0, Dp - D))
                      ).astype(jnp.bfloat16)

        out_p = None
        for (w_rel_p, w_self_p, bias_p) in self._layers_padded:
            out_p = rgcn_layer(adj_p, h_p, w_rel_p, w_self_p, bias_p,
                               tn=tn, fuse_relations=fuse,
                               vmem_limit_bytes=vmem_limit)
            h_p = out_p                # bf16 output feeds the next layer directly
        return out_p[:N, :D].astype(jnp.float32)


def _reference(graph_adj, h, layers):
    # pure-jnp reference; inputs rounded to bf16 to mirror the kernel's input cast
    bf = lambda x: x.astype(jnp.bfloat16).astype(jnp.float32)
    adj = bf(graph_adj)
    h = bf(h)
    for layer in layers:
        msgs = jnp.einsum("rnm,md,rde->ne", adj, h, bf(layer["w_rel"]))
        h = jnp.maximum(msgs + h @ bf(layer["w_self"]) + layer["bias"], 0.0)
    return h


if __name__ == "__main__":
    N = 200          # num nodes (not a multiple of 8 -> exercises padding)
    D = 32           # h_dim (padded to 128 lanes internally)
    R = 4            # num_relations
    L = 2            # num_hidden_layers

    key = jax.random.PRNGKey(0)
    k_adj, k_emb, k_params = jax.random.split(key, 3)

    # deterministic synthetic graph: per-relation bernoulli adjacency, row-normalized
    raw = (jax.random.uniform(k_adj, (R, N, N)) < 0.4).astype(jnp.float32)
    deg = jnp.clip(raw.sum(axis=-1, keepdims=True), 1.0, None)
    adj = raw / deg                                        # (R, N, N)

    initial_embeddings = jax.random.normal(k_emb, (N, D), jnp.float32)

    model = GNN(h_dim=D, num_relations=R, num_hidden_layers=L, key=k_params)

    # Fused (relations-in-kernel) path — the one selected for small graphs.
    out = jax.block_until_ready(model(adj, initial_embeddings))
    ref = _reference(adj, initial_embeddings, model.layers)
    assert out.shape == (N, D)
    assert jnp.allclose(out, ref, atol=5e-2, rtol=5e-2), (
        "fused-path mismatch vs jnp reference: max abs err "
        f"{float(jnp.max(jnp.abs(out - ref)))}")

    # Also exercise the large-graph path (relation axis as grid reduction).
    model._fuse_override = False
    out_red = jax.block_until_ready(model(adj, initial_embeddings))
    assert jnp.allclose(out_red, ref, atol=5e-2, rtol=5e-2), (
        "reduction-path mismatch vs jnp reference: max abs err "
        f"{float(jnp.max(jnp.abs(out_red - ref)))}")

    print("KERNEL_OK")
</pallas_src>

<mosaic_0001>
module attributes {stable_mosaic.version = 11 : i64} {
  func.func @_rgcn_fused_kernel(%arg0: i32, %arg1: memref<4x128x256xbf16, #tpu.memory_space<vmem>>, %arg2: memref<256x128xbf16, #tpu.memory_space<vmem>>, %arg3: memref<4x128x128xbf16, #tpu.memory_space<vmem>>, %arg4: memref<128x128xbf16, #tpu.memory_space<vmem>>, %arg5: memref<1x128xf32, #tpu.memory_space<vmem>>, %arg6: memref<128x128xbf16, #tpu.memory_space<vmem>>) attributes {dimension_semantics = [#tpu.dimension_semantics<parallel>], iteration_bounds = array<i64: 2>, scalar_prefetch = 0 : i64, scratch_operands = 0 : i64, tpu.core_type = #tpu.core_type<tc>, window_params = [{transform_indices = @transform_0, window_bounds = array<i64: 4, 128, 256>}, {pipeline_mode = #tpu.pipeline_mode<synchronous>, transform_indices = @transform_1, window_bounds = array<i64: 256, 128>}, {pipeline_mode = #tpu.pipeline_mode<synchronous>, transform_indices = @transform_2, window_bounds = array<i64: 4, 128, 128>}, {pipeline_mode = #tpu.pipeline_mode<synchronous>, transform_indices = @transform_3, window_bounds = array<i64: 128, 128>}, {pipeline_mode = #tpu.pipeline_mode<synchronous>, transform_indices = @transform_4, window_bounds = array<i64: 1, 128>}, {transform_indices = @transform_5, window_bounds = array<i64: 128, 128>}]} {
    %c128_i32 = arith.constant 128 : i32
    %0 = arith.muli %arg0, %c128_i32 : i32
    %1 = tpu.assume_multiple %0, 128 : i32
    %2 = arith.index_cast %1 : i32 to index
    %c0 = arith.constant 0 : index
    %3 = vector.load %arg2[%2, %c0] : memref<256x128xbf16, #tpu.memory_space<vmem>>, vector<128x128xbf16>
    %c0_0 = arith.constant 0 : index
    %c0_1 = arith.constant 0 : index
    %4 = vector.load %arg4[%c0_0, %c0_1] : memref<128x128xbf16, #tpu.memory_space<vmem>>, vector<128x128xbf16>
    %cst = arith.constant dense<0.000000e+00> : vector<128x128xf32>
    %5 = tpu.matmul %3, %4, %cst {dimension_numbers = #tpu.dot_dimension_numbers<[1], [0], [0], [1], [0, 0, 1, 1], [], []>} : vector<128x128xbf16>, vector<128x128xbf16>, vector<128x128xf32> -> vector<128x128xf32>
    %c0_2 = arith.constant 0 : index
    %c0_3 = arith.constant 0 : index
    %6 = vector.load %arg5[%c0_2, %c0_3] : memref<1x128xf32, #tpu.memory_space<vmem>>, vector<1x128xf32>
    %7 = vector.broadcast %6 : vector<1x128xf32> to vector<128x128xf32>
    %8 = arith.addf %5, %7 : vector<128x128xf32>
    %c0_4 = arith.constant 0 : index
    %c0_5 = arith.constant 0 : index
    %c0_6 = arith.constant 0 : index
    %9 = vector.load %arg1[%c0_4, %c0_5, %c0_6] : memref<4x128x256xbf16, #tpu.memory_space<vmem>>, vector<1x128x256xbf16>
    %10 = vector.shape_cast %9 : vector<1x128x256xbf16> to vector<128x256xbf16>
    %c0_7 = arith.constant 0 : index
    %c0_8 = arith.constant 0 : index
    %11 = vector.load %arg2[%c0_7, %c0_8] : memref<256x128xbf16, #tpu.memory_space<vmem>>, vector<256x128xbf16>
    %cst_9 = arith.constant dense<0.000000e+00> : vector<128x128xf32>
    %12 = tpu.matmul %10, %11, %cst_9 {dimension_numbers = #tpu.dot_dimension_numbers<[1], [0], [0], [1], [0, 0, 1, 1], [], []>} : vector<128x256xbf16>, vector<256x128xbf16>, vector<128x128xf32> -> vector<128x128xf32>
    %13 = arith.truncf %12 : vector<128x128xf32> to vector<128x128xbf16>
    %c0_10 = arith.constant 0 : index
    %c0_11 = arith.constant 0 : index
    %c0_12 = arith.constant 0 : index
    %14 = vector.load %arg3[%c0_10, %c0_11, %c0_12] : memref<4x128x128xbf16, #tpu.memory_space<vmem>>, vector<1x128x128xbf16>
    %15 = vector.shape_cast %14 : vector<1x128x128xbf16> to vector<128x128xbf16>
    %cst_13 = arith.constant dense<0.000000e+00> : vector<128x128xf32>
    %16 = tpu.matmul %13, %15, %cst_13 {dimension_numbers = #tpu.dot_dimension_numbers<[1], [0], [0], [1], [0, 0, 1, 1], [], []>} : vector<128x128xbf16>, vector<128x128xbf16>, vector<128x128xf32> -> vector<128x128xf32>
    %17 = arith.addf %8, %16 : vector<128x128xf32>
    %c1 = arith.constant 1 : index
    %c0_14 = arith.constant 0 : index
    %c0_15 = arith.constant 0 : index
    %18 = vector.load %arg1[%c1, %c0_14, %c0_15] : memref<4x128x256xbf16, #tpu.memory_space<vmem>>, vector<1x128x256xbf16>
    %19 = vector.shape_cast %18 : vector<1x128x256xbf16> to vector<128x256xbf16>
    %c0_16 = arith.constant 0 : index
    %c0_17 = arith.constant 0 : index
    %20 = vector.load %arg2[%c0_16, %c0_17] : memref<256x128xbf16, #tpu.memory_space<vmem>>, vector<256x128xbf16>
    %cst_18 = arith.constant dense<0.000000e+00> : vector<128x128xf32>
    %21 = tpu.matmul %19, %20, %cst_18 {dimension_numbers = #tpu.dot_dimension_numbers<[1], [0], [0], [1], [0, 0, 1, 1], [], []>} : vector<128x256xbf16>, vector<256x128xbf16>, vector<128x128xf32> -> vector<128x128xf32>
    %22 = arith.truncf %21 : vector<128x128xf32> to vector<128x128xbf16>
    %c1_19 = arith.constant 1 : index
    %c0_20 = arith.constant 0 : index
    %c0_21 = arith.constant 0 : index
    %23 = vector.load %arg3[%c1_19, %c0_20, %c0_21] : memref<4x128x128xbf16, #tpu.memory_space<vmem>>, vector<1x128x128xbf16>
    %24 = vector.shape_cast %23 : vector<1x128x128xbf16> to vector<128x128xbf16>
    %cst_22 = arith.constant dense<0.000000e+00> : vector<128x128xf32>
    %25 = tpu.matmul %22, %24, %cst_22 {dimension_numbers = #tpu.dot_dimension_numbers<[1], [0], [0], [1], [0, 0, 1, 1], [], []>} : vector<128x128xbf16>, vector<128x128xbf16>, vector<128x128xf32> -> vector<128x128xf32>
    %26 = arith.addf %17, %25 : vector<128x128xf32>
    %c2 = arith.constant 2 : index
    %c0_23 = arith.constant 0 : index
    %c0_24 = arith.constant 0 : index
    %27 = vector.load %arg1[%c2, %c0_23, %c0_24] : memref<4x128x256xbf16, #tpu.memory_space<vmem>>, vector<1x128x256xbf16>
    %28 = vector.shape_cast %27 : vector<1x128x256xbf16> to vector<128x256xbf16>
    %c0_25 = arith.constant 0 : index
    %c0_26 = arith.constant 0 : index
    %29 = vector.load %arg2[%c0_25, %c0_26] : memref<256x128xbf16, #tpu.memory_space<vmem>>, vector<256x128xbf16>
    %cst_27 = arith.constant dense<0.000000e+00> : vector<128x128xf32>
    %30 = tpu.matmul %28, %29, %cst_27 {dimension_numbers = #tpu.dot_dimension_numbers<[1], [0], [0], [1], [0, 0, 1, 1], [], []>} : vector<128x256xbf16>, vector<256x128xbf16>, vector<128x128xf32> -> vector<128x128xf32>
    %31 = arith.truncf %30 : vector<128x128xf32> to vector<128x128xbf16>
    %c2_28 = arith.constant 2 : index
    %c0_29 = arith.constant 0 : index
    %c0_30 = arith.constant 0 : index
    %32 = vector.load %arg3[%c2_28, %c0_29, %c0_30] : memref<4x128x128xbf16, #tpu.memory_space<vmem>>, vector<1x128x128xbf16>
    %33 = vector.shape_cast %32 : vector<1x128x128xbf16> to vector<128x128xbf16>
    %cst_31 = arith.constant dense<0.000000e+00> : vector<128x128xf32>
    %34 = tpu.matmul %31, %33, %cst_31 {dimension_numbers = #tpu.dot_dimension_numbers<[1], [0], [0], [1], [0, 0, 1, 1], [], []>} : vector<128x128xbf16>, vector<128x128xbf16>, vector<128x128xf32> -> vector<128x128xf32>
    %35 = arith.addf %26, %34 : vector<128x128xf32>
    %c3 = arith.constant 3 : index
    %c0_32 = arith.constant 0 : index
    %c0_33 = arith.constant 0 : index
    %36 = vector.load %arg1[%c3, %c0_32, %c0_33] : memref<4x128x256xbf16, #tpu.memory_space<vmem>>, vector<1x128x256xbf16>
    %37 = vector.shape_cast %36 : vector<1x128x256xbf16> to vector<128x256xbf16>
    %c0_34 = arith.constant 0 : index
    %c0_35 = arith.constant 0 : index
    %38 = vector.load %arg2[%c0_34, %c0_35] : memref<256x128xbf16, #tpu.memory_space<vmem>>, vector<256x128xbf16>
    %cst_36 = arith.constant dense<0.000000e+00> : vector<128x128xf32>
    %39 = tpu.matmul %37, %38, %cst_36 {dimension_numbers = #tpu.dot_dimension_numbers<[1], [0], [0], [1], [0, 0, 1, 1], [], []>} : vector<128x256xbf16>, vector<256x128xbf16>, vector<128x128xf32> -> vector<128x128xf32>
    %40 = arith.truncf %39 : vector<128x128xf32> to vector<128x128xbf16>
    %c3_37 = arith.constant 3 : index
    %c0_38 = arith.constant 0 : index
    %c0_39 = arith.constant 0 : index
    %41 = vector.load %arg3[%c3_37, %c0_38, %c0_39] : memref<4x128x128xbf16, #tpu.memory_space<vmem>>, vector<1x128x128xbf16>
    %42 = vector.shape_cast %41 : vector<1x128x128xbf16> to vector<128x128xbf16>
    %cst_40 = arith.constant dense<0.000000e+00> : vector<128x128xf32>
    %43 = tpu.matmul %40, %42, %cst_40 {dimension_numbers = #tpu.dot_dimension_numbers<[1], [0], [0], [1], [0, 0, 1, 1], [], []>} : vector<128x128xbf16>, vector<128x128xbf16>, vector<128x128xf32> -> vector<128x128xf32>
    %44 = arith.addf %35, %43 : vector<128x128xf32>
    %cst_41 = arith.constant 0.000000e+00 : f32
    %45 = vector.broadcast %cst_41 : f32 to vector<128x128xf32>
    %46 = arith.maximumf %44, %45 : vector<128x128xf32>
    %47 = arith.truncf %46 : vector<128x128xf32> to vector<128x128xbf16>
    %c0_42 = arith.constant 0 : index
    %c0_43 = arith.constant 0 : index
    %48 = vector.load %arg6[%c0_42, %c0_43] : memref<128x128xbf16, #tpu.memory_space<vmem>>, vector<128x128xbf16>
    tpu.vector_store %arg6[%c0_42, %c0_43], %47 {strides = array<i32>} : memref<128x128xbf16, #tpu.memory_space<vmem>>, vector<128x128xbf16>,
    return
  }
  func.func @transform_0(%arg0: i32) -> (i32, i32, i32) {
    %c0_i32 = arith.constant 0 : i32
    %c0_i32_0 = arith.constant 0 : i32
    %c0_i32_1 = arith.constant 0 : i32
    return %c0_i32, %arg0, %c0_i32_0 : i32, i32, i32
  }
  func.func @transform_1(%arg0: i32) -> (i32, i32) {
    %c0_i32 = arith.constant 0 : i32
    %c0_i32_0 = arith.constant 0 : i32
    %c0_i32_1 = arith.constant 0 : i32
    return %c0_i32, %c0_i32_0 : i32, i32
  }
  func.func @transform_2(%arg0: i32) -> (i32, i32, i32) {
    %c0_i32 = arith.constant 0 : i32
    %c0_i32_0 = arith.constant 0 : i32
    %c0_i32_1 = arith.constant 0 : i32
    %c0_i32_2 = arith.constant 0 : i32
    return %c0_i32, %c0_i32_0, %c0_i32_1 : i32, i32, i32
  }
  func.func @transform_3(%arg0: i32) -> (i32, i32) {
    %c0_i32 = arith.constant 0 : i32
    %c0_i32_0 = arith.constant 0 : i32
    %c0_i32_1 = arith.constant 0 : i32
    return %c0_i32, %c0_i32_0 : i32, i32
  }
  func.func @transform_4(%arg0: i32) -> (i32, i32) {
    %c0_i32 = arith.constant 0 : i32
    %c0_i32_0 = arith.constant 0 : i32
    %c0_i32_1 = arith.constant 0 : i32
    return %c0_i32, %c0_i32_0 : i32, i32
  }
  func.func @transform_5(%arg0: i32) -> (i32, i32) {
    %c0_i32 = arith.constant 0 : i32
    %c0_i32_0 = arith.constant 0 : i32
    return %arg0, %c0_i32 : i32, i32
  }
}

module attributes {stable_mosaic.version = 11 : i64} {
  func.func @_rgcn_fused_kernel(%arg0: i32, %arg1: memref<4x128x256xbf16, #tpu.memory_space<vmem>>, %arg2: memref<256x128xbf16, #tpu.memory_space<vmem>>, %arg3: memref<4x128x128xbf16, #tpu.memory_space<vmem>>, %arg4: memref<128x128xbf16, #tpu.memory_space<vmem>>, %arg5: memref<1x128xf32, #tpu.memory_space<vmem>>, %arg6: memref<128x128xbf16, #tpu.memory_space<vmem>>) attributes {dimension_semantics = [#tpu.dimension_semantics<parallel>], iteration_bounds = array<i64: 2>, scalar_prefetch = 0 : i64, scratch_operands = 0 : i64, tpu.core_type = #tpu.core_type<tc>, window_params = [{transform_indices = @transform_0, window_bounds = array<i64: 4, 128, 256>}, {pipeline_mode = #tpu.pipeline_mode<synchronous>, transform_indices = @transform_1, window_bounds = array<i64: 256, 128>}, {pipeline_mode = #tpu.pipeline_mode<synchronous>, transform_indices = @transform_2, window_bounds = array<i64: 4, 128, 128>}, {pipeline_mode = #tpu.pipeline_mode<synchronous>, transform_indices = @transform_3, window_bounds = array<i64: 128, 128>}, {pipeline_mode = #tpu.pipeline_mode<synchronous>, transform_indices = @transform_4, window_bounds = array<i64: 1, 128>}, {transform_indices = @transform_5, window_bounds = array<i64: 128, 128>}]} {
    %c128_i32 = arith.constant 128 : i32
    %0 = arith.muli %arg0, %c128_i32 : i32
    %1 = tpu.assume_multiple %0, 128 : i32
    %2 = arith.index_cast %1 : i32 to index
    %c0 = arith.constant 0 : index
    %3 = vector.load %arg2[%2, %c0] : memref<256x128xbf16, #tpu.memory_space<vmem>>, vector<128x128xbf16>
    %c0_0 = arith.constant 0 : index
    %c0_1 = arith.constant 0 : index
    %4 = vector.load %arg4[%c0_0, %c0_1] : memref<128x128xbf16, #tpu.memory_space<vmem>>, vector<128x128xbf16>
    %cst = arith.constant dense<0.000000e+00> : vector<128x128xf32>
    %5 = tpu.matmul %3, %4, %cst {dimension_numbers = #tpu.dot_dimension_numbers<[1], [0], [0], [1], [0, 0, 1, 1], [], []>} : vector<128x128xbf16>, vector<128x128xbf16>, vector<128x128xf32> -> vector<128x128xf32>
    %c0_2 = arith.constant 0 : index
    %c0_3 = arith.constant 0 : index
    %6 = vector.load %arg5[%c0_2, %c0_3] : memref<1x128xf32, #tpu.memory_space<vmem>>, vector<1x128xf32>
    %7 = vector.broadcast %6 : vector<1x128xf32> to vector<128x128xf32>
    %8 = arith.addf %5, %7 : vector<128x128xf32>
    %c0_4 = arith.constant 0 : index
    %c0_5 = arith.constant 0 : index
    %c0_6 = arith.constant 0 : index
    %9 = vector.load %arg1[%c0_4, %c0_5, %c0_6] : memref<4x128x256xbf16, #tpu.memory_space<vmem>>, vector<1x128x256xbf16>
    %10 = vector.shape_cast %9 : vector<1x128x256xbf16> to vector<128x256xbf16>
    %c0_7 = arith.constant 0 : index
    %c0_8 = arith.constant 0 : index
    %11 = vector.load %arg2[%c0_7, %c0_8] : memref<256x128xbf16, #tpu.memory_space<vmem>>, vector<256x128xbf16>
    %cst_9 = arith.constant dense<0.000000e+00> : vector<128x128xf32>
    %12 = tpu.matmul %10, %11, %cst_9 {dimension_numbers = #tpu.dot_dimension_numbers<[1], [0], [0], [1], [0, 0, 1, 1], [], []>} : vector<128x256xbf16>, vector<256x128xbf16>, vector<128x128xf32> -> vector<128x128xf32>
    %13 = arith.truncf %12 : vector<128x128xf32> to vector<128x128xbf16>
    %c0_10 = arith.constant 0 : index
    %c0_11 = arith.constant 0 : index
    %c0_12 = arith.constant 0 : index
    %14 = vector.load %arg3[%c0_10, %c0_11, %c0_12] : memref<4x128x128xbf16, #tpu.memory_space<vmem>>, vector<1x128x128xbf16>
    %15 = vector.shape_cast %14 : vector<1x128x128xbf16> to vector<128x128xbf16>
    %cst_13 = arith.constant dense<0.000000e+00> : vector<128x128xf32>
    %16 = tpu.matmul %13, %15, %cst_13 {dimension_numbers = #tpu.dot_dimension_numbers<[1], [0], [0], [1], [0, 0, 1, 1], [], []>} : vector<128x128xbf16>, vector<128x128xbf16>, vector<128x128xf32> -> vector<128x128xf32>
    %17 = arith.addf %8, %16 : vector<128x128xf32>
    %c1 = arith.constant 1 : index
    %c0_14 = arith.constant 0 : index
    %c0_15 = arith.constant 0 : index
    %18 = vector.load %arg1[%c1, %c0_14, %c0_15] : memref<4x128x256xbf16, #tpu.memory_space<vmem>>, vector<1x128x256xbf16>
    %19 = vector.shape_cast %18 : vector<1x128x256xbf16> to vector<128x256xbf16>
    %c0_16 = arith.constant 0 : index
    %c0_17 = arith.constant 0 : index
    %20 = vector.load %arg2[%c0_16, %c0_17] : memref<256x128xbf16, #tpu.memory_space<vmem>>, vector<256x128xbf16>
    %cst_18 = arith.constant dense<0.000000e+00> : vector<128x128xf32>
    %21 = tpu.matmul %19, %20, %cst_18 {dimension_numbers = #tpu.dot_dimension_numbers<[1], [0], [0], [1], [0, 0, 1, 1], [], []>} : vector<128x256xbf16>, vector<256x128xbf16>, vector<128x128xf32> -> vector<128x128xf32>
    %22 = arith.truncf %21 : vector<128x128xf32> to vector<128x128xbf16>
    %c1_19 = arith.constant 1 : index
    %c0_20 = arith.constant 0 : index
    %c0_21 = arith.constant 0 : index
    %23 = vector.load %arg3[%c1_19, %c0_20, %c0_21] : memref<4x128x128xbf16, #tpu.memory_space<vmem>>, vector<1x128x128xbf16>
    %24 = vector.shape_cast %23 : vector<1x128x128xbf16> to vector<128x128xbf16>
    %cst_22 = arith.constant dense<0.000000e+00> : vector<128x128xf32>
    %25 = tpu.matmul %22, %24, %cst_22 {dimension_numbers = #tpu.dot_dimension_numbers<[1], [0], [0], [1], [0, 0, 1, 1], [], []>} : vector<128x128xbf16>, vector<128x128xbf16>, vector<128x128xf32> -> vector<128x128xf32>
    %26 = arith.addf %17, %25 : vector<128x128xf32>
    %c2 = arith.constant 2 : index
    %c0_23 = arith.constant 0 : index
    %c0_24 = arith.constant 0 : index
    %27 = vector.load %arg1[%c2, %c0_23, %c0_24] : memref<4x128x256xbf16, #tpu.memory_space<vmem>>, vector<1x128x256xbf16>
    %28 = vector.shape_cast %27 : vector<1x128x256xbf16> to vector<128x256xbf16>
    %c0_25 = arith.constant 0 : index
    %c0_26 = arith.constant 0 : index
    %29 = vector.load %arg2[%c0_25, %c0_26] : memref<256x128xbf16, #tpu.memory_space<vmem>>, vector<256x128xbf16>
    %cst_27 = arith.constant dense<0.000000e+00> : vector<128x128xf32>
    %30 = tpu.matmul %28, %29, %cst_27 {dimension_numbers = #tpu.dot_dimension_numbers<[1], [0], [0], [1], [0, 0, 1, 1], [], []>} : vector<128x256xbf16>, vector<256x128xbf16>, vector<128x128xf32> -> vector<128x128xf32>
    %31 = arith.truncf %30 : vector<128x128xf32> to vector<128x128xbf16>
    %c2_28 = arith.constant 2 : index
    %c0_29 = arith.constant 0 : index
    %c0_30 = arith.constant 0 : index
    %32 = vector.load %arg3[%c2_28, %c0_29, %c0_30] : memref<4x128x128xbf16, #tpu.memory_space<vmem>>, vector<1x128x128xbf16>
    %33 = vector.shape_cast %32 : vector<1x128x128xbf16> to vector<128x128xbf16>
    %cst_31 = arith.constant dense<0.000000e+00> : vector<128x128xf32>
    %34 = tpu.matmul %31, %33, %cst_31 {dimension_numbers = #tpu.dot_dimension_numbers<[1], [0], [0], [1], [0, 0, 1, 1], [], []>} : vector<128x128xbf16>, vector<128x128xbf16>, vector<128x128xf32> -> vector<128x128xf32>
    %35 = arith.addf %26, %34 : vector<128x128xf32>
    %c3 = arith.constant 3 : index
    %c0_32 = arith.constant 0 : index
    %c0_33 = arith.constant 0 : index
    %36 = vector.load %arg1[%c3, %c0_32, %c0_33] : memref<4x128x256xbf16, #tpu.memory_space<vmem>>, vector<1x128x256xbf16>
    %37 = vector.shape_cast %36 : vector<1x128x256xbf16> to vector<128x256xbf16>
    %c0_34 = arith.constant 0 : index
    %c0_35 = arith.constant 0 : index
    %38 = vector.load %arg2[%c0_34, %c0_35] : memref<256x128xbf16, #tpu.memory_space<vmem>>, vector<256x128xbf16>
    %cst_36 = arith.constant dense<0.000000e+00> : vector<128x128xf32>
    %39 = tpu.matmul %37, %38, %cst_36 {dimension_numbers = #tpu.dot_dimension_numbers<[1], [0], [0], [1], [0, 0, 1, 1], [], []>} : vector<128x256xbf16>, vector<256x128xbf16>, vector<128x128xf32> -> vector<128x128xf32>
    %40 = arith.truncf %39 : vector<128x128xf32> to vector<128x128xbf16>
    %c3_37 = arith.constant 3 : index
    %c0_38 = arith.constant 0 : index
    %c0_39 = arith.constant 0 : index
    %41 = vector.load %arg3[%c3_37, %c0_38, %c0_39] : memref<4x128x128xbf16, #tpu.memory_space<vmem>>, vector<1x128x128xbf16>
    %42 = vector.shape_cast %41 : vector<1x128x128xbf16> to vector<128x128xbf16>
    %cst_40 = arith.constant dense<0.000000e+00> : vector<128x128xf32>
    %43 = tpu.matmul %40, %42, %cst_40 {dimension_numbers = #tpu.dot_dimension_numbers<[1], [0], [0], [1], [0, 0, 1, 1], [], []>} : vector<128x128xbf16>, vector<128x128xbf16>, vector<128x128xf32> -> vector<128x128xf32>
    %44 = arith.addf %35, %43 : vector<128x128xf32>
    %cst_41 = arith.constant 0.000000e+00 : f32
    %45 = vector.broadcast %cst_41 : f32 to vector<128x128xf32>
    %46 = arith.maximumf %44, %45 : vector<128x128xf32>
    %47 = arith.truncf %46 : vector<128x128xf32> to vector<128x128xbf16>
    %c0_42 = arith.constant 0 : index
    %c0_43 = arith.constant 0 : index
    %48 = vector.load %arg6[%c0_42, %c0_43] : memref<128x128xbf16, #tpu.memory_space<vmem>>, vector<128x128xbf16>
    tpu.vector_store %arg6[%c0_42, %c0_43], %47 {strides = array<i32>} : memref<128x128xbf16, #tpu.memory_space<vmem>>, vector<128x128xbf16>,
    return
  }
  func.func @transform_0(%arg0: i32) -> (i32, i32, i32) {
    %c0_i32 = arith.constant 0 : i32
    %c0_i32_0 = arith.constant 0 : i32
    %c0_i32_1 = arith.constant 0 : i32
    return %c0_i32, %arg0, %c0_i32_0 : i32, i32, i32
  }
  func.func @transform_1(%arg0: i32) -> (i32, i32) {
    %c0_i32 = arith.constant 0 : i32
    %c0_i32_0 = arith.constant 0 : i32
    %c0_i32_1 = arith.constant 0 : i32
    return %c0_i32, %c0_i32_0 : i32, i32
  }
  func.func @transform_2(%arg0: i32) -> (i32, i32, i32) {
    %c0_i32 = arith.constant 0 : i32
    %c0_i32_0 = arith.constant 0 : i32
    %c0_i32_1 = arith.constant 0 : i32
    %c0_i32_2 = arith.constant 0 : i32
    return %c0_i32, %c0_i32_0, %c0_i32_1 : i32, i32, i32
  }
  func.func @transform_3(%arg0: i32) -> (i32, i32) {
    %c0_i32 = arith.constant 0 : i32
    %c0_i32_0 = arith.constant 0 : i32
    %c0_i32_1 = arith.constant 0 : i32
    return %c0_i32, %c0_i32_0 : i32, i32
  }
  func.func @transform_4(%arg0: i32) -> (i32, i32) {
    %c0_i32 = arith.constant 0 : i32
    %c0_i32_0 = arith.constant 0 : i32
    %c0_i32_1 = arith.constant 0 : i32
    return %c0_i32, %c0_i32_0 : i32, i32
  }
  func.func @transform_5(%arg0: i32) -> (i32, i32) {
    %c0_i32 = arith.constant 0 : i32
    %c0_i32_0 = arith.constant 0 : i32
    return %arg0, %c0_i32 : i32, i32
  }
}

</mosaic_0001>

<bundles_post_ra>
// kernel: tpu_custom_call.1
= control target key start
LH: loop header
LB: loop body
LE: loop exit
PB: predicated region body
PF: predicated region fallthrough
CT: control target
= control target key end

     0   :  { %s4349_s0 = inlined_call_operand.hbm [shape: bf16[4,256,256], index: 0, kind: input, shape index: {}]   ;;  %s4350_s1 = inlined_call_operand.hbm [shape: bf16[256,128], index: 1, kind: input, shape index: {}]   ;;  %s4351_s2 = inlined_call_operand.hbm [shape: bf16[4,128,128], index: 2, kind: input, shape index: {}]   ;;  %s4352_s3 = inlined_call_operand.hbm [shape: bf16[128,128], index: 3, kind: input, shape index: {}]   ;;  %s4353_s4 = inlined_call_operand.vmem [shape: f32[1,128], index: 4, kind: input, shape index: {}]   ;;  %s4354_s5 = inlined_call_operand.hbm [shape: bf16[256,128], index: 5, kind: output, shape index: {}]  }
   0x1   :  { %4362 = sst [smem:[#allocation20_spill]] %s4350_s1 }
   0x2   :  { %10 = vsyncpa [#allocation3], 0 }
   0x3   :  { %12 = vsyncpa [#allocation3 + $0x1], 0 }
   0x4   :  { %13 = vsyncpa [#allocation6], 0 }
   0x5   :  { %14 = vsyncpa [#allocation9], 0 }
   0x6   :  { %15 = vsyncpa [#allocation4], 0 }
   0x7   :  { %17 = vsyncpa [#allocation4 + $0x1], 0  ;;  %s3742_s18 = smov 0   ;;  %s3744_s19 = smov 0  }
   0x8   :  { %s3746_s20 = smov 0   ;;  %s3748_s21 = smov 0  }
   0x9 LB: > { %s3763_s22 = sadd.s32 4294967295, %s3696_s21   ;;  %s2413_s23 = sadd.s32 4294967294, %s3696_s21   ;;  %s3696_s21 = sphi %s3748_s21, %s4384_s21   ;;  %s3692_s20 = sphi %s3746_s20, %s4388_s20   ;;  %s3688_s19 = sphi %s3744_s19, %s4387_s19   ;;  %s3684_s18 = sphi %s3742_s18, %s4386_s18  }
   0xa   : > { %s3767_s24 = sadd.s32 1, %s3696_s21   ;;  %s30_s25 = sadd.s32 1, %s3692_s20 }
   0xb   : > { %4363 = sst [smem:[#allocation18_spill]] %s3767_s24  ;;  %s27_s26 = ssub.s32 %s3696_s21, %s3767_s24 }
   0xc   : > { %p37_p0 = scmp.ne.s32.totalorder %s3692_s20, %s3688_s19  ;;  %p28_p1 = scmp.eq.s32.totalorder %s27_s26, 0 }
   0xd   : > { %p38_p2 = scmp.eq.s32.totalorder %s3696_s21, 0  ;;  %p43_p3 = scmp.ne.s32.totalorder %s3688_s19, %s3684_s18 }
   0xe   : > { %p4355_p4 = scmp.eq.s32.totalorder %s3763_s22, 0  ;;  %p151_p7 = scmp.eq.s32.totalorder %s3763_s22, 1 }
   0xf   : > { %s3779_s27 = scalar_select %p28_p1, %s3692_s20, %s30_s25  }
  0x10   : > { %p3781_p5 = por %p38_p2, %p37_p0  ;;  %p3787_p6 = por %p4355_p4, %p43_p3 }
  0x11   : > { %4364 = sst [smem:[#allocation19_spill]] %s3779_s27  ;;  %p157_p8 = scmp.eq.s32.totalorder %s2413_s23, 1 }
  0x12   : > { %s4365_s28 = scalar_select %p3781_p5, 1, 0 }
  0x13   : > { %s4366_s29 = scalar_select %p3787_p6, 1, 0 }
  0x14   : > { %p2414_p9 = scmp.ge.s32.totalorder %s3696_s21, 1  ;;  %p164_p10 = scmp.lt.s32.totalorder %s3696_s21, 3 }
  0x15   : > { %p3794_p11 = por %p151_p7, %p37_p0  ;;  %p3798_p12 = por %p157_p8, %p43_p3 }
  0x16   : > { %p3802_p13 = pnand %p2414_p9, %p164_p10  ;;  %s3698_s8 = smov [#allocation5]  }
  0x17   : > { %s4367_s30 = scalar_select %p3794_p11, 1, 0 }
  0x18   : > { %s4368_s6 = scalar_select %p3798_p12, 1, 0 }
  0x19   : > { %s4369_s7 = scalar_select %p3802_p13, 1, 0 }
  0x1a   : > { %p3312_p1 = pneg %p3802_p13  ;;  %s176_s9 = sshll.u32 %s3698_s8, 4  ;;  %s177_s9 = int_to_ptr.vmem [resolvable:$true] %s176_s9 }
  0x1b   : > { %s3699_s11 = smov [#allocation7]   ;;  %s4371_s1 = sld [smem:[#allocation20_spill]] }
  0x1c   : > { %p3810_p2 = pnand %p3312_p1, %p4355_p4  ;;  %s189_s12 = sshll.u32 %s3699_s11, 4  ;;  %s3814_s12 = int_to_ptr.vmem [resolvable:$true] %s189_s12 }
  0x1e   : > { %p3824_p3 = pneg %p3810_p2 }
  0x21   : > { %s3538_s15 = scalar_lea.hbm %s4371_s1, 2048 }
  0x22   : > { %p3539_p0 = scmp.ne.s32.totalorder %s4371_s1, %s3538_s15  ;;  %p3545_p9 = scmp.lt.u32.totalorder %s3538_s15, %s4371_s1 }
  0x24   : > { %p3541_p7 = pnand %p3824_p3, %p3539_p0 }
  0x26   : > { %p3542_p8 = pneg %p3541_p7 }
  0x28   : > { %p3547_p10 = pnand %p3545_p9, %p3542_p8 }
  0x2a   : > { %3550 = shalt.err (!%p3547_p10)
}
  0x2b   : > { %s3551_s8 = scalar_lea.vmem %s177_s9, 2048  ;;  %p3559_p11 = scmp.lt.s32.totalorder %s177_s9, %s177_s9 }
  0x2c   : > { %p3552_p1 = scmp.ne.s32.totalorder %s177_s9, %s3551_s8  ;;  %p3560_p6 = scmp.lt.s32.totalorder %s3551_s8, %s3551_s8 }
  0x2e   : > { %p3554_p4 = pnand %p3552_p1, %p3824_p3  ;;  %p3561_p13 = por %p3560_p6, %p3559_p11 }
  0x30   : > { %p3555_p12 = pneg %p3554_p4 }
  0x32   : > { %p3562_p5 = pnand %p3561_p13, %p3555_p12 }
  0x34   : > { %3565 = shalt.err (!%p3562_p5)
}
  0x35   : > { %s3700_s11 = smov 64   ;;  %s3701_s13 = smov 4  }
  0x36   : > { %3315 = dma.hbm_to_vmem [thread:$0]  (!%p3810_p2), %s4371_s1, 2048, %s177_s9, [#allocation6], %s3700_s11, %s3700_s11, %s3701_s13  }
  0x37   : > { %s3566_s25 = scalar_lea.hbm %s4351_s2, 4096 }
  0x38   : > { %p3567_p4 = scmp.ne.s32.totalorder %s4351_s2, %s3566_s25  ;;  %p3573_p11 = scmp.lt.u32.totalorder %s3566_s25, %s4351_s2 }
  0x3a   : > { %p3569_p5 = pnand %p3567_p4, %p3824_p3 }
  0x3c   : > { %p3570_p6 = pneg %p3569_p5 }
  0x3e   : > { %p3575_p12 = pnand %p3573_p11, %p3570_p6 }
  0x40   : > { %3578 = shalt.err (!%p3575_p12)
}
  0x41   : > { %s3579_s9 = scalar_lea.vmem %s3814_s12, 4096  ;;  %p3587_p8 = scmp.lt.s32.totalorder %s3814_s12, %s3814_s12 }
  0x42   : > { %p3580_p13 = scmp.ne.s32.totalorder %s3814_s12, %s3579_s9  ;;  %p3588_p9 = scmp.lt.s32.totalorder %s3579_s9, %s3579_s9 }
  0x44   : > { %p3582_p0 = pnand %p3580_p13, %p3824_p3  ;;  %p3589_p10 = por %p3588_p9, %p3587_p8 }
  0x46   : > { %p3583_p7 = pneg %p3582_p0 }
  0x48   : > { %p3590_p1 = pnand %p3589_p10, %p3583_p7 }
  0x4a   : > { %3593 = shalt.err (!%p3590_p1)
}
  0x4b   : > { %3318 = dma.hbm_to_vmem [thread:$0]  (!%p3810_p2), %s4351_s2, 4096, %s3814_s12, [#allocation6], %s3700_s11, %s3700_s11, %s3701_s13  }
  0x4c   : > { %s3702_s14 = smov [#allocation8]   ;;  %s3594_s25 = scalar_lea.hbm %s4352_s3, 1024 }
  0x4d   : > { %s202_s15 = sshll.u32 %s3702_s14, 4  ;;  %p3595_p4 = scmp.ne.s32.totalorder %s4352_s3, %s3594_s25  ;;  %s203_s15 = int_to_ptr.vmem [resolvable:$true] %s202_s15 }
  0x4e   : > { %p3601_p11 = scmp.lt.u32.totalorder %s3594_s25, %s4352_s3 }
  0x4f   : > { %p3597_p5 = pnand %p3595_p4, %p3824_p3 }
  0x51   : > { %p3598_p6 = pneg %p3597_p5 }
  0x53   : > { %p3603_p12 = pnand %p3601_p11, %p3598_p6 }
  0x55   : > { %3606 = shalt.err (!%p3603_p12)
}
  0x56   : > { %s3607_s12 = scalar_lea.vmem %s203_s15, 1024  ;;  %p3615_p8 = scmp.lt.s32.totalorder %s203_s15, %s203_s15 }
  0x57   : > { %p3608_p13 = scmp.ne.s32.totalorder %s203_s15, %s3607_s12  ;;  %p3616_p9 = scmp.lt.s32.totalorder %s3607_s12, %s3607_s12 }
  0x59   : > { %p3610_p0 = pnand %p3608_p13, %p3824_p3  ;;  %p3617_p10 = por %p3616_p9, %p3615_p8 }
  0x5b   : > { %p3611_p7 = pneg %p3610_p0 }
  0x5d   : > { %p3618_p1 = pnand %p3617_p10, %p3611_p7 }
  0x5f   : > { %3621 = shalt.err (!%p3618_p1)
}
  0x60   : > { %3321 = dma.hbm_to_vmem [thread:$0]  (!%p3810_p2), %s4352_s3, 1024, %s203_s15, [#allocation9], %s3700_s11, %s3700_s11, %s3701_s13  }
  0x61   : > { %p2418_p4 = scmp.ge.s32.totalorder %s3696_s21, 2 }
  0x63   : > { %215 = sbr.rel (%p2418_p4) target bundleno = 121 (0x79), region = 32 }
  0x6a   : > { %s219_s23 = sand.u32 1, %s3692_s20   ;;  %s2632_s10 = sshll.u32 %s3696_s21, 11 }
  0x6b   : > { %s2419_s27 = sshll.u32 %s219_s23, 9  ;;  %s230_s11 = scalar_lea.hbm %s4349_s0, %s2632_s10 }
  0x6c   : > { %p4373_p2 = scmp.ne.s32.totalorder %s4365_s28, 0  ;;  %s223_s15 = scalar_lea.vmem [#allocation2], %s2419_s27 }
  0x6d   : > { %s243_s17 = sshll.u32 %s223_s15, 4  ;;  %s3703_s26 = smov 4096   ;;  %s244_s17 = int_to_ptr.vmem [resolvable:$true] %s243_s17 }
  0x6e   : > { %s3295_s13 = scalar_select %p4373_p2, [#allocation0], [#allocation13] }
  0x6f   : > { %3296 = sst [smem:[#allocation12]] (%p4373_p2), %s3703_s26  ;;  %s3704_s8 = smov 2048  }
  0x70   : > { %s235_s25 = sld [smem:[%s3295_s13]]   ;;  %s3705_s9 = smov 16  }
  0x71   : > { %3297 = sst [smem:[#allocation12 + $0x1]] (%p4373_p2), %s3704_s8  ;;  %s3706_s12 = smov 128  }
  0x72   : > { %3298 = sst [smem:[#allocation12 + $0x2]] (%p4373_p2), %s3705_s9  ;;  %s3707_s24 = smov 8  }
  0x73   : > { %3299 = sst [smem:[#allocation12 + $0x3]] (%p4373_p2), %s3706_s12  ;;  %s220_s27 = scalar_lea.sflag [#allocation3], %s219_s23 }
  0x74   : > { %3300 = sst [smem:[#allocation12 + $0x4]] (%p4373_p2), %s3706_s12  ;;  %s3708_s14 = smov [#allocation11]  }
  0x75   : > { %3301 = sst [smem:[#allocation12 + $0x5]] (%p4373_p2), %s3707_s24 }
  0x76   : > { %s2423_s1 = sshll.u32 %s235_s25, 26 }
  0x77   : > { %s2424_s10 = sadd.s32 134217728, %s2423_s1 }
  0x78   : > { %3302 = dma.general (%p4373_p2), %s230_s11, 8192, %s244_s17, %s220_s27, %s3708_s14, [#allocation12], %s2424_s10, 0  }
  0x79 PF: > { %p4374_p3 = scmp.ne.s32.totalorder %s4369_s7, 0 }
  0x7a   : > { %s3917_s16 = sand.u32 (!%p4374_p3), 1, %s3688_s19   ;;  %p4375_p5 = scmp.ne.s32.totalorder (!%p4374_p3), %s4366_s29, 0 }
  0x7b   : > { %268 = sbr.rel (%p4374_p3) target bundleno = 1012 (0x3f4), region = 40  ;;  %s2426_s13 = sshll.u32 (!%p4374_p3), %s3917_s16, 9 }
  0x7c   : > { %s271_s15 = scalar_lea.sflag (!%p4374_p3), [#allocation3], %s3917_s16  ;;  %s3921_s25 = scalar_lea.vmem (!%p4374_p3), [#allocation2], %s2426_s13 }
  0x82   : > { %3667 = dma.done.wait (%p4375_p5), %s271_s15, 8192  }
  0x83   : > { %3669 = vsyncadd (%p4375_p5), %s271_s15, 4294959104  ;;  %p4376_p6 = scmp.eq.s32.totalorder %s3763_s22, 0 }
  0x85   : > { %3671 = dma.done.wait (%p4376_p6), [#allocation6], 6144   ;;  %p4377_p11 = pmov %p4376_p6 }
  0x86   : > { %p4378_p12 = pmov %p4376_p6 }
  0x87   : > { %3673 = vsyncadd (%p4377_p11), [#allocation6], 4294961152 }
  0x88   : > { %3675 = dma.done.wait (%p4378_p12), [#allocation9], 1024   ;;  %p4379_p13 = pmov %p4376_p6 }
  0x89   : > { %v3935_v0 = vld [vmem:[#allocation5 + $0x40] sm:$0xff]   ;;  %v3940_v2 = vld [vmem:[#allocation5 + $0x48] sm:$0xff]   ;;  %v3946_v4 = vld [vmem:[#allocation5 + $0x50] sm:$0xff]   ;;  %s2431_s28 = sshll.u32 %s3763_s22, 7  ;;  %s2430_s26 = sshll.u32 %s3917_s16, 6 }
  0x8a   : > { %3677 = vsyncadd (%p4379_p13), [#allocation9], 4294966272  ;;  %v3937_v1 = vld [vmem:[#allocation5] sm:$0xff]   ;;  %2713 = vmatprep.subr.bf16.mxu1 %v3935_v0  ;;  %v3943_v3 = vld [vmem:[#allocation5 + $0x8] sm:$0xff]   ;;  %s317_s29 = sshra.s32 %s2431_s28, 3  ;;  %s4278_s8 = scalar_lea.vmem [#allocation10], %s2430_s26 }
  0x8b   : > { %2714 = vmatpush3.bf16.msra.mxu1 %v3937_v1  ;;  %v3949_v5 = vld [vmem:[#allocation5 + $0x10] sm:$0xff]   ;;  %v3952_v6 = vld [vmem:[#allocation5 + $0x58] sm:$0xff]   ;;  %v3958_v8 = vld [vmem:[#allocation5 + $0x60] sm:$0xff]   ;;  %s2432_s7 = sshll.u32 %s317_s29, 2  ;;  %s2309_s9 = sshll.u32 %s4278_s8, 4  ;;  %s4298_s9 = int_to_ptr.vmem [resolvable:$true] %s2309_s9 }
  0x8c   : > { %2715 = vmatprep.subr.bf16.mxu1 %v3940_v2  ;;  %v3955_v7 = vld [vmem:[#allocation5 + $0x18] sm:$0xff]   ;;  %v3961_v9 = vld [vmem:[#allocation5 + $0x20] sm:$0xff]   ;;  %v3964_v10 = vld [vmem:[#allocation5 + $0x68] sm:$0xff]   ;;  %s3988_s23 = scalar_lea.vmem [#allocation5], %s2432_s7  ;;  %s2649_s12 = sshll.u32 %s3763_s22, 10 }
  0x8d   : > { %v3396_v11 = vld [vmem:[%s3921_s25 + $0x4] ss:$8 sps:$4 sm:$0xff]   ;;  %v3971_v13 = vld [vmem:[#allocation5 + $0x70] sm:$0xff]   ;;  %v3978_v15 = vld [vmem:[#allocation5 + $0x78] sm:$0xff]   ;;  %s4303_s10 = scalar_lea.hbm %s4354_s5, %s2649_s12  ;;  %s2296_s27 = scalar_lea.sflag [#allocation4], %s3917_s16 }
  0x8e   : > { %v3968_v12 = vld [vmem:[#allocation5 + $0x28] sm:$0xff]   ;;  %809 = vmatprep.mubr.bf16.mxu1 %v3396_v11  ;;  %v3975_v14 = vld [vmem:[#allocation5 + $0x30] sm:$0xff]   ;;  %v3980_v16 = vld [vmem:[#allocation5 + $0x38] sm:$0xff]   ;;  %s3622_s22 = scalar_lea.vmem %s4298_s9, 1024  ;;  %p4382_p7 = scmp.ne.s32.totalorder %s4367_s30, 0 }
  0x8f   : > { %2716 = vmatpush3.bf16.msra.mxu1 %v3943_v3  ;;  %v3418_v17 = vld [vmem:[#allocation8] sm:$0xff]   ;;  %v3419_v18 = vld [vmem:[#allocation8 + $0x8] sm:$0xff]   ;;  %v3397_v20 = vld [vmem:[%s3921_s25 + $0x14] ss:$8 sps:$4 sm:$0xff]   ;;  %p3623_p0 = scmp.ne.s32.totalorder %s4298_s9, %s3622_s22  ;;  %s3709_s14 = smov [#allocation10]  }
  0x90   : > { %2717 = vmatprep.subr.bf16.mxu1 %v3946_v4  ;;  %v3394_v19 = vld [vmem:[%s3921_s25] ss:$8 sps:$4 sm:$0xff]   ;;  %3033 = vmatprep.subr.bf16.mxu0 %v3418_v17  ;;  %v3420_v21 = vld [vmem:[#allocation8 + $0x10] sm:$0xff]   ;;  %v3421_v22 = vld [vmem:[#allocation8 + $0x18] sm:$0xff]   ;;  %s3626_s13 = sshll.u32 %s3709_s14, 4  ;;  %s3627_s13 = int_to_ptr.vmem [resolvable:$false] %s3626_s13 }
  0x91   : > { %3034 = vmatpush3.bf16.msra.mxu0 %v3418_v17  ;;  %v3426_v23 = vld [vmem:[%s3988_s23] sm:$0xff]   ;;  %v3399_v24 = vld [vmem:[%s3921_s25 + $0x10] ss:$8 sps:$4 sm:$0xff]   ;;  %v3423_v27 = vld [vmem:[#allocation8 + $0x28] sm:$0xff]   ;;  %p3624_p8 = pnand %p3623_p0, %p4382_p7  ;;  %s3628_s15 = scalar_lea.vmem %s3627_s13, 2048 }
  0x92   : > { %3035 = vmatprep.subr.bf16.mxu0 %v3419_v18  ;;  %3049 = vmatprep.mubr.bf16.mxu0 %v3426_v23  ;;  %v3400_v25 = vld [vmem:[%s3921_s25 + $0x24] ss:$8 sps:$4 sm:$0xff]   ;;  %v3402_v28 = vld [vmem:[%s3921_s25 + $0x20] ss:$8 sps:$4 sm:$0xff]   ;;  %v3403_v29 = vld [vmem:[%s3921_s25 + $0x34] ss:$8 sps:$4 sm:$0xff]   ;;  %p3629_p10 = scmp.lt.s32.totalorder %s4298_s9, %s3627_s13  ;;  %p3630_p1 = scmp.lt.s32.totalorder %s3628_s15, %s3622_s22 }
  0x93   : > { %2718 = vmatpush3.bf16.msra.mxu1 %v3949_v5  ;;  %v3422_v26 = vld [vmem:[#allocation8 + $0x20] sm:$0xff]   ;;  %v3424_v30 = vld [vmem:[#allocation8 + $0x30] sm:$0xff]   ;;  %v3425_v31 = vld [vmem:[#allocation8 + $0x38] sm:$0xff]   ;;  %p3625_p9 = pneg %p3624_p8 }
  0x94   : > { %2719 = vmatprep.subr.bf16.mxu1 %v3952_v6  ;;  %v3405_v32 = vld [vmem:[%s3921_s25 + $0x30] ss:$8 sps:$4 sm:$0xff]   ;;  %v3406_v33 = vld [vmem:[%s3921_s25 + $0x44] ss:$8 sps:$4 sm:$0xff]   ;;  %v3408_v38 = vld [vmem:[%s3921_s25 + $0x40] ss:$8 sps:$4 sm:$0xff]   ;;  %p3631_p2 = por %p3630_p1, %p3629_p10 }
  0x95   : > { %3036 = vmatpush3.bf16.msra.mxu0 %v3419_v18  ;;  %v3428_v34 = vld [vmem:[#allocation7] sm:$0xff]   ;;  %v3427_v35 = vld [vmem:[%s3988_s23 + $0x8] sm:$0xff]   ;;  %v3430_v36 = vld [vmem:[%s3988_s23 + $0x10] sm:$0xff]  }
  0x96   : > { %3037 = vmatprep.subr.bf16.mxu0 %v3420_v21  ;;  %v3429_v37 = vld [vmem:[#allocation7 + $0x8] sm:$0xff]   ;;  %v3409_v39 = vld [vmem:[%s3921_s25 + $0x54] ss:$8 sps:$4 sm:$0xff]   ;;  %v3434_v42 = vld [vmem:[%s3988_s23 + $0x20] sm:$0xff]   ;;  %p3632_p3 = pnand %p3631_p2, %p3625_p9 }
  0x97   : > { %2720 = vmatpush3.bf16.msra.mxu1 %v3955_v7  ;;  %v3432_v40 = vld [vmem:[#allocation7 + $0x10] sm:$0xff]   ;;  %v3431_v41 = vld [vmem:[%s3988_s23 + $0x18] sm:$0xff]   ;;  %v3412_v45 = vld [vmem:[%s3921_s25 + $0x64] ss:$8 sps:$4 sm:$0xff]  }
  0x98   : > { %2721 = vmatprep.subr.bf16.mxu1 %v3958_v8  ;;  %v3433_v43 = vld [vmem:[#allocation7 + $0x18] sm:$0xff]   ;;  %v3435_v46 = vld [vmem:[%s3988_s23 + $0x28] sm:$0xff]   ;;  %v3436_v50 = vld [vmem:[#allocation7 + $0x20] sm:$0xff]  }
  0x99   : > { %3038 = vmatpush3.bf16.msra.mxu0 %v3420_v21  ;;  %v3411_v44 = vld [vmem:[%s3921_s25 + $0x50] ss:$8 sps:$4 sm:$0xff]   ;;  %v3414_v47 = vld [vmem:[%s3921_s25 + $0x60] ss:$8 sps:$4 sm:$0xff]   ;;  %v3415_v48 = vld [vmem:[%s3921_s25 + $0x74] ss:$8 sps:$4 sm:$0xff]  }
  0x9a   : > { %3039 = vmatprep.subr.bf16.mxu0 %v3421_v22  ;;  %v3417_v49 = vld [vmem:[%s3921_s25 + $0x70] ss:$8 sps:$4 sm:$0xff]   ;;  %v3437_v51 = vld [vmem:[#allocation7 + $0x28] sm:$0xff]   ;;  %v3445_v58 = vld [vmem:[%s3921_s25 + $0x114] ss:$8 sps:$4 sm:$0xff]  }
  0x9b   : > { %2722 = vmatpush3.bf16.msra.mxu1 %v3961_v9  ;;  %v3438_v52 = vld [vmem:[%s3988_s23 + $0x30] sm:$0xff]   ;;  %v3439_v53 = vld [vmem:[%s3988_s23 + $0x38] sm:$0xff]   ;;  %v3444_v56 = vld [vmem:[%s3921_s25 + $0x104] ss:$8 sps:$4 sm:$0xff]  }
  0x9c   : > { %2723 = vmatprep.subr.bf16.mxu1 %v3964_v10  ;;  %v3440_v54 = vld [vmem:[#allocation7 + $0x30] sm:$0xff]   ;;  %v3441_v55 = vld [vmem:[#allocation7 + $0x38] sm:$0xff]   ;;  %v3442_v57 = vld [vmem:[%s3921_s25 + $0x100] ss:$8 sps:$4 sm:$0xff]  }
  0x9d   : > { %3040 = vmatpush3.bf16.msra.mxu0 %v3421_v22  ;;  %v3447_v59 = vld [vmem:[%s3921_s25 + $0x110] ss:$8 sps:$4 sm:$0xff]   ;;  %v3448_v60 = vld [vmem:[%s3921_s25 + $0x124] ss:$8 sps:$4 sm:$0xff]   ;;  %v3450_v61 = vld [vmem:[%s3921_s25 + $0x120] ss:$8 sps:$4 sm:$0xff]  }
  0x9e   : > { %3041 = vmatprep.subr.bf16.mxu0 %v3422_v26  ;;  %v3451_v62 = vld [vmem:[%s3921_s25 + $0x134] ss:$8 sps:$4 sm:$0xff]   ;;  %v3453_v63 = vld [vmem:[%s3921_s25 + $0x130] ss:$8 sps:$4 sm:$0xff]   ;;  %v3459_v11 = vld [vmem:[%s3921_s25 + $0x140] ss:$8 sps:$4 sm:$0xff]  }
  0x9f   : > { %2724 = vmatpush3.bf16.msra.mxu1 %v3968_v12  ;;  %v3463_v17 = vld [vmem:[%s3921_s25 + $0x154] ss:$8 sps:$4 sm:$0xff]   ;;  %v3465_v18 = vld [vmem:[%s3921_s25 + $0x150] ss:$8 sps:$4 sm:$0xff]   ;;  %v3483_v23 = vld [vmem:[%s3921_s25 + $0x184] ss:$8 sps:$4 sm:$0xff]  }
  0xa0   : > { %2725 = vmatprep.subr.bf16.mxu1 %v3971_v13  ;;  %v3475_v21 = vld [vmem:[%s3921_s25 + $0x174] ss:$8 sps:$4 sm:$0xff]   ;;  %v3477_v22 = vld [vmem:[%s3921_s25 + $0x170] ss:$8 sps:$4 sm:$0xff]  }
  0xa1   : > { %3042 = vmatpush3.bf16.msra.mxu0 %v3422_v26  ;;  %v3489_v26 = vld [vmem:[%s3921_s25 + $0x190] ss:$8 sps:$4 sm:$0xff]  }
  0xa2   : > { %3043 = vmatprep.subr.bf16.mxu0 %v3423_v27 }
  0xa3   : > { %2726 = vmatpush3.bf16.msra.mxu1 %v3975_v14 }
  0xa4   : > { %2727 = vmatprep.subr.bf16.mxu1 %v3978_v15 }
  0xa5   : > { %3044 = vmatpush3.bf16.msra.mxu0 %v3423_v27  ;;  %v3493_v27 = vld [vmem:[%s3921_s25 + $0x1a4] ss:$8 sps:$4 sm:$0xff]  }
  0xa6   : > { %3045 = vmatprep.subr.bf16.mxu0 %v3424_v30 }
  0xa7   : > { %2728 = vmatpush3.bf16.msra.mxu1 %v3980_v16 }
  0xa8   : > { %2873 = vmatprep.subr.bf16.mxu1 %v3935_v0 }
  0xa9   : > { %3046 = vmatpush3.bf16.msra.mxu0 %v3424_v30 }
  0xaa   : > { %810 = vmatmul.mubr.bf16.vlgmr.msra.gmra.mrb[0].mxu1 %v3394_v19  ;;  %3047 = vmatprep.subr.bf16.mxu0 %v3425_v31  ;;  %v3469_v19 = vld [vmem:[%s3921_s25 + $0x164] ss:$8 sps:$4 sm:$0xff]  }
  0xab   : > { %817 = vmatprep.mubr.bf16.mxu1 %v3397_v20  ;;  %2874 = vmatpush3.bf16.msra.mxu1 %v3937_v1  ;;  %v3471_v20 = vld [vmem:[%s3921_s25 + $0x160] ss:$8 sps:$4 sm:$0xff]  }
  0xac   : > { %2875 = vmatprep.subr.bf16.mxu1 %v3940_v2 }
  0xad   : > { %3048 = vmatpush3.bf16.msra.mxu0 %v3425_v31  ;;  %v3501_v31 = vld [vmem:[%s3921_s25 + $0x1b0] ss:$8 sps:$4 sm:$0xff]  }
  0xae   : > { %3065 = vmatprep.subr.bf16.mxu0 %v3428_v34 }
  0xaf   : > { %2876 = vmatpush3.bf16.msra.mxu1 %v3943_v3 }
  0xb0   : > { %2877 = vmatprep.subr.bf16.mxu1 %v3946_v4  ;;  %3050 = vmatmul.mubr.bf16.vlgmr.msra.gmra.mrb[0].mxu0 %v3427_v35 }
  0xb1   : > { %3066 = vmatpush3.bf16.msra.mxu0 %v3428_v34  ;;  %3053 = vmatprep.mubr.bf16.mxu0 %v3430_v36 }
  0xb2   : > { %818 = vmatmul.mubr.bf16.gmra.mrb[4].mxu1 %v3399_v24  ;;  %3067 = vmatprep.subr.bf16.mxu0 %v3429_v37  ;;  %v3481_v24 = vld [vmem:[%s3921_s25 + $0x180] ss:$8 sps:$4 sm:$0xff]  }
  0xb3   : > { %825 = vmatprep.mubr.bf16.mxu1 %v3400_v25  ;;  %2878 = vmatpush3.bf16.msra.mxu1 %v3949_v5  ;;  %v3487_v25 = vld [vmem:[%s3921_s25 + $0x194] ss:$8 sps:$4 sm:$0xff]  }
  0xb4   : > { %2879 = vmatprep.subr.bf16.mxu1 %v3952_v6 }
  0xb5   : > { %3068 = vmatpush3.bf16.msra.mxu0 %v3429_v37 }
  0xb6   : > { %3069 = vmatprep.subr.bf16.mxu0 %v3432_v40 }
  0xb7   : > { %2880 = vmatpush3.bf16.msra.mxu1 %v3955_v7 }
  0xb8   : > { %2881 = vmatprep.subr.bf16.mxu1 %v3958_v8  ;;  %3054 = vmatmul.mubr.bf16.gmra.mrb[4].mxu0 %v3431_v41 }
  0xb9   : > { %3070 = vmatpush3.bf16.msra.mxu0 %v3432_v40  ;;  %3057 = vmatprep.mubr.bf16.mxu0 %v3434_v42  ;;  %v3505_v40 = vld [vmem:[%s3921_s25 + $0x1d4] ss:$8 sps:$4 sm:$0xff]  }
  0xba   : > { %826 = vmatmul.mubr.bf16.gmra.mrb[8].mxu1 %v3402_v28  ;;  %3071 = vmatprep.subr.bf16.mxu0 %v3433_v43  ;;  %v3495_v28 = vld [vmem:[%s3921_s25 + $0x1a0] ss:$8 sps:$4 sm:$0xff]  }
  0xbb   : > { %833 = vmatprep.mubr.bf16.mxu1 %v3403_v29  ;;  %2882 = vmatpush3.bf16.msra.mxu1 %v3961_v9  ;;  %v3499_v29 = vld [vmem:[%s3921_s25 + $0x1b4] ss:$8 sps:$4 sm:$0xff]  }
  0xbc   : > { %2883 = vmatprep.subr.bf16.mxu1 %v3964_v10 }
  0xbd   : > { %3072 = vmatpush3.bf16.msra.mxu0 %v3433_v43 }
  0xbe   : > { %3073 = vmatprep.subr.bf16.mxu0 %v3436_v50 }
  0xbf   : > { %2884 = vmatpush3.bf16.msra.mxu1 %v3968_v12 }
  0xc0   : > { %2885 = vmatprep.subr.bf16.mxu1 %v3971_v13  ;;  %3058 = vmatmul.mubr.bf16.gmra.mrb[8].mxu0 %v3435_v46 }
  0xc1   : > { %3074 = vmatpush3.bf16.msra.mxu0 %v3436_v50  ;;  %3061 = vmatprep.mubr.bf16.mxu0 %v3438_v52 }
  0xc2   : > { %834 = vmatmul.mubr.bf16.gmra.mrb[12].mxu1 %v3405_v32  ;;  %3075 = vmatprep.subr.bf16.mxu0 %v3437_v51  ;;  %v3502_v32 = vld [vmem:[%s3921_s25 + $0x1c4] ss:$8 sps:$4 sm:$0xff]  }
  0xc3   : > { %841 = vmatprep.mubr.bf16.mxu1 %v3406_v33  ;;  %2886 = vmatpush3.bf16.msra.mxu1 %v3975_v14 }
  0xc4   : > { %2887 = vmatprep.subr.bf16.mxu1 %v3978_v15 }
  0xc5   : > { %3076 = vmatpush3.bf16.msra.mxu0 %v3437_v51 }
  0xc6   : > { %3077 = vmatprep.subr.bf16.mxu0 %v3440_v54 }
  0xc7   : > { %2888 = vmatpush3.bf16.msra.mxu1 %v3980_v16 }
  0xc8   : > { %2953 = vmatprep.subr.bf16.mxu1 %v3935_v0  ;;  %3062 = vmatmul.mubr.bf16.gmra.mrb[12].mxu0 %v3439_v53 }
  0xc9   : > { %3078 = vmatpush3.bf16.msra.mxu0 %v3440_v54 }
  0xca   : > { %842 = vmatmul.mubr.bf16.gmra.mrb[16].mxu1 %v3408_v38  ;;  %3079 = vmatprep.subr.bf16.mxu0 %v3441_v55 }
  0xcb   : > { %849 = vmatprep.mubr.bf16.mxu1 %v3409_v39  ;;  %v3504_v39 = vld [vmem:[%s3921_s25 + $0x1c0] ss:$8 sps:$4 sm:$0xff]  }
  0xcd   : > { %3080 = vmatpush3.bf16.msra.mxu0 %v3441_v55 }
  0xce   : > { %2793 = vmatprep.subr.bf16.mxu0 %v3935_v0  ;;  %v3457_v0 = vld [vmem:[%s3921_s25 + $0x144] ss:$8 sps:$4 sm:$0xff]  }
  0xd2   : > { %850 = vmatmul.mubr.bf16.gmra.mrb[20].mxu1 %v3411_v44 }
  0xd3   : > { %857 = vmatprep.mubr.bf16.mxu1 %v3412_v45 }
  0xda   : > { %858 = vmatmul.mubr.bf16.gmra.mrb[24].mxu1 %v3414_v47 }
  0xdb   : > { %865 = vmatprep.mubr.bf16.mxu1 %v3415_v48  ;;  %v3507_v48 = vld [vmem:[%s3921_s25 + $0x1d0] ss:$8 sps:$4 sm:$0xff]  }
  0xe2   : > { %866 = vmatmul.mubr.bf16.gmra.mrb[28].mxu1 %v3417_v49  ;;  %v3508_v49 = vld [vmem:[%s3921_s25 + $0x1e4] ss:$8 sps:$4 sm:$0xff]  }
  0xe3   : > { %1568 = vmatprep.mubr.bf16.mxu1 %v3444_v56 }
  0xea   : > { %1569 = vmatmul.mubr.bf16.vlgmr.msra.gmra.mrb[32].mxu1 %v3442_v57  ;;  %v3510_v57 = vld [vmem:[%s3921_s25 + $0x1e0] ss:$8 sps:$4 sm:$0xff]  }
  0xeb   : > { %2954 = vmatpush3.bf16.msra.mxu1 %v3937_v1  ;;  %1576 = vmatprep.mubr.bf16.mxu1 %v3445_v58  ;;  %v3511_v58 = vld [vmem:[%s3921_s25 + $0x1f4] ss:$8 sps:$4 sm:$0xff]  }
  0xec   : > { %2955 = vmatprep.subr.bf16.mxu1 %v3940_v2 }
  0xef   : > { %2956 = vmatpush3.bf16.msra.mxu1 %v3943_v3 }
  0xf0   : > { %2957 = vmatprep.subr.bf16.mxu1 %v3946_v4 }
  0xf2   : > { %1577 = vmatmul.mubr.bf16.gmra.mrb[36].mxu1 %v3447_v59 }
  0xf3   : > { %2958 = vmatpush3.bf16.msra.mxu1 %v3949_v5  ;;  %1584 = vmatprep.mubr.bf16.mxu1 %v3448_v60 }
  0xf4   : > { %2959 = vmatprep.subr.bf16.mxu1 %v3952_v6 }
  0xf7   : > { %2960 = vmatpush3.bf16.msra.mxu1 %v3955_v7 }
  0xf8   : > { %2961 = vmatprep.subr.bf16.mxu1 %v3958_v8 }
  0xfa   : > { %1585 = vmatmul.mubr.bf16.gmra.mrb[40].mxu1 %v3450_v61 }
  0xfb   : > { %2962 = vmatpush3.bf16.msra.mxu1 %v3961_v9  ;;  %1592 = vmatprep.mubr.bf16.mxu1 %v3451_v62 }
  0xfc   : > { %2963 = vmatprep.subr.bf16.mxu1 %v3964_v10 }
  0xff   : > { %2964 = vmatpush3.bf16.msra.mxu1 %v3968_v12 }
 0x100   : > { %2965 = vmatprep.subr.bf16.mxu1 %v3971_v13 }
 0x102   : > { %1593 = vmatmul.mubr.bf16.gmra.mrb[44].mxu1 %v3453_v63 }
 0x103   : > { %2966 = vmatpush3.bf16.msra.mxu1 %v3975_v14  ;;  %1600 = vmatprep.mubr.bf16.mxu1 %v3457_v0 }
 0x104   : > { %2967 = vmatprep.subr.bf16.mxu1 %v3978_v15 }
 0x107   : > { %2968 = vmatpush3.bf16.msra.mxu1 %v3980_v16 }
 0x10a   : > { %1601 = vmatmul.mubr.bf16.gmra.mrb[48].mxu1 %v3459_v11 }
 0x10b   : > { %1608 = vmatprep.mubr.bf16.mxu1 %v3463_v17 }
 0x112   : > { %1609 = vmatmul.mubr.bf16.gmra.mrb[52].mxu1 %v3465_v18 }
 0x113   : > { %1616 = vmatprep.mubr.bf16.mxu1 %v3469_v19 }
 0x11a   : > { %1617 = vmatmul.mubr.bf16.gmra.mrb[56].mxu1 %v3471_v20 }
 0x11b   : > { %1624 = vmatprep.mubr.bf16.mxu1 %v3475_v21 }
 0x122   : > { %1625 = vmatmul.mubr.bf16.gmra.mrb[60].mxu1 %v3477_v22 }
 0x123   : > { %1948 = vmatprep.mubr.bf16.mxu1 %v3483_v23 }
 0x12a   : > { %1949 = vmatmul.mubr.bf16.vlgmr.msra.gmra.mrb[64].mxu1 %v3481_v24 }
 0x12b   : > { %1956 = vmatprep.mubr.bf16.mxu1 %v3487_v25 }
 0x132   : > { %1957 = vmatmul.mubr.bf16.gmra.mrb[68].mxu1 %v3489_v26 }
 0x133   : > { %1964 = vmatprep.mubr.bf16.mxu1 %v3493_v27 }
 0x13a   : > { %1965 = vmatmul.mubr.bf16.gmra.mrb[72].mxu1 %v3495_v28 }
 0x13b   : > { %1972 = vmatprep.mubr.bf16.mxu1 %v3499_v29 }
 0x142   : > { %1973 = vmatmul.mubr.bf16.gmra.mrb[76].mxu1 %v3501_v31  ;;  %v3456_v31 = vld [vmem:[%s3921_s25 + $0x84] ss:$8 sps:$4 sm:$0xff]  }
 0x143   : > { %1980 = vmatprep.mubr.bf16.mxu1 %v3502_v32 }
 0x14a   : > { %1981 = vmatmul.mubr.bf16.gmra.mrb[80].mxu1 %v3504_v39  ;;  %v3517_v39 = vld [vmem:[#allocation7 + $0x58] sm:$0xff]  }
 0x14b   : > { %1988 = vmatprep.mubr.bf16.mxu1 %v3505_v40  ;;  %v3468_v40 = vld [vmem:[%s3921_s25 + $0xa0] ss:$8 sps:$4 sm:$0xff]  }
 0x152   : > { %1989 = vmatmul.mubr.bf16.gmra.mrb[84].mxu1 %v3507_v48  ;;  %v3492_v48 = vld [vmem:[%s3921_s25 + $0xe0] ss:$8 sps:$4 sm:$0xff]  }
 0x153   : > { %1996 = vmatprep.mubr.bf16.mxu1 %v3508_v49  ;;  %v3496_v49 = vld [vmem:[%s3921_s25 + $0xf4] ss:$8 sps:$4 sm:$0xff]  }
 0x15a   : > { %1997 = vmatmul.mubr.bf16.gmra.mrb[88].mxu1 %v3510_v57 }
 0x15b   : > { %2004 = vmatprep.mubr.bf16.mxu1 %v3511_v58 }
 0x17d   : > { %v2729_v30 = vpop.f32.mrb[0].mxu1 }
 0x17e   : > { %v2730_v33 = vpop.f32.mrb[1].mxu1 }
 0x17f   : > { %v2731_v34 = vadd.f32 %v2730_v33, %v2729_v30  ;;  %v2732_v35 = vpop.f32.mrb[2].mxu1  ;;  %v3454_v33 = vld [vmem:[%s3921_s25 + $0x80] ss:$8 sps:$4 sm:$0xff]  }
 0x180   : > { %v2733_v36 = vpop.f32.mrb[3].mxu1 }
 0x181   : > { %v2734_v37 = vadd.f32 %v2733_v36, %v2732_v35  ;;  %v3515_v35 = vld [vmem:[#allocation7 + $0x48] sm:$0xff]   ;;  %v3516_v36 = vld [vmem:[#allocation7 + $0x50] sm:$0xff]  }
 0x183   : > { %v874_v38 = vpack.c.bf16 %v2734_v37, %v2731_v34  ;;  %v3460_v34 = vld [vmem:[%s3921_s25 + $0x94] ss:$8 sps:$4 sm:$0xff]   ;;  %v3462_v37 = vld [vmem:[%s3921_s25 + $0x90] ss:$8 sps:$4 sm:$0xff]  }
 0x185   : > { %v2735_v41 = vpop.f32.mrb[4].mxu1  ;;  %3081 = vmatprep.mubr.bf16.mxu0 %v874_v38  ;;  %v3466_v38 = vld [vmem:[%s3921_s25 + $0xa4] ss:$8 sps:$4 sm:$0xff]  }
 0x186   : > { %v2736_v42 = vpop.f32.mrb[5].mxu1 }
 0x187   : > { %v2737_v43 = vadd.f32 %v2736_v42, %v2735_v41  ;;  %v2738_v44 = vpop.f32.mrb[6].mxu1  ;;  %v3472_v41 = vld [vmem:[%s3921_s25 + $0xb4] ss:$8 sps:$4 sm:$0xff]   ;;  %v3474_v42 = vld [vmem:[%s3921_s25 + $0xb0] ss:$8 sps:$4 sm:$0xff]  }
 0x188   : > { %v2739_v45 = vpop.f32.mrb[7].mxu1 }
 0x189   : > { %v2740_v46 = vadd.f32 %v2739_v45, %v2738_v44  ;;  %v3480_v44 = vld [vmem:[%s3921_s25 + $0xc0] ss:$8 sps:$4 sm:$0xff]   ;;  %v3484_v45 = vld [vmem:[%s3921_s25 + $0xd4] ss:$8 sps:$4 sm:$0xff]  }
 0x18b   : > { %v875_v47 = vpack.c.bf16 %v2740_v46, %v2737_v43  ;;  %v3478_v43 = vld [vmem:[%s3921_s25 + $0xc4] ss:$8 sps:$4 sm:$0xff]   ;;  %v3486_v46 = vld [vmem:[%s3921_s25 + $0xd0] ss:$8 sps:$4 sm:$0xff]  }
 0x18d   : > { %v2741_v50 = vpop.f32.mrb[8].mxu1  ;;  %3082 = vmatmul.mubr.bf16.vlgmr.msra.gmra.mrb[0].mxu0 %v875_v47  ;;  %v3490_v47 = vld [vmem:[%s3921_s25 + $0xe4] ss:$8 sps:$4 sm:$0xff]  }
 0x18e   : > { %v2742_v51 = vpop.f32.mrb[9].mxu1  ;;  %2794 = vmatpush3.bf16.msra.mxu0 %v3937_v1 }
 0x18f   : > { %v2743_v52 = vadd.f32 %v2742_v51, %v2741_v50  ;;  %v2744_v53 = vpop.f32.mrb[10].mxu1  ;;  %2795 = vmatprep.subr.bf16.mxu0 %v3940_v2  ;;  %v3498_v50 = vld [vmem:[%s3921_s25 + $0xf0] ss:$8 sps:$4 sm:$0xff]  }
 0x190   : > { %v2745_v54 = vpop.f32.mrb[11].mxu1 }
 0x191   : > { %v2746_v55 = vadd.f32 %v2745_v54, %v2744_v53 }
 0x192   : > { %2796 = vmatpush3.bf16.msra.mxu0 %v3943_v3 }
 0x193   : > { %v876_v56 = vpack.c.bf16 %v2746_v55, %v2743_v52  ;;  %2797 = vmatprep.subr.bf16.mxu0 %v3946_v4  ;;  %v3513_v4 = vld [vmem:[%s3921_s25 + $0x1f0] ss:$8 sps:$4 sm:$0xff]  }
 0x194   : > { %2005 = vmatmul.mubr.bf16.gmra.mrb[92].mxu1 %v3513_v4 }
 0x195   : > { %v2747_v59 = vpop.f32.mrb[12].mxu1  ;;  %3085 = vmatprep.mubr.bf16.mxu0 %v876_v56 }
 0x196   : > { %v2748_v60 = vpop.f32.mrb[13].mxu1  ;;  %2798 = vmatpush3.bf16.msra.mxu0 %v3949_v5 }
 0x197   : > { %v2749_v1 = vadd.f32 %v2748_v60, %v2747_v59  ;;  %v2750_v61 = vpop.f32.mrb[14].mxu1  ;;  %2799 = vmatprep.subr.bf16.mxu0 %v3952_v6 }
 0x198   : > { %v2751_v2 = vpop.f32.mrb[15].mxu1 }
 0x199   : > { %v2752_v62 = vadd.f32 %v2751_v2, %v2750_v61 }
 0x19a   : > { %2800 = vmatpush3.bf16.msra.mxu0 %v3955_v7 }
 0x19b   : > { %v877_v3 = vpack.c.bf16 %v2752_v62, %v2749_v1  ;;  %2801 = vmatprep.subr.bf16.mxu0 %v3958_v8 }
 0x19d   : > { %v2753_v63 = vpop.f32.mrb[16].mxu1  ;;  %3086 = vmatmul.mubr.bf16.gmra.mrb[4].mxu0 %v877_v3 }
 0x19e   : > { %v2754_v0 = vpop.f32.mrb[17].mxu1  ;;  %2802 = vmatpush3.bf16.msra.mxu0 %v3961_v9  ;;  %v3514_v9 = vld [vmem:[#allocation7 + $0x40] sm:$0xff]  }
 0x19f   : > { %v2755_v5 = vadd.f32 %v2754_v0, %v2753_v63  ;;  %v2756_v11 = vpop.f32.mrb[18].mxu1  ;;  %2803 = vmatprep.subr.bf16.mxu0 %v3964_v10 }
 0x1a0   : > { %v2757_v6 = vpop.f32.mrb[19].mxu1 }
 0x1a1   : > { %v2758_v17 = vadd.f32 %v2757_v6, %v2756_v11 }
 0x1a2   : > { %2804 = vmatpush3.bf16.msra.mxu0 %v3968_v12 }
 0x1a3   : > { %v878_v18 = vpack.c.bf16 %v2758_v17, %v2755_v5  ;;  %2805 = vmatprep.subr.bf16.mxu0 %v3971_v13  ;;  %v3518_v5 = vld [vmem:[#allocation7 + $0x60] sm:$0xff]   ;;  %v3519_v17 = vld [vmem:[#allocation7 + $0x68] sm:$0xff]  }
 0x1a5   : > { %v2759_v7 = vpop.f32.mrb[20].mxu1  ;;  %3089 = vmatprep.mubr.bf16.mxu0 %v878_v18 }
 0x1a6   : > { %v2760_v8 = vpop.f32.mrb[21].mxu1  ;;  %2806 = vmatpush3.bf16.msra.mxu0 %v3975_v14 }
 0x1a7   : > { %v2761_v19 = vadd.f32 %v2760_v8, %v2759_v7  ;;  %v2762_v20 = vpop.f32.mrb[22].mxu1  ;;  %2807 = vmatprep.subr.bf16.mxu0 %v3978_v15 }
 0x1a8   : > { %v2763_v21 = vpop.f32.mrb[23].mxu1 }
 0x1a9   : > { %v2764_v10 = vadd.f32 %v2763_v21, %v2762_v20 }
 0x1aa   : > { %2808 = vmatpush3.bf16.msra.mxu0 %v3980_v16 }
 0x1ab   : > { %v879_v22 = vpack.c.bf16 %v2764_v10, %v2761_v19  ;;  %3097 = vmatprep.subr.bf16.mxu0 %v3514_v9  ;;  %v3520_v19 = vld [vmem:[#allocation7 + $0x70] sm:$0xff]  }
 0x1ad   : > { %v2765_v12 = vpop.f32.mrb[24].mxu1  ;;  %3090 = vmatmul.mubr.bf16.gmra.mrb[8].mxu0 %v879_v22  ;;  %v3521_v22 = vld [vmem:[#allocation7 + $0x78] sm:$0xff]  }
 0x1ae   : > { %v2766_v13 = vpop.f32.mrb[25].mxu1 }
 0x1af   : > { %v2767_v23 = vadd.f32 %v2766_v13, %v2765_v12  ;;  %v2768_v24 = vpop.f32.mrb[26].mxu1 }
 0x1b0   : > { %v2769_v14 = vpop.f32.mrb[27].mxu1 }
 0x1b1   : > { %v2770_v25 = vadd.f32 %v2769_v14, %v2768_v24 }
 0x1b3   : > { %v880_v26 = vpack.c.bf16 %v2770_v25, %v2767_v23 }
 0x1b5   : > { %v2771_v27 = vpop.f32.mrb[28].mxu1  ;;  %3093 = vmatprep.mubr.bf16.mxu0 %v880_v26 }
 0x1b6   : > { %v2772_v15 = vpop.f32.mrb[29].mxu1 }
 0x1b7   : > { %v2773_v28 = vadd.f32 %v2772_v15, %v2771_v27  ;;  %v2774_v29 = vpop.f32.mrb[30].mxu1 }
 0x1b8   : > { %v2775_v16 = vpop.f32.mrb[31].mxu1 }
 0x1b9   : > { %v2776_v30 = vadd.f32 %v2775_v16, %v2774_v29 }
 0x1bb   : > { %v881_v32 = vpack.c.bf16 %v2776_v30, %v2773_v28 }
 0x1bd   : > { %3094 = vmatmul.mubr.bf16.gmra.mrb[12].mxu0 %v881_v32  ;;  %v2889_v51 = vpop.f32.mrb[32].mxu1 }
 0x1be   : > { %1188 = vmatprep.mubr.bf16.mxu0 %v3456_v31  ;;  %v2890_v52 = vpop.f32.mrb[33].mxu1 }
 0x1bf   : > { %v4106_v53 = vadd.f32 %v2890_v52, %v2889_v51  ;;  %v2892_v54 = vpop.f32.mrb[34].mxu1  ;;  %v4161_v51 = vld [vmem:[#allocation7 + $0xc8] sm:$0xff]  }
 0x1c0   : > { %v2893_v55 = vpop.f32.mrb[35].mxu1 }
 0x1c1   : > { %v4108_v56 = vadd.f32 %v2893_v55, %v2892_v54 }
 0x1c3   : > { %v1633_v57 = vpack.c.bf16 %v4108_v56, %v4106_v53 }
 0x1c5   : > { %1189 = vmatmul.mubr.bf16.vlgmr.msra.gmra.mrb[16].mxu0 %v3454_v33  ;;  %v2895_v58 = vpop.f32.mrb[36].mxu1 }
 0x1c6   : > { %1196 = vmatprep.mubr.bf16.mxu0 %v3460_v34  ;;  %3098 = vmatpush3.bf16.msra.mxu0 %v3514_v9  ;;  %v2896_v59 = vpop.f32.mrb[37].mxu1 }
 0x1c7   : > { %3099 = vmatprep.subr.bf16.mxu0 %v3515_v35  ;;  %v4112_v60 = vadd.f32 %v2896_v59, %v2895_v58  ;;  %v2898_v1 = vpop.f32.mrb[38].mxu1 }
 0x1c8   : > { %v2899_v61 = vpop.f32.mrb[39].mxu1 }
 0x1c9   : > { %v4114_v2 = vadd.f32 %v2899_v61, %v2898_v1 }
 0x1ca   : > { %3100 = vmatpush3.bf16.msra.mxu0 %v3515_v35 }
 0x1cb   : > { %3101 = vmatprep.subr.bf16.mxu0 %v3516_v36  ;;  %v1634_v62 = vpack.c.bf16 %v4114_v2, %v4112_v60 }
 0x1cd   : > { %1197 = vmatmul.mubr.bf16.gmra.mrb[20].mxu0 %v3462_v37  ;;  %v2901_v3 = vpop.f32.mrb[40].mxu1 }
 0x1ce   : > { %1204 = vmatprep.mubr.bf16.mxu0 %v3466_v38  ;;  %3102 = vmatpush3.bf16.msra.mxu0 %v3516_v36  ;;  %v2902_v4 = vpop.f32.mrb[41].mxu1 }
 0x1cf   : > { %3103 = vmatprep.subr.bf16.mxu0 %v3517_v39  ;;  %v4118_v63 = vadd.f32 %v2902_v4, %v2901_v3  ;;  %v2904_v0 = vpop.f32.mrb[42].mxu1  ;;  %v4171_v3 = vld [vmem:[#allocation7 + $0xd0] sm:$0xff]  }
 0x1d0   : > { %v2905_v11 = vpop.f32.mrb[43].mxu1 }
 0x1d1   : > { %v4120_v6 = vadd.f32 %v2905_v11, %v2904_v0 }
 0x1d2   : > { %3104 = vmatpush3.bf16.msra.mxu0 %v3517_v39 }
 0x1d3   : > { %3105 = vmatprep.subr.bf16.mxu0 %v3518_v5  ;;  %v1635_v18 = vpack.c.bf16 %v4120_v6, %v4118_v63 }
 0x1d5   : > { %1205 = vmatmul.mubr.bf16.gmra.mrb[24].mxu0 %v3468_v40  ;;  %v2907_v7 = vpop.f32.mrb[44].mxu1 }
 0x1d6   : > { %1212 = vmatprep.mubr.bf16.mxu0 %v3472_v41  ;;  %3106 = vmatpush3.bf16.msra.mxu0 %v3518_v5  ;;  %v2908_v8 = vpop.f32.mrb[45].mxu1 }
 0x1d7   : > { %3107 = vmatprep.subr.bf16.mxu0 %v3519_v17  ;;  %v4124_v20 = vadd.f32 %v2908_v8, %v2907_v7  ;;  %v2910_v9 = vpop.f32.mrb[46].mxu1 }
 0x1d8   : > { %v2911_v21 = vpop.f32.mrb[47].mxu1 }
 0x1d9   : > { %v4126_v10 = vadd.f32 %v2911_v21, %v2910_v9 }
 0x1da   : > { %3108 = vmatpush3.bf16.msra.mxu0 %v3519_v17 }
 0x1db   : > { %3109 = vmatprep.subr.bf16.mxu0 %v3520_v19  ;;  %v1636_v12 = vpack.c.bf16 %v4126_v10, %v4124_v20  ;;  %v4269_v10 = vld [vmem:[%s4353_s4] ss:$0 sm:$0xff] }
 0x1dd   : > { %1213 = vmatmul.mubr.bf16.gmra.mrb[28].mxu0 %v3474_v42  ;;  %v2913_v13 = vpop.f32.mrb[48].mxu1  ;;  %v4148_v42 = vld [vmem:[#allocation7 + $0x80] sm:$0xff]  }
 0x1de   : > { %1220 = vmatprep.mubr.bf16.mxu0 %v3478_v43  ;;  %3110 = vmatpush3.bf16.msra.mxu0 %v3520_v19  ;;  %v2914_v23 = vpop.f32.mrb[49].mxu1  ;;  %v4150_v43 = vld [vmem:[#allocation7 + $0xc0] sm:$0xff]   ;;  %v4181_v19 = vld [vmem:[#allocation7 + $0xd8] sm:$0xff]  }
 0x1df   : > { %3111 = vmatprep.subr.bf16.mxu0 %v3521_v22  ;;  %v4130_v24 = vadd.f32 %v2914_v23, %v2913_v13  ;;  %v2916_v14 = vpop.f32.mrb[50].mxu1  ;;  %3193 = vmatprep.subr.bf16.mxu1 %v4150_v43 }
 0x1e0   : > { %v2917_v25 = vpop.f32.mrb[51].mxu1  ;;  %3201 = vmatpush3.bf16.msra.mxu1 %v4150_v43 }
 0x1e1   : > { %v4132_v26 = vadd.f32 %v2917_v25, %v2916_v14  ;;  %3194 = vmatprep.subr.bf16.mxu1 %v4161_v51  ;;  %v4189_v14 = vld [vmem:[#allocation7 + $0xe0] sm:$0xff]  }
 0x1e2   : > { %3112 = vmatpush3.bf16.msra.mxu0 %v3521_v22 }
 0x1e3   : > { %v1637_v27 = vpack.c.bf16 %v4132_v26, %v4130_v24  ;;  %3129 = vmatprep.subr.bf16.mxu0 %v4148_v42 }
 0x1e4   : > { %3202 = vmatpush3.bf16.msra.mxu1 %v4161_v51 }
 0x1e5   : > { %1221 = vmatmul.mubr.bf16.gmra.mrb[32].mxu0 %v3480_v44  ;;  %v2919_v15 = vpop.f32.mrb[52].mxu1  ;;  %3195 = vmatprep.subr.bf16.mxu1 %v4171_v3 }
 0x1e6   : > { %1228 = vmatprep.mubr.bf16.mxu0 %v3484_v45  ;;  %v2920_v28 = vpop.f32.mrb[53].mxu1 }
 0x1e7   : > { %v4136_v29 = vadd.f32 %v2920_v28, %v2919_v15  ;;  %v2922_v16 = vpop.f32.mrb[54].mxu1 }
 0x1e8   : > { %v2923_v30 = vpop.f32.mrb[55].mxu1  ;;  %3203 = vmatpush3.bf16.msra.mxu1 %v4171_v3 }
 0x1e9   : > { %v4138_v31 = vadd.f32 %v2923_v30, %v2922_v16  ;;  %3196 = vmatprep.subr.bf16.mxu1 %v4181_v19 }
 0x1eb   : > { %v1638_v32 = vpack.c.bf16 %v4138_v31, %v4136_v29 }
 0x1ec   : > { %3204 = vmatpush3.bf16.msra.mxu1 %v4181_v19 }
 0x1ed   : > { %1229 = vmatmul.mubr.bf16.gmra.mrb[36].mxu0 %v3486_v46  ;;  %v2925_v33 = vpop.f32.mrb[56].mxu1  ;;  %3197 = vmatprep.subr.bf16.mxu1 %v4189_v14 }
 0x1ee   : > { %1236 = vmatprep.mubr.bf16.mxu0 %v3490_v47  ;;  %v2926_v34 = vpop.f32.mrb[57].mxu1 }
 0x1ef   : > { %v4142_v35 = vadd.f32 %v2926_v34, %v2925_v33  ;;  %v2928_v36 = vpop.f32.mrb[58].mxu1 }
 0x1f0   : > { %v2929_v37 = vpop.f32.mrb[59].mxu1  ;;  %3205 = vmatpush3.bf16.msra.mxu1 %v4189_v14 }
 0x1f1   : > { %v4144_v38 = vadd.f32 %v2929_v37, %v2928_v36  ;;  %v4201_v36 = vld [vmem:[#allocation7 + $0xe8] sm:$0xff]  }
 0x1f2   : > { %3198 = vmatprep.subr.bf16.mxu1 %v4201_v36 }
 0x1f3   : > { %v1639_v39 = vpack.c.bf16 %v4144_v38, %v4142_v35 }
 0x1f4   : > { %3206 = vmatpush3.bf16.msra.mxu1 %v4201_v36 }
 0x1f5   : > { %1237 = vmatmul.mubr.bf16.gmra.mrb[40].mxu0 %v3492_v48  ;;  %v2931_v40 = vpop.f32.mrb[60].mxu1 }
 0x1f6   : > { %1244 = vmatprep.mubr.bf16.mxu0 %v3496_v49  ;;  %v2932_v41 = vpop.f32.mrb[61].mxu1 }
 0x1f7   : > { %v4152_v44 = vadd.f32 %v2932_v41, %v2931_v40  ;;  %v2934_v45 = vpop.f32.mrb[62].mxu1 }
 0x1f8   : > { %v2935_v46 = vpop.f32.mrb[63].mxu1 }
 0x1f9   : > { %v4156_v47 = vadd.f32 %v2935_v46, %v2934_v45 }
 0x1fb   : > { %v1640_v48 = vpack.c.bf16 %v4156_v47, %v4152_v44 }
 0x1fd   : > { %1245 = vmatmul.mubr.bf16.gmra.mrb[44].mxu0 %v3498_v50  ;;  %v2969_v49 = vpop.f32.mrb[64].mxu1 }
 0x1fe   : > { %v2970_v50 = vpop.f32.mrb[65].mxu1 }
 0x1ff   : > { %v4163_v52 = vadd.f32 %v2970_v50, %v2969_v49  ;;  %v2972_v54 = vpop.f32.mrb[66].mxu1  ;;  %v4205_v49 = vld [vmem:[#allocation7 + $0xf0] sm:$0xff]  }
 0x200   : > { %v2973_v55 = vpop.f32.mrb[67].mxu1  ;;  %3199 = vmatprep.subr.bf16.mxu1 %v4205_v49 }
 0x201   : > { %v4166_v58 = vadd.f32 %v2973_v55, %v2972_v54  ;;  %3207 = vmatpush3.bf16.msra.mxu1 %v4205_v49 }
 0x203   : > { %v2013_v59 = vpack.c.bf16 %v4166_v58, %v4163_v52 }
 0x205   : > { %v2975_v1 = vpop.f32.mrb[68].mxu1 }
 0x206   : > { %v2976_v61 = vpop.f32.mrb[69].mxu1 }
 0x207   : > { %v4173_v4 = vadd.f32 %v2976_v61, %v2975_v1  ;;  %v2978_v0 = vpop.f32.mrb[70].mxu1 }
 0x208   : > { %v2979_v5 = vpop.f32.mrb[71].mxu1 }
 0x209   : > { %v4176_v11 = vadd.f32 %v2979_v5, %v2978_v0  ;;  %v4209_v5 = vld [vmem:[#allocation7 + $0xf8] sm:$0xff]  }
 0x20a   : > { %3200 = vmatprep.subr.bf16.mxu1 %v4209_v5 }
 0x20b   : > { %v2014_v17 = vpack.c.bf16 %v4176_v11, %v4173_v4  ;;  %3208 = vmatpush3.bf16.msra.mxu1 %v4209_v5 }
 0x20d   : > { %v2981_v7 = vpop.f32.mrb[72].mxu1 }
 0x20e   : > { %v2982_v8 = vpop.f32.mrb[73].mxu1 }
 0x20f   : > { %v4183_v9 = vadd.f32 %v2982_v8, %v2981_v7  ;;  %v2984_v21 = vpop.f32.mrb[74].mxu1 }
 0x210   : > { %v2985_v22 = vpop.f32.mrb[75].mxu1 }
 0x211   : > { %v4186_v13 = vadd.f32 %v2985_v22, %v2984_v21 }
 0x213   : > { %v4380_v53 = vpack.c.bf16 %v4186_v13, %v4183_v9 }
 0x215   : > { %v2987_v23 = vpop.f32.mrb[76].mxu1 }
 0x216   : > { %v2988_v25 = vpop.f32.mrb[77].mxu1 }
 0x217   : > { %v4193_v28 = vadd.f32 %v2988_v25, %v2987_v23  ;;  %v2990_v16 = vpop.f32.mrb[78].mxu1 }
 0x218   : > { %v2991_v30 = vpop.f32.mrb[79].mxu1 }
 0x219   : > { %v4197_v33 = vadd.f32 %v2991_v30, %v2990_v16 }
 0x21b   : > { %v4381_v56 = vpack.c.bf16 %v4197_v33, %v4193_v28 }
 0x21d   : > { %v2993_v37 = vpop.f32.mrb[80].mxu1 }
 0x21e   : > { %v2994_v40 = vpop.f32.mrb[81].mxu1 }
 0x21f   : > { %v2995_v41 = vadd.f32 %v2994_v40, %v2993_v37  ;;  %v2996_v45 = vpop.f32.mrb[82].mxu1 }
 0x220   : > { %v2997_v46 = vpop.f32.mrb[83].mxu1 }
 0x221   : > { %v2998_v50 = vadd.f32 %v2997_v46, %v2996_v45 }
 0x223   : > { %v2017_v1 = vpack.c.bf16 %v2998_v50, %v2995_v41 }
 0x225   : > { %v2999_v54 = vpop.f32.mrb[84].mxu1  ;;  %3185 = vmatprep.mubr.bf16.mxu1 %v2017_v1 }
 0x226   : > { %v3000_v55 = vpop.f32.mrb[85].mxu1 }
 0x227   : > { %v3001_v61 = vadd.f32 %v3000_v55, %v2999_v54  ;;  %v3002_v0 = vpop.f32.mrb[86].mxu1 }
 0x228   : > { %v3003_v7 = vpop.f32.mrb[87].mxu1 }
 0x229   : > { %v3004_v8 = vadd.f32 %v3003_v7, %v3002_v0 }
 0x22b   : > { %v2018_v23 = vpack.c.bf16 %v3004_v8, %v3001_v61 }
 0x22d   : > { %v3005_v21 = vpop.f32.mrb[88].mxu1  ;;  %3186 = vmatmul.mubr.bf16.vlgmr.msra.gmra.mrb[96].mxu1 %v2018_v23 }
 0x22e   : > { %v3006_v22 = vpop.f32.mrb[89].mxu1 }
 0x22f   : > { %v3007_v25 = vadd.f32 %v3006_v22, %v3005_v21  ;;  %v3008_v16 = vpop.f32.mrb[90].mxu1 }
 0x230   : > { %v3009_v30 = vpop.f32.mrb[91].mxu1 }
 0x231   : > { %v3010_v37 = vadd.f32 %v3009_v30, %v3008_v16 }
 0x233   : > { %v2019_v45 = vpack.c.bf16 %v3010_v37, %v3007_v25 }
 0x235   : > { %3189 = vmatprep.mubr.bf16.mxu1 %v2019_v45 }
 0x267   : > { %v3011_v40 = vpop.f32.mrb[92].mxu1 }
 0x268   : > { %v3012_v41 = vpop.f32.mrb[93].mxu1 }
 0x269   : > { %v3013_v46 = vadd.f32 %v3012_v41, %v3011_v40  ;;  %v3014_v50 = vpop.f32.mrb[94].mxu1  ;;  %v3524_v41 = vld [vmem:[#allocation7 + $0x88] sm:$0xff]  }
 0x26a   : > { %v3015_v54 = vpop.f32.mrb[95].mxu1 }
 0x26b   : > { %v3016_v55 = vadd.f32 %v3015_v54, %v3014_v50 }
 0x26d   : > { %v2020_v1 = vpack.c.bf16 %v3016_v55, %v3013_v46  ;;  %v3525_v55 = vld [vmem:[#allocation7 + $0x90] sm:$0xff]  }
 0x26f   : > { %3190 = vmatmul.mubr.bf16.gmra.mrb[100].mxu1 %v2020_v1 }
 0x298   : > { %v2809_v0 = vpop.f32.mrb[16].mxu0 }
 0x299   : > { %v2810_v7 = vpop.f32.mrb[17].mxu0 }
 0x29a   : > { %v2811_v34 = vadd.f32 %v2810_v7, %v2809_v0  ;;  %v2812_v15 = vpop.f32.mrb[18].mxu0  ;;  %v3527_v0 = vld [vmem:[#allocation7 + $0x98] sm:$0xff]  }
 0x29b   : > { %v2813_v61 = vpop.f32.mrb[19].mxu0 }
 0x29c   : > { %v2814_v8 = vadd.f32 %v2813_v61, %v2812_v15 }
 0x29e   : > { %v1253_v21 = vpack.c.bf16 %v2814_v8, %v2811_v34 }
 0x2a0   : > { %v2815_v22 = vpop.f32.mrb[20].mxu0  ;;  %3113 = vmatprep.mubr.bf16.mxu0 %v1253_v21 }
 0x2a1   : > { %v2816_v16 = vpop.f32.mrb[21].mxu0 }
 0x2a2   : > { %v2817_v23 = vadd.f32 %v2816_v16, %v2815_v22  ;;  %v2818_v30 = vpop.f32.mrb[22].mxu0  ;;  %v3528_v22 = vld [vmem:[#allocation7 + $0xa0] sm:$0xff]  }
 0x2a3   : > { %v2819_v25 = vpop.f32.mrb[23].mxu0 }
 0x2a4   : > { %v2820_v37 = vadd.f32 %v2819_v25, %v2818_v30  ;;  %v3530_v30 = vld [vmem:[#allocation7 + $0xa8] sm:$0xff]  }
 0x2a6   : > { %v1254_v40 = vpack.c.bf16 %v2820_v37, %v2817_v23 }
 0x2a8   : > { %v2821_v50 = vpop.f32.mrb[24].mxu0  ;;  %3114 = vmatmul.mubr.bf16.vlgmr.msra.gmra.mrb[0].mxu0 %v1254_v40 }
 0x2a9   : > { %v2822_v45 = vpop.f32.mrb[25].mxu0  ;;  %3130 = vmatpush3.bf16.msra.mxu0 %v4148_v42 }
 0x2aa   : > { %v2823_v46 = vadd.f32 %v2822_v45, %v2821_v50  ;;  %v2824_v54 = vpop.f32.mrb[26].mxu0  ;;  %3131 = vmatprep.subr.bf16.mxu0 %v3524_v41  ;;  %v3531_v50 = vld [vmem:[#allocation7 + $0xb0] sm:$0xff]  }
 0x2ab   : > { %v2825_v15 = vpop.f32.mrb[27].mxu0 }
 0x2ac   : > { %v2826_v34 = vadd.f32 %v2825_v15, %v2824_v54 }
 0x2ad   : > { %3132 = vmatpush3.bf16.msra.mxu0 %v3524_v41 }
 0x2ae   : > { %v1255_v1 = vpack.c.bf16 %v2826_v34, %v2823_v46  ;;  %3133 = vmatprep.subr.bf16.mxu0 %v3525_v55 }
 0x2b0   : > { %v2827_v7 = vpop.f32.mrb[28].mxu0  ;;  %3117 = vmatprep.mubr.bf16.mxu0 %v1255_v1 }
 0x2b1   : > { %v2828_v61 = vpop.f32.mrb[29].mxu0  ;;  %3134 = vmatpush3.bf16.msra.mxu0 %v3525_v55  ;;  %v3533_v55 = vld [vmem:[#allocation7 + $0xb8] sm:$0xff]  }
 0x2b2   : > { %v2829_v8 = vadd.f32 %v2828_v61, %v2827_v7  ;;  %v2830_v21 = vpop.f32.mrb[30].mxu0  ;;  %3135 = vmatprep.subr.bf16.mxu0 %v3527_v0 }
 0x2b3   : > { %v2831_v16 = vpop.f32.mrb[31].mxu0 }
 0x2b4   : > { %v2832_v42 = vadd.f32 %v2831_v16, %v2830_v21 }
 0x2b5   : > { %3136 = vmatpush3.bf16.msra.mxu0 %v3527_v0 }
 0x2b6   : > { %v1256_v23 = vpack.c.bf16 %v2832_v42, %v2829_v8  ;;  %3137 = vmatprep.subr.bf16.mxu0 %v3528_v22 }
 0x2b8   : > { %v2833_v25 = vpop.f32.mrb[32].mxu0  ;;  %3118 = vmatmul.mubr.bf16.gmra.mrb[4].mxu0 %v1256_v23 }
 0x2b9   : > { %v2834_v37 = vpop.f32.mrb[33].mxu0  ;;  %3138 = vmatpush3.bf16.msra.mxu0 %v3528_v22 }
 0x2ba   : > { %v2835_v40 = vadd.f32 %v2834_v37, %v2833_v25  ;;  %v2836_v41 = vpop.f32.mrb[34].mxu0  ;;  %3139 = vmatprep.subr.bf16.mxu0 %v3530_v30 }
 0x2bb   : > { %v2837_v45 = vpop.f32.mrb[35].mxu0 }
 0x2bc   : > { %v2838_v46 = vadd.f32 %v2837_v45, %v2836_v41 }
 0x2bd   : > { %3140 = vmatpush3.bf16.msra.mxu0 %v3530_v30 }
 0x2be   : > { %v1257_v54 = vpack.c.bf16 %v2838_v46, %v2835_v40  ;;  %3141 = vmatprep.subr.bf16.mxu0 %v3531_v50 }
 0x2c0   : > { %v2839_v15 = vpop.f32.mrb[36].mxu0  ;;  %3121 = vmatprep.mubr.bf16.mxu0 %v1257_v54 }
 0x2c1   : > { %v2840_v34 = vpop.f32.mrb[37].mxu0  ;;  %3142 = vmatpush3.bf16.msra.mxu0 %v3531_v50 }
 0x2c2   : > { %v2841_v1 = vadd.f32 %v2840_v34, %v2839_v15  ;;  %v2842_v0 = vpop.f32.mrb[38].mxu0  ;;  %3143 = vmatprep.subr.bf16.mxu0 %v3533_v55 }
 0x2c3   : > { %v2843_v7 = vpop.f32.mrb[39].mxu0 }
 0x2c4   : > { %v2844_v61 = vadd.f32 %v2843_v7, %v2842_v0 }
 0x2c5   : > { %3144 = vmatpush3.bf16.msra.mxu0 %v3533_v55 }
 0x2c6   : > { %v1258_v8 = vpack.c.bf16 %v2844_v61, %v2841_v1  ;;  %3161 = vmatprep.subr.bf16.mxu0 %v4150_v43 }
 0x2c8   : > { %v2845_v21 = vpop.f32.mrb[40].mxu0  ;;  %3122 = vmatmul.mubr.bf16.gmra.mrb[8].mxu0 %v1258_v8 }
 0x2c9   : > { %v2846_v22 = vpop.f32.mrb[41].mxu0 }
 0x2ca   : > { %v2847_v16 = vadd.f32 %v2846_v22, %v2845_v21  ;;  %v2848_v42 = vpop.f32.mrb[42].mxu0 }
 0x2cb   : > { %v2849_v23 = vpop.f32.mrb[43].mxu0 }
 0x2cc   : > { %v2850_v30 = vadd.f32 %v2849_v23, %v2848_v42 }
 0x2ce   : > { %v1259_v25 = vpack.c.bf16 %v2850_v30, %v2847_v16 }
 0x2d0   : > { %v2851_v37 = vpop.f32.mrb[44].mxu0  ;;  %3125 = vmatprep.mubr.bf16.mxu0 %v1259_v25 }
 0x2d1   : > { %v2852_v40 = vpop.f32.mrb[45].mxu0 }
 0x2d2   : > { %v2853_v41 = vadd.f32 %v2852_v40, %v2851_v37  ;;  %v2854_v50 = vpop.f32.mrb[46].mxu0 }
 0x2d3   : > { %v2855_v45 = vpop.f32.mrb[47].mxu0 }
 0x2d4   : > { %v2856_v46 = vadd.f32 %v2855_v45, %v2854_v50 }
 0x2d6   : > { %v1260_v54 = vpack.c.bf16 %v2856_v46, %v2853_v41 }
 0x2d8   : > { %3126 = vmatmul.mubr.bf16.gmra.mrb[12].mxu0 %v1260_v54 }
 0x2d9   : > { %3145 = vmatprep.mubr.bf16.mxu0 %v1633_v57 }
 0x2e0   : > { %3146 = vmatmul.mubr.bf16.vlgmr.msra.gmra.mrb[0].mxu0 %v1634_v62 }
 0x2e1   : > { %3162 = vmatpush3.bf16.msra.mxu0 %v4150_v43  ;;  %3149 = vmatprep.mubr.bf16.mxu0 %v1635_v18 }
 0x2e2   : > { %3163 = vmatprep.subr.bf16.mxu0 %v4161_v51 }
 0x2e5   : > { %3164 = vmatpush3.bf16.msra.mxu0 %v4161_v51 }
 0x2e6   : > { %3165 = vmatprep.subr.bf16.mxu0 %v4171_v3 }
 0x2e8   : > { %3150 = vmatmul.mubr.bf16.gmra.mrb[4].mxu0 %v1636_v12 }
 0x2e9   : > { %3166 = vmatpush3.bf16.msra.mxu0 %v4171_v3  ;;  %3153 = vmatprep.mubr.bf16.mxu0 %v1637_v27 }
 0x2ea   : > { %3167 = vmatprep.subr.bf16.mxu0 %v4181_v19 }
 0x2ed   : > { %3168 = vmatpush3.bf16.msra.mxu0 %v4181_v19 }
 0x2ee   : > { %3169 = vmatprep.subr.bf16.mxu0 %v4189_v14 }
 0x2f0   : > { %3154 = vmatmul.mubr.bf16.gmra.mrb[8].mxu0 %v1638_v32 }
 0x2f1   : > { %3170 = vmatpush3.bf16.msra.mxu0 %v4189_v14  ;;  %3157 = vmatprep.mubr.bf16.mxu0 %v1639_v39 }
 0x2f2   : > { %3171 = vmatprep.subr.bf16.mxu0 %v4201_v36 }
 0x2f5   : > { %3172 = vmatpush3.bf16.msra.mxu0 %v4201_v36 }
 0x2f6   : > { %3173 = vmatprep.subr.bf16.mxu0 %v4205_v49 }
 0x2f8   : > { %3158 = vmatmul.mubr.bf16.gmra.mrb[12].mxu0 %v1640_v48 }
 0x2f9   : > { %3174 = vmatpush3.bf16.msra.mxu0 %v4205_v49  ;;  %3177 = vmatprep.mubr.bf16.mxu0 %v2013_v59 }
 0x2fa   : > { %3175 = vmatprep.subr.bf16.mxu0 %v4209_v5 }
 0x2fd   : > { %3176 = vmatpush3.bf16.msra.mxu0 %v4209_v5 }
 0x300   : > { %3178 = vmatmul.mubr.bf16.vlgmr.msra.gmra.mrb[0].mxu0 %v2014_v17  ;;  %v3187_v57 = vpop.f32.mrb[96].mxu1 }
 0x301   : > { %3181 = vmatprep.mubr.bf16.mxu0 %v4380_v53  ;;  %v2152_v60 = vpop.f32.mrb[97].mxu1 }
 0x302   : > { %v3188_v2 = vpop.f32.mrb[98].mxu1 }
 0x303   : > { %v2155_v62 = vpop.f32.mrb[99].mxu1 }
 0x308   : > { %3182 = vmatmul.mubr.bf16.gmra.mrb[4].mxu0 %v4381_v56 }
 0x342   : > { %v3191_v63 = vpop.f32.mrb[100].mxu1 }
 0x343   : > { %v2168_v6 = vpop.f32.mrb[101].mxu1 }
 0x344   : > { %v3192_v18 = vpop.f32.mrb[102].mxu1 }
 0x345   : > { %v2171_v20 = vpop.f32.mrb[103].mxu1 }
 0x3c3   : > { %v3155_v12 = vpop.f32.mrb[8].mxu0 }
 0x3c4   : > { %v3217_v24 = vadd.f32 %v3155_v12, %v4269_v10  ;;  %v1772_v26 = vpop.f32.mrb[9].mxu0 }
 0x3c5   : > { %v3219_v27 = vadd.f32 %v4269_v10, %v1772_v26  ;;  %v3156_v29 = vpop.f32.mrb[10].mxu0 }
 0x3c6   : > { %v3221_v31 = vadd.f32 %v3156_v29, %v4269_v10  ;;  %v3218_v32 = vadd.f32 %v3217_v24, %v3187_v57  ;;  %v1775_v35 = vpop.f32.mrb[11].mxu0 }
 0x3c7   : > { %v3223_v38 = vadd.f32 %v4269_v10, %v1775_v35  ;;  %v3220_v39 = vadd.f32 %v3219_v27, %v2152_v60 }
 0x3c8   : > { %v3222_v43 = vadd.f32 %v3221_v31, %v3188_v2  ;;  %v2209_v47 = vmax.f32 %v3218_v32, 0.0 }
 0x3c9   : > { %v3224_v44 = vadd.f32 %v3223_v38, %v2155_v62  ;;  %v2207_v51 = vmax.f32 %v3220_v39, 0.0 }
 0x3ca   : > { %v2210_v48 = vmax.f32 %v3222_v43, 0.0 }
 0x3cb   : > { %v2208_v52 = vmax.f32 %v3224_v44, 0.0  ;;  %v3159_v58 = vpop.f32.mrb[12].mxu0 }
 0x3cc   : > { %v2678_v59 = vpack.c.bf16 %v2210_v48, %v2209_v47  ;;  %v3225_v3 = vadd.f32 %v3159_v58, %v4269_v10  ;;  %v1788_v4 = vpop.f32.mrb[13].mxu0 }
 0x3cd   : > { %v2673_v11 = vpack.c.bf16 %v2208_v52, %v2207_v51  ;;  %v3227_v17 = vadd.f32 %v4269_v10, %v1788_v4  ;;  %v3160_v19 = vpop.f32.mrb[14].mxu0 }
 0x3ce   : > { %2694 = vst [vmem:[%s4278_s8 + $0x28] sm:$0xff] %v2678_v59   ;;  %v3229_v9 = vadd.f32 %v3160_v19, %v4269_v10  ;;  %v3226_v13 = vadd.f32 %v3225_v3, %v3191_v63  ;;  %v1791_v14 = vpop.f32.mrb[15].mxu0 }
 0x3cf   : > { %2693 = vst [vmem:[%s4278_s8 + $0x20] sm:$0xff] %v2673_v11   ;;  %v3231_v28 = vadd.f32 %v4269_v10, %v1791_v14  ;;  %v3228_v33 = vadd.f32 %v3227_v17, %v2168_v6 }
 0x3d0   : > { %v3230_v36 = vadd.f32 %v3229_v9, %v3192_v18  ;;  %v2213_v5 = vmax.f32 %v3226_v13, 0.0 }
 0x3d1   : > { %v3232_v49 = vadd.f32 %v3231_v28, %v2171_v20  ;;  %v2211_v15 = vmax.f32 %v3228_v33, 0.0 }
 0x3d2   : > { %v2214_v55 = vmax.f32 %v3230_v36, 0.0 }
 0x3d3   : > { %v2212_v34 = vmax.f32 %v3232_v49, 0.0  ;;  %v3179_v1 = vpop.f32.mrb[0].mxu0 }
 0x3d4   : > { %v2688_v0 = vpack.c.bf16 %v2214_v55, %v2213_v5  ;;  %v3209_v7 = vadd.f32 %v3179_v1, %v4269_v10  ;;  %v2120_v61 = vpop.f32.mrb[1].mxu0 }
 0x3d5   : > { %v2683_v8 = vpack.c.bf16 %v2212_v34, %v2211_v15  ;;  %v3210_v21 = vadd.f32 %v4269_v10, %v2120_v61  ;;  %v3180_v22 = vpop.f32.mrb[2].mxu0 }
 0x3d6   : > { %2696 = vst [vmem:[%s4278_s8 + $0x38] sm:$0xff] %v2688_v0   ;;  %v3211_v16 = vadd.f32 %v3180_v22, %v4269_v10  ;;  %v2123_v42 = vpop.f32.mrb[3].mxu0  ;;  %v2201_v30 = vmax.f32 %v3209_v7, 0.0 }
 0x3d7   : > { %2695 = vst [vmem:[%s4278_s8 + $0x30] sm:$0xff] %v2683_v8   ;;  %v3212_v23 = vadd.f32 %v4269_v10, %v2123_v42  ;;  %v2199_v37 = vmax.f32 %v3210_v21, 0.0 }
 0x3d8   : > { %v2202_v25 = vmax.f32 %v3211_v16, 0.0 }
 0x3d9   : > { %v2200_v40 = vmax.f32 %v3212_v23, 0.0 }
 0x3da   : > { %v2658_v41 = vpack.c.bf16 %v2202_v25, %v2201_v30 }
 0x3db   : > { %v2653_v50 = vpack.c.bf16 %v2200_v40, %v2199_v37  ;;  %v3183_v45 = vpop.f32.mrb[4].mxu0 }
 0x3dc   : > { %2690 = vst [vmem:[%s4278_s8 + $0x8] sm:$0xff] %v2658_v41   ;;  %v3213_v46 = vadd.f32 %v3183_v45, %v4269_v10  ;;  %v2136_v54 = vpop.f32.mrb[5].mxu0 }
 0x3dd   : > { %2654 = vst [vmem:[%s4278_s8] sm:$0xff] %v2653_v50   ;;  %v3214_v53 = vadd.f32 %v4269_v10, %v2136_v54  ;;  %v3184_v56 = vpop.f32.mrb[6].mxu0 }
 0x3de   : > { %v3215_v57 = vadd.f32 %v3184_v56, %v4269_v10  ;;  %v2139_v60 = vpop.f32.mrb[7].mxu0  ;;  %v2205_v62 = vmax.f32 %v3213_v46, 0.0 }
 0x3df   : > { %v3216_v2 = vadd.f32 %v4269_v10, %v2139_v60  ;;  %v2203_v6 = vmax.f32 %v3214_v53, 0.0 }
 0x3e0   : > { %v2206_v63 = vmax.f32 %v3215_v57, 0.0 }
 0x3e1   : > { %v2204_v18 = vmax.f32 %v3216_v2, 0.0 }
 0x3e2   : > { %v2668_v20 = vpack.c.bf16 %v2206_v63, %v2205_v62 }
 0x3e3   : > { %v2663_v12 = vpack.c.bf16 %v2204_v18, %v2203_v6 }
 0x3e4   : > { %2692 = vst [vmem:[%s4278_s8 + $0x18] sm:$0xff] %v2668_v20  }
 0x3e5   : > { %2691 = vst [vmem:[%s4278_s8 + $0x10] sm:$0xff] %v2663_v12  }
 0x3e6   : > { %3635 = shalt.err (!%p3632_p3)
}
 0x3e7   : > { %s3636_s25 = scalar_lea.hbm %s4303_s10, 1024  ;;  %s3640_s7 = scalar_lea.hbm %s4354_s5, 2048 }
 0x3e8   : > { %p3637_p5 = scmp.ne.s32.totalorder %s4303_s10, %s3636_s25  ;;  %p3641_p12 = scmp.lt.u32.totalorder %s4303_s10, %s4354_s5 }
 0x3e9   : > { %p3642_p13 = scmp.lt.u32.totalorder %s3640_s7, %s3636_s25  ;;  %p3644_p8 = scmp.lt.u32.totalorder %s3636_s25, %s4303_s10 }
 0x3ea   : > { %p3638_p6 = pnand %p3637_p5, %p4382_p7 }
 0x3eb   : > { %p3643_p0 = por %p3642_p13, %p3641_p12 }
 0x3ec   : > { %p3639_p11 = pneg %p3638_p6 }
 0x3ed   : > { %p3645_p9 = por %p3644_p8, %p3643_p0 }
 0x3ef   : > { %p3646_p10 = pnand %p3645_p9, %p3639_p11 }
 0x3f1   : > { %3649 = shalt.err (!%p3646_p10)
}
 0x3f2   : > { %s3710_s17 = smov 64   ;;  %s3711_s26 = smov 4  }
 0x3f3   : > { %3310 = dma.vmem_to_hbm [thread:$0]  (%p4382_p7), %s4298_s9, 1024, %s4303_s10, %s2296_s27, %s3710_s17, %s3710_s17, %s3711_s26  }
 0x3f4 PF: > { %s2324_s8 = sand.u32 1, %s3684_s18   ;;  %p4383_p1 = scmp.ne.s32.totalorder %s4368_s6, 0 }
 0x3f5   : > { %s2325_s12 = scalar_lea.sflag [#allocation4], %s2324_s8 }
 0x3f6   : > { %p3323_p2 = pnand %p2418_p4, %p4383_p1 }
 0x3f8   : > { %3679 = dma.done.wait (!%p3323_p2), %s2325_s12, 1024  }
 0x3f9   : > { %3681 = vsyncadd (!%p3323_p2), %s2325_s12, 4294966272  ;;  %s4384_s21 = sld [smem:[#allocation18_spill]]  ;;  %s4385_s1 = sld [smem:[#allocation19_spill]] }
 0x3fa   : > { %s4386_s18 = smov %s3688_s19  ;;  %s4387_s19 = smov %s3692_s20 }
 0x3ff   : > { %p20_p3 = scmp.ge.s32.totalorder %s4384_s21, 4   ;;  %s4388_s20 = smov %s4385_s1 }
 0x401   :  { %22 = sbr.rel (!%p20_p3) target bundleno = 9 (0x9), region = 109 }
 0x408   :  { %2330 = vsyncpa [#allocation3], 1 }
 0x409   :  { %2332 = vsyncpa [#allocation3 + $0x1], 1 }
 0x40a   :  { %2333 = vsyncpa [#allocation6], 1 }
 0x40b   :  { %2334 = vsyncpa [#allocation9], 1 }
 0x40c   :  { %2335 = vsyncpa [#allocation4], 1 }
 0x40d   :  { %2337 = vsyncpa [#allocation4 + $0x1], 1 }

// kernel: tpu_custom_call.1
= control target key start
LH: loop header
LB: loop body
LE: loop exit
PB: predicated region body
PF: predicated region fallthrough
CT: control target
= control target key end

     0   :  { %s4349_s0 = inlined_call_operand.hbm [shape: bf16[4,256,256], index: 0, kind: input, shape index: {}]   ;;  %s4350_s1 = inlined_call_operand.hbm [shape: bf16[256,128], index: 1, kind: input, shape index: {}]   ;;  %s4351_s2 = inlined_call_operand.hbm [shape: bf16[4,128,128], index: 2, kind: input, shape index: {}]   ;;  %s4352_s3 = inlined_call_operand.hbm [shape: bf16[128,128], index: 3, kind: input, shape index: {}]   ;;  %s4353_s4 = inlined_call_operand.vmem [shape: f32[1,128], index: 4, kind: input, shape index: {}]   ;;  %s4354_s5 = inlined_call_operand.hbm [shape: bf16[256,128], index: 5, kind: output, shape index: {}]  }
   0x1   :  { %4362 = sst [smem:[#allocation20_spill]] %s4350_s1 }
   0x2   :  { %10 = vsyncpa [#allocation3], 0 }
   0x3   :  { %12 = vsyncpa [#allocation3 + $0x1], 0 }
   0x4   :  { %13 = vsyncpa [#allocation6], 0 }
   0x5   :  { %14 = vsyncpa [#allocation9], 0 }
   0x6   :  { %15 = vsyncpa [#allocation4], 0 }
   0x7   :  { %17 = vsyncpa [#allocation4 + $0x1], 0  ;;  %s3742_s18 = smov 0   ;;  %s3744_s19 = smov 0  }
   0x8   :  { %s3746_s20 = smov 0   ;;  %s3748_s21 = smov 0  }
   0x9 LB: > { %s3763_s22 = sadd.s32 4294967295, %s3696_s21   ;;  %s2413_s23 = sadd.s32 4294967294, %s3696_s21   ;;  %s3696_s21 = sphi %s3748_s21, %s4384_s21   ;;  %s3692_s20 = sphi %s3746_s20, %s4388_s20   ;;  %s3688_s19 = sphi %s3744_s19, %s4387_s19   ;;  %s3684_s18 = sphi %s3742_s18, %s4386_s18  }
   0xa   : > { %s3767_s24 = sadd.s32 1, %s3696_s21   ;;  %s30_s25 = sadd.s32 1, %s3692_s20 }
   0xb   : > { %4363 = sst [smem:[#allocation18_spill]] %s3767_s24  ;;  %s27_s26 = ssub.s32 %s3696_s21, %s3767_s24 }
   0xc   : > { %p37_p0 = scmp.ne.s32.totalorder %s3692_s20, %s3688_s19  ;;  %p28_p1 = scmp.eq.s32.totalorder %s27_s26, 0 }
   0xd   : > { %p38_p2 = scmp.eq.s32.totalorder %s3696_s21, 0  ;;  %p43_p3 = scmp.ne.s32.totalorder %s3688_s19, %s3684_s18 }
   0xe   : > { %p4355_p4 = scmp.eq.s32.totalorder %s3763_s22, 0  ;;  %p151_p7 = scmp.eq.s32.totalorder %s3763_s22, 1 }
   0xf   : > { %s3779_s27 = scalar_select %p28_p1, %s3692_s20, %s30_s25  }
  0x10   : > { %p3781_p5 = por %p38_p2, %p37_p0  ;;  %p3787_p6 = por %p4355_p4, %p43_p3 }
  0x11   : > { %4364 = sst [smem:[#allocation19_spill]] %s3779_s27  ;;  %p157_p8 = scmp.eq.s32.totalorder %s2413_s23, 1 }
  0x12   : > { %s4365_s28 = scalar_select %p3781_p5, 1, 0 }
  0x13   : > { %s4366_s29 = scalar_select %p3787_p6, 1, 0 }
  0x14   : > { %p2414_p9 = scmp.ge.s32.totalorder %s3696_s21, 1  ;;  %p164_p10 = scmp.lt.s32.totalorder %s3696_s21, 3 }
  0x15   : > { %p3794_p11 = por %p151_p7, %p37_p0  ;;  %p3798_p12 = por %p157_p8, %p43_p3 }
  0x16   : > { %p3802_p13 = pnand %p2414_p9, %p164_p10  ;;  %s3698_s8 = smov [#allocation5]  }
  0x17   : > { %s4367_s30 = scalar_select %p3794_p11, 1, 0 }
  0x18   : > { %s4368_s6 = scalar_select %p3798_p12, 1, 0 }
  0x19   : > { %s4369_s7 = scalar_select %p3802_p13, 1, 0 }
  0x1a   : > { %p3312_p1 = pneg %p3802_p13  ;;  %s176_s9 = sshll.u32 %s3698_s8, 4  ;;  %s177_s9 = int_to_ptr.vmem [resolvable:$true] %s176_s9 }
  0x1b   : > { %s3699_s11 = smov [#allocation7]   ;;  %s4371_s1 = sld [smem:[#allocation20_spill]] }
  0x1c   : > { %p3810_p2 = pnand %p3312_p1, %p4355_p4  ;;  %s189_s12 = sshll.u32 %s3699_s11, 4  ;;  %s3814_s12 = int_to_ptr.vmem [resolvable:$true] %s189_s12 }
  0x1e   : > { %p3824_p3 = pneg %p3810_p2 }
  0x21   : > { %s3538_s15 = scalar_lea.hbm %s4371_s1, 2048 }
  0x22   : > { %p3539_p0 = scmp.ne.s32.totalorder %s4371_s1, %s3538_s15  ;;  %p3545_p9 = scmp.lt.u32.totalorder %s3538_s15, %s4371_s1 }
  0x24   : > { %p3541_p7 = pnand %p3824_p3, %p3539_p0 }
  0x26   : > { %p3542_p8 = pneg %p3541_p7 }
  0x28   : > { %p3547_p10 = pnand %p3545_p9, %p3542_p8 }
  0x2a   : > { %3550 = shalt.err (!%p3547_p10)
}
  0x2b   : > { %s3551_s8 = scalar_lea.vmem %s177_s9, 2048  ;;  %p3559_p11 = scmp.lt.s32.totalorder %s177_s9, %s177_s9 }
  0x2c   : > { %p3552_p1 = scmp.ne.s32.totalorder %s177_s9, %s3551_s8  ;;  %p3560_p6 = scmp.lt.s32.totalorder %s3551_s8, %s3551_s8 }
  0x2e   : > { %p3554_p4 = pnand %p3552_p1, %p3824_p3  ;;  %p3561_p13 = por %p3560_p6, %p3559_p11 }
  0x30   : > { %p3555_p12 = pneg %p3554_p4 }
  0x32   : > { %p3562_p5 = pnand %p3561_p13, %p3555_p12 }
  0x34   : > { %3565 = shalt.err (!%p3562_p5)
}
  0x35   : > { %s3700_s11 = smov 64   ;;  %s3701_s13 = smov 4  }
  0x36   : > { %3315 = dma.hbm_to_vmem [thread:$0]  (!%p3810_p2), %s4371_s1, 2048, %s177_s9, [#allocation6], %s3700_s11, %s3700_s11, %s3701_s13  }
  0x37   : > { %s3566_s25 = scalar_lea.hbm %s4351_s2, 4096 }
  0x38   : > { %p3567_p4 = scmp.ne.s32.totalorder %s4351_s2, %s3566_s25  ;;  %p3573_p11 = scmp.lt.u32.totalorder %s3566_s25, %s4351_s2 }
  0x3a   : > { %p3569_p5 = pnand %p3567_p4, %p3824_p3 }
  0x3c   : > { %p3570_p6 = pneg %p3569_p5 }
  0x3e   : > { %p3575_p12 = pnand %p3573_p11, %p3570_p6 }
  0x40   : > { %3578 = shalt.err (!%p3575_p12)
}
  0x41   : > { %s3579_s9 = scalar_lea.vmem %s3814_s12, 4096  ;;  %p3587_p8 = scmp.lt.s32.totalorder %s3814_s12, %s3814_s12 }
  0x42   : > { %p3580_p13 = scmp.ne.s32.totalorder %s3814_s12, %s3579_s9  ;;  %p3588_p9 = scmp.lt.s32.totalorder %s3579_s9, %s3579_s9 }
  0x44   : > { %p3582_p0 = pnand %p3580_p13, %p3824_p3  ;;  %p3589_p10 = por %p3588_p9, %p3587_p8 }
  0x46   : > { %p3583_p7 = pneg %p3582_p0 }
  0x48   : > { %p3590_p1 = pnand %p3589_p10, %p3583_p7 }
  0x4a   : > { %3593 = shalt.err (!%p3590_p1)
}
  0x4b   : > { %3318 = dma.hbm_to_vmem [thread:$0]  (!%p3810_p2), %s4351_s2, 4096, %s3814_s12, [#allocation6], %s3700_s11, %s3700_s11, %s3701_s13  }
  0x4c   : > { %s3702_s14 = smov [#allocation8]   ;;  %s3594_s25 = scalar_lea.hbm %s4352_s3, 1024 }
  0x4d   : > { %s202_s15 = sshll.u32 %s3702_s14, 4  ;;  %p3595_p4 = scmp.ne.s32.totalorder %s4352_s3, %s3594_s25  ;;  %s203_s15 = int_to_ptr.vmem [resolvable:$true] %s202_s15 }
  0x4e   : > { %p3601_p11 = scmp.lt.u32.totalorder %s3594_s25, %s4352_s3 }
  0x4f   : > { %p3597_p5 = pnand %p3595_p4, %p3824_p3 }
  0x51   : > { %p3598_p6 = pneg %p3597_p5 }
  0x53   : > { %p3603_p12 = pnand %p3601_p11, %p3598_p6 }
  0x55   : > { %3606 = shalt.err (!%p3603_p12)
}
  0x56   : > { %s3607_s12 = scalar_lea.vmem %s203_s15, 1024  ;;  %p3615_p8 = scmp.lt.s32.totalorder %s203_s15, %s203_s15 }
  0x57   : > { %p3608_p13 = scmp.ne.s32.totalorder %s203_s15, %s3607_s12  ;;  %p3616_p9 = scmp.lt.s32.totalorder %s3607_s12, %s3607_s12 }
  0x59   : > { %p3610_p0 = pnand %p3608_p13, %p3824_p3  ;;  %p3617_p10 = por %p3616_p9, %p3615_p8 }
  0x5b   : > { %p3611_p7 = pneg %p3610_p0 }
  0x5d   : > { %p3618_p1 = pnand %p3617_p10, %p3611_p7 }
  0x5f   : > { %3621 = shalt.err (!%p3618_p1)
}
  0x60   : > { %3321 = dma.hbm_to_vmem [thread:$0]  (!%p3810_p2), %s4352_s3, 1024, %s203_s15, [#allocation9], %s3700_s11, %s3700_s11, %s3701_s13  }
  0x61   : > { %p2418_p4 = scmp.ge.s32.totalorder %s3696_s21, 2 }
  0x63   : > { %215 = sbr.rel (%p2418_p4) target bundleno = 121 (0x79), region = 32 }
  0x6a   : > { %s219_s23 = sand.u32 1, %s3692_s20   ;;  %s2632_s10 = sshll.u32 %s3696_s21, 11 }
  0x6b   : > { %s2419_s27 = sshll.u32 %s219_s23, 9  ;;  %s230_s11 = scalar_lea.hbm %s4349_s0, %s2632_s10 }
  0x6c   : > { %p4373_p2 = scmp.ne.s32.totalorder %s4365_s28, 0  ;;  %s223_s15 = scalar_lea.vmem [#allocation2], %s2419_s27 }
  0x6d   : > { %s243_s17 = sshll.u32 %s223_s15, 4  ;;  %s3703_s26 = smov 4096   ;;  %s244_s17 = int_to_ptr.vmem [resolvable:$true] %s243_s17 }
  0x6e   : > { %s3295_s13 = scalar_select %p4373_p2, [#allocation0], [#allocation13] }
  0x6f   : > { %3296 = sst [smem:[#allocation12]] (%p4373_p2), %s3703_s26  ;;  %s3704_s8 = smov 2048  }
  0x70   : > { %s235_s25 = sld [smem:[%s3295_s13]]   ;;  %s3705_s9 = smov 16  }
  0x71   : > { %3297 = sst [smem:[#allocation12 + $0x1]] (%p4373_p2), %s3704_s8  ;;  %s3706_s12 = smov 128  }
  0x72   : > { %3298 = sst [smem:[#allocation12 + $0x2]] (%p4373_p2), %s3705_s9  ;;  %s3707_s24 = smov 8  }
  0x73   : > { %3299 = sst [smem:[#allocation12 + $0x3]] (%p4373_p2), %s3706_s12  ;;  %s220_s27 = scalar_lea.sflag [#allocation3], %s219_s23 }
  0x74   : > { %3300 = sst [smem:[#allocation12 + $0x4]] (%p4373_p2), %s3706_s12  ;;  %s3708_s14 = smov [#allocation11]  }
  0x75   : > { %3301 = sst [smem:[#allocation12 + $0x5]] (%p4373_p2), %s3707_s24 }
  0x76   : > { %s2423_s1 = sshll.u32 %s235_s25, 26 }
  0x77   : > { %s2424_s10 = sadd.s32 134217728, %s2423_s1 }
  0x78   : > { %3302 = dma.general (%p4373_p2), %s230_s11, 8192, %s244_s17, %s220_s27, %s3708_s14, [#allocation12], %s2424_s10, 0  }
  0x79 PF: > { %p4374_p3 = scmp.ne.s32.totalorder %s4369_s7, 0 }
  0x7a   : > { %s3917_s16 = sand.u32 (!%p4374_p3), 1, %s3688_s19   ;;  %p4375_p5 = scmp.ne.s32.totalorder (!%p4374_p3), %s4366_s29, 0 }
  0x7b   : > { %268 = sbr.rel (%p4374_p3) target bundleno = 1012 (0x3f4), region = 40  ;;  %s2426_s13 = sshll.u32 (!%p4374_p3), %s3917_s16, 9 }
  0x7c   : > { %s271_s15 = scalar_lea.sflag (!%p4374_p3), [#allocation3], %s3917_s16  ;;  %s3921_s25 = scalar_lea.vmem (!%p4374_p3), [#allocation2], %s2426_s13 }
  0x82   : > { %3667 = dma.done.wait (%p4375_p5), %s271_s15, 8192  }
  0x83   : > { %3669 = vsyncadd (%p4375_p5), %s271_s15, 4294959104  ;;  %p4376_p6 = scmp.eq.s32.totalorder %s3763_s22, 0 }
  0x85   : > { %3671 = dma.done.wait (%p4376_p6), [#allocation6], 6144   ;;  %p4377_p11 = pmov %p4376_p6 }
  0x86   : > { %p4378_p12 = pmov %p4376_p6 }
  0x87   : > { %3673 = vsyncadd (%p4377_p11), [#allocation6], 4294961152 }
  0x88   : > { %3675 = dma.done.wait (%p4378_p12), [#allocation9], 1024   ;;  %p4379_p13 = pmov %p4376_p6 }
  0x89   : > { %v3935_v0 = vld [vmem:[#allocation5 + $0x40] sm:$0xff]   ;;  %v3940_v2 = vld [vmem:[#allocation5 + $0x48] sm:$0xff]   ;;  %v3946_v4 = vld [vmem:[#allocation5 + $0x50] sm:$0xff]   ;;  %s2431_s28 = sshll.u32 %s3763_s22, 7  ;;  %s2430_s26 = sshll.u32 %s3917_s16, 6 }
  0x8a   : > { %3677 = vsyncadd (%p4379_p13), [#allocation9], 4294966272  ;;  %v3937_v1 = vld [vmem:[#allocation5] sm:$0xff]   ;;  %2713 = vmatprep.subr.bf16.mxu1 %v3935_v0  ;;  %v3943_v3 = vld [vmem:[#allocation5 + $0x8] sm:$0xff]   ;;  %s317_s29 = sshra.s32 %s2431_s28, 3  ;;  %s4278_s8 = scalar_lea.vmem [#allocation10], %s2430_s26 }
  0x8b   : > { %2714 = vmatpush3.bf16.msra.mxu1 %v3937_v1  ;;  %v3949_v5 = vld [vmem:[#allocation5 + $0x10] sm:$0xff]   ;;  %v3952_v6 = vld [vmem:[#allocation5 + $0x58] sm:$0xff]   ;;  %v3958_v8 = vld [vmem:[#allocation5 + $0x60] sm:$0xff]   ;;  %s2432_s7 = sshll.u32 %s317_s29, 2  ;;  %s2309_s9 = sshll.u32 %s4278_s8, 4  ;;  %s4298_s9 = int_to_ptr.vmem [resolvable:$true] %s2309_s9 }
  0x8c   : > { %2715 = vmatprep.subr.bf16.mxu1 %v3940_v2  ;;  %v3955_v7 = vld [vmem:[#allocation5 + $0x18] sm:$0xff]   ;;  %v3961_v9 = vld [vmem:[#allocation5 + $0x20] sm:$0xff]   ;;  %v3964_v10 = vld [vmem:[#allocation5 + $0x68] sm:$0xff]   ;;  %s3988_s23 = scalar_lea.vmem [#allocation5], %s2432_s7  ;;  %s2649_s12 = sshll.u32 %s3763_s22, 10 }
  0x8d   : > { %v3396_v11 = vld [vmem:[%s3921_s25 + $0x4] ss:$8 sps:$4 sm:$0xff]   ;;  %v3971_v13 = vld [vmem:[#allocation5 + $0x70] sm:$0xff]   ;;  %v3978_v15 = vld [vmem:[#allocation5 + $0x78] sm:$0xff]   ;;  %s4303_s10 = scalar_lea.hbm %s4354_s5, %s2649_s12  ;;  %s2296_s27 = scalar_lea.sflag [#allocation4], %s3917_s16 }
  0x8e   : > { %v3968_v12 = vld [vmem:[#allocation5 + $0x28] sm:$0xff]   ;;  %809 = vmatprep.mubr.bf16.mxu1 %v3396_v11  ;;  %v3975_v14 = vld [vmem:[#allocation5 + $0x30] sm:$0xff]   ;;  %v3980_v16 = vld [vmem:[#allocation5 + $0x38] sm:$0xff]   ;;  %s3622_s22 = scalar_lea.vmem %s4298_s9, 1024  ;;  %p4382_p7 = scmp.ne.s32.totalorder %s4367_s30, 0 }
  0x8f   : > { %2716 = vmatpush3.bf16.msra.mxu1 %v3943_v3  ;;  %v3418_v17 = vld [vmem:[#allocation8] sm:$0xff]   ;;  %v3419_v18 = vld [vmem:[#allocation8 + $0x8] sm:$0xff]   ;;  %v3397_v20 = vld [vmem:[%s3921_s25 + $0x14] ss:$8 sps:$4 sm:$0xff]   ;;  %p3623_p0 = scmp.ne.s32.totalorder %s4298_s9, %s3622_s22  ;;  %s3709_s14 = smov [#allocation10]  }
  0x90   : > { %2717 = vmatprep.subr.bf16.mxu1 %v3946_v4  ;;  %v3394_v19 = vld [vmem:[%s3921_s25] ss:$8 sps:$4 sm:$0xff]   ;;  %3033 = vmatprep.subr.bf16.mxu0 %v3418_v17  ;;  %v3420_v21 = vld [vmem:[#allocation8 + $0x10] sm:$0xff]   ;;  %v3421_v22 = vld [vmem:[#allocation8 + $0x18] sm:$0xff]   ;;  %s3626_s13 = sshll.u32 %s3709_s14, 4  ;;  %s3627_s13 = int_to_ptr.vmem [resolvable:$false] %s3626_s13 }
  0x91   : > { %3034 = vmatpush3.bf16.msra.mxu0 %v3418_v17  ;;  %v3426_v23 = vld [vmem:[%s3988_s23] sm:$0xff]   ;;  %v3399_v24 = vld [vmem:[%s3921_s25 + $0x10] ss:$8 sps:$4 sm:$0xff]   ;;  %v3423_v27 = vld [vmem:[#allocation8 + $0x28] sm:$0xff]   ;;  %p3624_p8 = pnand %p3623_p0, %p4382_p7  ;;  %s3628_s15 = scalar_lea.vmem %s3627_s13, 2048 }
  0x92   : > { %3035 = vmatprep.subr.bf16.mxu0 %v3419_v18  ;;  %3049 = vmatprep.mubr.bf16.mxu0 %v3426_v23  ;;  %v3400_v25 = vld [vmem:[%s3921_s25 + $0x24] ss:$8 sps:$4 sm:$0xff]   ;;  %v3402_v28 = vld [vmem:[%s3921_s25 + $0x20] ss:$8 sps:$4 sm:$0xff]   ;;  %v3403_v29 = vld [vmem:[%s3921_s25 + $0x34] ss:$8 sps:$4 sm:$0xff]   ;;  %p3629_p10 = scmp.lt.s32.totalorder %s4298_s9, %s3627_s13  ;;  %p3630_p1 = scmp.lt.s32.totalorder %s3628_s15, %s3622_s22 }
  0x93   : > { %2718 = vmatpush3.bf16.msra.mxu1 %v3949_v5  ;;  %v3422_v26 = vld [vmem:[#allocation8 + $0x20] sm:$0xff]   ;;  %v3424_v30 = vld [vmem:[#allocation8 + $0x30] sm:$0xff]   ;;  %v3425_v31 = vld [vmem:[#allocation8 + $0x38] sm:$0xff]   ;;  %p3625_p9 = pneg %p3624_p8 }
  0x94   : > { %2719 = vmatprep.subr.bf16.mxu1 %v3952_v6  ;;  %v3405_v32 = vld [vmem:[%s3921_s25 + $0x30] ss:$8 sps:$4 sm:$0xff]   ;;  %v3406_v33 = vld [vmem:[%s3921_s25 + $0x44] ss:$8 sps:$4 sm:$0xff]   ;;  %v3408_v38 = vld [vmem:[%s3921_s25 + $0x40] ss:$8 sps:$4 sm:$0xff]   ;;  %p3631_p2 = por %p3630_p1, %p3629_p10 }
  0x95   : > { %3036 = vmatpush3.bf16.msra.mxu0 %v3419_v18  ;;  %v3428_v34 = vld [vmem:[#allocation7] sm:$0xff]   ;;  %v3427_v35 = vld [vmem:[%s3988_s23 + $0x8] sm:$0xff]   ;;  %v3430_v36 = vld [vmem:[%s3988_s23 + $0x10] sm:$0xff]  }
  0x96   : > { %3037 = vmatprep.subr.bf16.mxu0 %v3420_v21  ;;  %v3429_v37 = vld [vmem:[#allocation7 + $0x8] sm:$0xff]   ;;  %v3409_v39 = vld [vmem:[%s3921_s25 + $0x54] ss:$8 sps:$4 sm:$0xff]   ;;  %v3434_v42 = vld [vmem:[%s3988_s23 + $0x20] sm:$0xff]   ;;  %p3632_p3 = pnand %p3631_p2, %p3625_p9 }
  0x97   : > { %2720 = vmatpush3.bf16.msra.mxu1 %v3955_v7  ;;  %v3432_v40 = vld [vmem:[#allocation7 + $0x10] sm:$0xff]   ;;  %v3431_v41 = vld [vmem:[%s3988_s23 + $0x18] sm:$0xff]   ;;  %v3412_v45 = vld [vmem:[%s3921_s25 + $0x64] ss:$8 sps:$4 sm:$0xff]  }
  0x98   : > { %2721 = vmatprep.subr.bf16.mxu1 %v3958_v8  ;;  %v3433_v43 = vld [vmem:[#allocation7 + $0x18] sm:$0xff]   ;;  %v3435_v46 = vld [vmem:[%s3988_s23 + $0x28] sm:$0xff]   ;;  %v3436_v50 = vld [vmem:[#allocation7 + $0x20] sm:$0xff]  }
  0x99   : > { %3038 = vmatpush3.bf16.msra.mxu0 %v3420_v21  ;;  %v3411_v44 = vld [vmem:[%s3921_s25 + $0x50] ss:$8 sps:$4 sm:$0xff]   ;;  %v3414_v47 = vld [vmem:[%s3921_s25 + $0x60] ss:$8 sps:$4 sm:$0xff]   ;;  %v3415_v48 = vld [vmem:[%s3921_s25 + $0x74] ss:$8 sps:$4 sm:$0xff]  }
  0x9a   : > { %3039 = vmatprep.subr.bf16.mxu0 %v3421_v22  ;;  %v3417_v49 = vld [vmem:[%s3921_s25 + $0x70] ss:$8 sps:$4 sm:$0xff]   ;;  %v3437_v51 = vld [vmem:[#allocation7 + $0x28] sm:$0xff]   ;;  %v3445_v58 = vld [vmem:[%s3921_s25 + $0x114] ss:$8 sps:$4 sm:$0xff]  }
  0x9b   : > { %2722 = vmatpush3.bf16.msra.mxu1 %v3961_v9  ;;  %v3438_v52 = vld [vmem:[%s3988_s23 + $0x30] sm:$0xff]   ;;  %v3439_v53 = vld [vmem:[%s3988_s23 + $0x38] sm:$0xff]   ;;  %v3444_v56 = vld [vmem:[%s3921_s25 + $0x104] ss:$8 sps:$4 sm:$0xff]  }
  0x9c   : > { %2723 = vmatprep.subr.bf16.mxu1 %v3964_v10  ;;  %v3440_v54 = vld [vmem:[#allocation7 + $0x30] sm:$0xff]   ;;  %v3441_v55 = vld [vmem:[#allocation7 + $0x38] sm:$0xff]   ;;  %v3442_v57 = vld [vmem:[%s3921_s25 + $0x100] ss:$8 sps:$4 sm:$0xff]  }
  0x9d   : > { %3040 = vmatpush3.bf16.msra.mxu0 %v3421_v22  ;;  %v3447_v59 = vld [vmem:[%s3921_s25 + $0x110] ss:$8 sps:$4 sm:$0xff]   ;;  %v3448_v60 = vld [vmem:[%s3921_s25 + $0x124] ss:$8 sps:$4 sm:$0xff]   ;;  %v3450_v61 = vld [vmem:[%s3921_s25 + $0x120] ss:$8 sps:$4 sm:$0xff]  }
  0x9e   : > { %3041 = vmatprep.subr.bf16.mxu0 %v3422_v26  ;;  %v3451_v62 = vld [vmem:[%s3921_s25 + $0x134] ss:$8 sps:$4 sm:$0xff]   ;;  %v3453_v63 = vld [vmem:[%s3921_s25 + $0x130] ss:$8 sps:$4 sm:$0xff]   ;;  %v3459_v11 = vld [vmem:[%s3921_s25 + $0x140] ss:$8 sps:$4 sm:$0xff]  }
  0x9f   : > { %2724 = vmatpush3.bf16.msra.mxu1 %v3968_v12  ;;  %v3463_v17 = vld [vmem:[%s3921_s25 + $0x154] ss:$8 sps:$4 sm:$0xff]   ;;  %v3465_v18 = vld [vmem:[%s3921_s25 + $0x150] ss:$8 sps:$4 sm:$0xff]   ;;  %v3483_v23 = vld [vmem:[%s3921_s25 + $0x184] ss:$8 sps:$4 sm:$0xff]  }
  0xa0   : > { %2725 = vmatprep.subr.bf16.mxu1 %v3971_v13  ;;  %v3475_v21 = vld [vmem:[%s3921_s25 + $0x174] ss:$8 sps:$4 sm:$0xff]   ;;  %v3477_v22 = vld [vmem:[%s3921_s25 + $0x170] ss:$8 sps:$4 sm:$0xff]  }
  0xa1   : > { %3042 = vmatpush3.bf16.msra.mxu0 %v3422_v26  ;;  %v3489_v26 = vld [vmem:[%s3921_s25 + $0x190] ss:$8 sps:$4 sm:$0xff]  }
  0xa2   : > { %3043 = vmatprep.subr.bf16.mxu0 %v3423_v27 }
  0xa3   : > { %2726 = vmatpush3.bf16.msra.mxu1 %v3975_v14 }
  0xa4   : > { %2727 = vmatprep.subr.bf16.mxu1 %v3978_v15 }
  0xa5   : > { %3044 = vmatpush3.bf16.msra.mxu0 %v3423_v27  ;;  %v3493_v27 = vld [vmem:[%s3921_s25 + $0x1a4] ss:$8 sps:$4 sm:$0xff]  }
  0xa6   : > { %3045 = vmatprep.subr.bf16.mxu0 %v3424_v30 }
  0xa7   : > { %2728 = vmatpush3.bf16.msra.mxu1 %v3980_v16 }
  0xa8   : > { %2873 = vmatprep.subr.bf16.mxu1 %v3935_v0 }
  0xa9   : > { %3046 = vmatpush3.bf16.msra.mxu0 %v3424_v30 }
  0xaa   : > { %810 = vmatmul.mubr.bf16.vlgmr.msra.gmra.mrb[0].mxu1 %v3394_v19  ;;  %3047 = vmatprep.subr.bf16.mxu0 %v3425_v31  ;;  %v3469_v19 = vld [vmem:[%s3921_s25 + $0x164] ss:$8 sps:$4 sm:$0xff]  }
  0xab   : > { %817 = vmatprep.mubr.bf16.mxu1 %v3397_v20  ;;  %2874 = vmatpush3.bf16.msra.mxu1 %v3937_v1  ;;  %v3471_v20 = vld [vmem:[%s3921_s25 + $0x160] ss:$8 sps:$4 sm:$0xff]  }
  0xac   : > { %2875 = vmatprep.subr.bf16.mxu1 %v3940_v2 }
  0xad   : > { %3048 = vmatpush3.bf16.msra.mxu0 %v3425_v31  ;;  %v3501_v31 = vld [vmem:[%s3921_s25 + $0x1b0] ss:$8 sps:$4 sm:$0xff]  }
  0xae   : > { %3065 = vmatprep.subr.bf16.mxu0 %v3428_v34 }
  0xaf   : > { %2876 = vmatpush3.bf16.msra.mxu1 %v3943_v3 }
  0xb0   : > { %2877 = vmatprep.subr.bf16.mxu1 %v3946_v4  ;;  %3050 = vmatmul.mubr.bf16.vlgmr.msra.gmra.mrb[0].mxu0 %v3427_v35 }
  0xb1   : > { %3066 = vmatpush3.bf16.msra.mxu0 %v3428_v34  ;;  %3053 = vmatprep.mubr.bf16.mxu0 %v3430_v36 }
  0xb2   : > { %818 = vmatmul.mubr.bf16.gmra.mrb[4].mxu1 %v3399_v24  ;;  %3067 = vmatprep.subr.bf16.mxu0 %v3429_v37  ;;  %v3481_v24 = vld [vmem:[%s3921_s25 + $0x180] ss:$8 sps:$4 sm:$0xff]  }
  0xb3   : > { %825 = vmatprep.mubr.bf16.mxu1 %v3400_v25  ;;  %2878 = vmatpush3.bf16.msra.mxu1 %v3949_v5  ;;  %v3487_v25 = vld [vmem:[%s3921_s25 + $0x194] ss:$8 sps:$4 sm:$0xff]  }
  0xb4   : > { %2879 = vmatprep.subr.bf16.mxu1 %v3952_v6 }
  0xb5   : > { %3068 = vmatpush3.bf16.msra.mxu0 %v3429_v37 }
  0xb6   : > { %3069 = vmatprep.subr.bf16.mxu0 %v3432_v40 }
  0xb7   : > { %2880 = vmatpush3.bf16.msra.mxu1 %v3955_v7 }
  0xb8   : > { %2881 = vmatprep.subr.bf16.mxu1 %v3958_v8  ;;  %3054 = vmatmul.mubr.bf16.gmra.mrb[4].mxu0 %v3431_v41 }
  0xb9   : > { %3070 = vmatpush3.bf16.msra.mxu0 %v3432_v40  ;;  %3057 = vmatprep.mubr.bf16.mxu0 %v3434_v42  ;;  %v3505_v40 = vld [vmem:[%s3921_s25 + $0x1d4] ss:$8 sps:$4 sm:$0xff]  }
  0xba   : > { %826 = vmatmul.mubr.bf16.gmra.mrb[8].mxu1 %v3402_v28  ;;  %3071 = vmatprep.subr.bf16.mxu0 %v3433_v43  ;;  %v3495_v28 = vld [vmem:[%s3921_s25 + $0x1a0] ss:$8 sps:$4 sm:$0xff]  }
  0xbb   : > { %833 = vmatprep.mubr.bf16.mxu1 %v3403_v29  ;;  %2882 = vmatpush3.bf16.msra.mxu1 %v3961_v9  ;;  %v3499_v29 = vld [vmem:[%s3921_s25 + $0x1b4] ss:$8 sps:$4 sm:$0xff]  }
  0xbc   : > { %2883 = vmatprep.subr.bf16.mxu1 %v3964_v10 }
  0xbd   : > { %3072 = vmatpush3.bf16.msra.mxu0 %v3433_v43 }
  0xbe   : > { %3073 = vmatprep.subr.bf16.mxu0 %v3436_v50 }
  0xbf   : > { %2884 = vmatpush3.bf16.msra.mxu1 %v3968_v12 }
  0xc0   : > { %2885 = vmatprep.subr.bf16.mxu1 %v3971_v13  ;;  %3058 = vmatmul.mubr.bf16.gmra.mrb[8].mxu0 %v3435_v46 }
  0xc1   : > { %3074 = vmatpush3.bf16.msra.mxu0 %v3436_v50  ;;  %3061 = vmatprep.mubr.bf16.mxu0 %v3438_v52 }
  0xc2   : > { %834 = vmatmul.mubr.bf16.gmra.mrb[12].mxu1 %v3405_v32  ;;  %3075 = vmatprep.subr.bf16.mxu0 %v3437_v51  ;;  %v3502_v32 = vld [vmem:[%s3921_s25 + $0x1c4] ss:$8 sps:$4 sm:$0xff]  }
  0xc3   : > { %841 = vmatprep.mubr.bf16.mxu1 %v3406_v33  ;;  %2886 = vmatpush3.bf16.msra.mxu1 %v3975_v14 }
  0xc4   : > { %2887 = vmatprep.subr.bf16.mxu1 %v3978_v15 }
  0xc5   : > { %3076 = vmatpush3.bf16.msra.mxu0 %v3437_v51 }
  0xc6   : > { %3077 = vmatprep.subr.bf16.mxu0 %v3440_v54 }
  0xc7   : > { %2888 = vmatpush3.bf16.msra.mxu1 %v3980_v16 }
  0xc8   : > { %2953 = vmatprep.subr.bf16.mxu1 %v3935_v0  ;;  %3062 = vmatmul.mubr.bf16.gmra.mrb[12].mxu0 %v3439_v53 }
  0xc9   : > { %3078 = vmatpush3.bf16.msra.mxu0 %v3440_v54 }
  0xca   : > { %842 = vmatmul.mubr.bf16.gmra.mrb[16].mxu1 %v3408_v38  ;;  %3079 = vmatprep.subr.bf16.mxu0 %v3441_v55 }
  0xcb   : > { %849 = vmatprep.mubr.bf16.mxu1 %v3409_v39  ;;  %v3504_v39 = vld [vmem:[%s3921_s25 + $0x1c0] ss:$8 sps:$4 sm:$0xff]  }
  0xcd   : > { %3080 = vmatpush3.bf16.msra.mxu0 %v3441_v55 }
  0xce   : > { %2793 = vmatprep.subr.bf16.mxu0 %v3935_v0  ;;  %v3457_v0 = vld [vmem:[%s3921_s25 + $0x144] ss:$8 sps:$4 sm:$0xff]  }
  0xd2   : > { %850 = vmatmul.mubr.bf16.gmra.mrb[20].mxu1 %v3411_v44 }
  0xd3   : > { %857 = vmatprep.mubr.bf16.mxu1 %v3412_v45 }
  0xda   : > { %858 = vmatmul.mubr.bf16.gmra.mrb[24].mxu1 %v3414_v47 }
  0xdb   : > { %865 = vmatprep.mubr.bf16.mxu1 %v3415_v48  ;;  %v3507_v48 = vld [vmem:[%s3921_s25 + $0x1d0] ss:$8 sps:$4 sm:$0xff]  }
  0xe2   : > { %866 = vmatmul.mubr.bf16.gmra.mrb[28].mxu1 %v3417_v49  ;;  %v3508_v49 = vld [vmem:[%s3921_s25 + $0x1e4] ss:$8 sps:$4 sm:$0xff]  }
  0xe3   : > { %1568 = vmatprep.mubr.bf16.mxu1 %v3444_v56 }
  0xea   : > { %1569 = vmatmul.mubr.bf16.vlgmr.msra.gmra.mrb[32].mxu1 %v3442_v57  ;;  %v3510_v57 = vld [vmem:[%s3921_s25 + $0x1e0] ss:$8 sps:$4 sm:$0xff]  }
  0xeb   : > { %2954 = vmatpush3.bf16.msra.mxu1 %v3937_v1  ;;  %1576 = vmatprep.mubr.bf16.mxu1 %v3445_v58  ;;  %v3511_v58 = vld [vmem:[%s3921_s25 + $0x1f4] ss:$8 sps:$4 sm:$0xff]  }
  0xec   : > { %2955 = vmatprep.subr.bf16.mxu1 %v3940_v2 }
  0xef   : > { %2956 = vmatpush3.bf16.msra.mxu1 %v3943_v3 }
  0xf0   : > { %2957 = vmatprep.subr.bf16.mxu1 %v3946_v4 }
  0xf2   : > { %1577 = vmatmul.mubr.bf16.gmra.mrb[36].mxu1 %v3447_v59 }
  0xf3   : > { %2958 = vmatpush3.bf16.msra.mxu1 %v3949_v5  ;;  %1584 = vmatprep.mubr.bf16.mxu1 %v3448_v60 }
  0xf4   : > { %2959 = vmatprep.subr.bf16.mxu1 %v3952_v6 }
  0xf7   : > { %2960 = vmatpush3.bf16.msra.mxu1 %v3955_v7 }
  0xf8   : > { %2961 = vmatprep.subr.bf16.mxu1 %v3958_v8 }
  0xfa   : > { %1585 = vmatmul.mubr.bf16.gmra.mrb[40].mxu1 %v3450_v61 }
  0xfb   : > { %2962 = vmatpush3.bf16.msra.mxu1 %v3961_v9  ;;  %1592 = vmatprep.mubr.bf16.mxu1 %v3451_v62 }
  0xfc   : > { %2963 = vmatprep.subr.bf16.mxu1 %v3964_v10 }
  0xff   : > { %2964 = vmatpush3.bf16.msra.mxu1 %v3968_v12 }
 0x100   : > { %2965 = vmatprep.subr.bf16.mxu1 %v3971_v13 }
 0x102   : > { %1593 = vmatmul.mubr.bf16.gmra.mrb[44].mxu1 %v3453_v63 }
 0x103   : > { %2966 = vmatpush3.bf16.msra.mxu1 %v3975_v14  ;;  %1600 = vmatprep.mubr.bf16.mxu1 %v3457_v0 }
 0x104   : > { %2967 = vmatprep.subr.bf16.mxu1 %v3978_v15 }
 0x107   : > { %2968 = vmatpush3.bf16.msra.mxu1 %v3980_v16 }
 0x10a   : > { %1601 = vmatmul.mubr.bf16.gmra.mrb[48].mxu1 %v3459_v11 }
 0x10b   : > { %1608 = vmatprep.mubr.bf16.mxu1 %v3463_v17 }
 0x112   : > { %1609 = vmatmul.mubr.bf16.gmra.mrb[52].mxu1 %v3465_v18 }
 0x113   : > { %1616 = vmatprep.mubr.bf16.mxu1 %v3469_v19 }
 0x11a   : > { %1617 = vmatmul.mubr.bf16.gmra.mrb[56].mxu1 %v3471_v20 }
 0x11b   : > { %1624 = vmatprep.mubr.bf16.mxu1 %v3475_v21 }
 0x122   : > { %1625 = vmatmul.mubr.bf16.gmra.mrb[60].mxu1 %v3477_v22 }
 0x123   : > { %1948 = vmatprep.mubr.bf16.mxu1 %v3483_v23 }
 0x12a   : > { %1949 = vmatmul.mubr.bf16.vlgmr.msra.gmra.mrb[64].mxu1 %v3481_v24 }
 0x12b   : > { %1956 = vmatprep.mubr.bf16.mxu1 %v3487_v25 }
 0x132   : > { %1957 = vmatmul.mubr.bf16.gmra.mrb[68].mxu1 %v3489_v26 }
 0x133   : > { %1964 = vmatprep.mubr.bf16.mxu1 %v3493_v27 }
 0x13a   : > { %1965 = vmatmul.mubr.bf16.gmra.mrb[72].mxu1 %v3495_v28 }
 0x13b   : > { %1972 = vmatprep.mubr.bf16.mxu1 %v3499_v29 }
 0x142   : > { %1973 = vmatmul.mubr.bf16.gmra.mrb[76].mxu1 %v3501_v31  ;;  %v3456_v31 = vld [vmem:[%s3921_s25 + $0x84] ss:$8 sps:$4 sm:$0xff]  }
 0x143   : > { %1980 = vmatprep.mubr.bf16.mxu1 %v3502_v32 }
 0x14a   : > { %1981 = vmatmul.mubr.bf16.gmra.mrb[80].mxu1 %v3504_v39  ;;  %v3517_v39 = vld [vmem:[#allocation7 + $0x58] sm:$0xff]  }
 0x14b   : > { %1988 = vmatprep.mubr.bf16.mxu1 %v3505_v40  ;;  %v3468_v40 = vld [vmem:[%s3921_s25 + $0xa0] ss:$8 sps:$4 sm:$0xff]  }
 0x152   : > { %1989 = vmatmul.mubr.bf16.gmra.mrb[84].mxu1 %v3507_v48  ;;  %v3492_v48 = vld [vmem:[%s3921_s25 + $0xe0] ss:$8 sps:$4 sm:$0xff]  }
 0x153   : > { %1996 = vmatprep.mubr.bf16.mxu1 %v3508_v49  ;;  %v3496_v49 = vld [vmem:[%s3921_s25 + $0xf4] ss:$8 sps:$4 sm:$0xff]  }
 0x15a   : > { %1997 = vmatmul.mubr.bf16.gmra.mrb[88].mxu1 %v3510_v57 }
 0x15b   : > { %2004 = vmatprep.mubr.bf16.mxu1 %v3511_v58 }
 0x17d   : > { %v2729_v30 = vpop.f32.mrb[0].mxu1 }
 0x17e   : > { %v2730_v33 = vpop.f32.mrb[1].mxu1 }
 0x17f   : > { %v2731_v34 = vadd.f32 %v2730_v33, %v2729_v30  ;;  %v2732_v35 = vpop.f32.mrb[2].mxu1  ;;  %v3454_v33 = vld [vmem:[%s3921_s25 + $0x80] ss:$8 sps:$4 sm:$0xff]  }
 0x180   : > { %v2733_v36 = vpop.f32.mrb[3].mxu1 }
 0x181   : > { %v2734_v37 = vadd.f32 %v2733_v36, %v2732_v35  ;;  %v3515_v35 = vld [vmem:[#allocation7 + $0x48] sm:$0xff]   ;;  %v3516_v36 = vld [vmem:[#allocation7 + $0x50] sm:$0xff]  }
 0x183   : > { %v874_v38 = vpack.c.bf16 %v2734_v37, %v2731_v34  ;;  %v3460_v34 = vld [vmem:[%s3921_s25 + $0x94] ss:$8 sps:$4 sm:$0xff]   ;;  %v3462_v37 = vld [vmem:[%s3921_s25 + $0x90] ss:$8 sps:$4 sm:$0xff]  }
 0x185   : > { %v2735_v41 = vpop.f32.mrb[4].mxu1  ;;  %3081 = vmatprep.mubr.bf16.mxu0 %v874_v38  ;;  %v3466_v38 = vld [vmem:[%s3921_s25 + $0xa4] ss:$8 sps:$4 sm:$0xff]  }
 0x186   : > { %v2736_v42 = vpop.f32.mrb[5].mxu1 }
 0x187   : > { %v2737_v43 = vadd.f32 %v2736_v42, %v2735_v41  ;;  %v2738_v44 = vpop.f32.mrb[6].mxu1  ;;  %v3472_v41 = vld [vmem:[%s3921_s25 + $0xb4] ss:$8 sps:$4 sm:$0xff]   ;;  %v3474_v42 = vld [vmem:[%s3921_s25 + $0xb0] ss:$8 sps:$4 sm:$0xff]  }
 0x188   : > { %v2739_v45 = vpop.f32.mrb[7].mxu1 }
 0x189   : > { %v2740_v46 = vadd.f32 %v2739_v45, %v2738_v44  ;;  %v3480_v44 = vld [vmem:[%s3921_s25 + $0xc0] ss:$8 sps:$4 sm:$0xff]   ;;  %v3484_v45 = vld [vmem:[%s3921_s25 + $0xd4] ss:$8 sps:$4 sm:$0xff]  }
 0x18b   : > { %v875_v47 = vpack.c.bf16 %v2740_v46, %v2737_v43  ;;  %v3478_v43 = vld [vmem:[%s3921_s25 + $0xc4] ss:$8 sps:$4 sm:$0xff]   ;;  %v3486_v46 = vld [vmem:[%s3921_s25 + $0xd0] ss:$8 sps:$4 sm:$0xff]  }
 0x18d   : > { %v2741_v50 = vpop.f32.mrb[8].mxu1  ;;  %3082 = vmatmul.mubr.bf16.vlgmr.msra.gmra.mrb[0].mxu0 %v875_v47  ;;  %v3490_v47 = vld [vmem:[%s3921_s25 + $0xe4] ss:$8 sps:$4 sm:$0xff]  }
 0x18e   : > { %v2742_v51 = vpop.f32.mrb[9].mxu1  ;;  %2794 = vmatpush3.bf16.msra.mxu0 %v3937_v1 }
 0x18f   : > { %v2743_v52 = vadd.f32 %v2742_v51, %v2741_v50  ;;  %v2744_v53 = vpop.f32.mrb[10].mxu1  ;;  %2795 = vmatprep.subr.bf16.mxu0 %v3940_v2  ;;  %v3498_v50 = vld [vmem:[%s3921_s25 + $0xf0] ss:$8 sps:$4 sm:$0xff]  }
 0x190   : > { %v2745_v54 = vpop.f32.mrb[11].mxu1 }
 0x191   : > { %v2746_v55 = vadd.f32 %v2745_v54, %v2744_v53 }
 0x192   : > { %2796 = vmatpush3.bf16.msra.mxu0 %v3943_v3 }
 0x193   : > { %v876_v56 = vpack.c.bf16 %v2746_v55, %v2743_v52  ;;  %2797 = vmatprep.subr.bf16.mxu0 %v3946_v4  ;;  %v3513_v4 = vld [vmem:[%s3921_s25 + $0x1f0] ss:$8 sps:$4 sm:$0xff]  }
 0x194   : > { %2005 = vmatmul.mubr.bf16.gmra.mrb[92].mxu1 %v3513_v4 }
 0x195   : > { %v2747_v59 = vpop.f32.mrb[12].mxu1  ;;  %3085 = vmatprep.mubr.bf16.mxu0 %v876_v56 }
 0x196   : > { %v2748_v60 = vpop.f32.mrb[13].mxu1  ;;  %2798 = vmatpush3.bf16.msra.mxu0 %v3949_v5 }
 0x197   : > { %v2749_v1 = vadd.f32 %v2748_v60, %v2747_v59  ;;  %v2750_v61 = vpop.f32.mrb[14].mxu1  ;;  %2799 = vmatprep.subr.bf16.mxu0 %v3952_v6 }
 0x198   : > { %v2751_v2 = vpop.f32.mrb[15].mxu1 }
 0x199   : > { %v2752_v62 = vadd.f32 %v2751_v2, %v2750_v61 }
 0x19a   : > { %2800 = vmatpush3.bf16.msra.mxu0 %v3955_v7 }
 0x19b   : > { %v877_v3 = vpack.c.bf16 %v2752_v62, %v2749_v1  ;;  %2801 = vmatprep.subr.bf16.mxu0 %v3958_v8 }
 0x19d   : > { %v2753_v63 = vpop.f32.mrb[16].mxu1  ;;  %3086 = vmatmul.mubr.bf16.gmra.mrb[4].mxu0 %v877_v3 }
 0x19e   : > { %v2754_v0 = vpop.f32.mrb[17].mxu1  ;;  %2802 = vmatpush3.bf16.msra.mxu0 %v3961_v9  ;;  %v3514_v9 = vld [vmem:[#allocation7 + $0x40] sm:$0xff]  }
 0x19f   : > { %v2755_v5 = vadd.f32 %v2754_v0, %v2753_v63  ;;  %v2756_v11 = vpop.f32.mrb[18].mxu1  ;;  %2803 = vmatprep.subr.bf16.mxu0 %v3964_v10 }
 0x1a0   : > { %v2757_v6 = vpop.f32.mrb[19].mxu1 }
 0x1a1   : > { %v2758_v17 = vadd.f32 %v2757_v6, %v2756_v11 }
 0x1a2   : > { %2804 = vmatpush3.bf16.msra.mxu0 %v3968_v12 }
 0x1a3   : > { %v878_v18 = vpack.c.bf16 %v2758_v17, %v2755_v5  ;;  %2805 = vmatprep.subr.bf16.mxu0 %v3971_v13  ;;  %v3518_v5 = vld [vmem:[#allocation7 + $0x60] sm:$0xff]   ;;  %v3519_v17 = vld [vmem:[#allocation7 + $0x68] sm:$0xff]  }
 0x1a5   : > { %v2759_v7 = vpop.f32.mrb[20].mxu1  ;;  %3089 = vmatprep.mubr.bf16.mxu0 %v878_v18 }
 0x1a6   : > { %v2760_v8 = vpop.f32.mrb[21].mxu1  ;;  %2806 = vmatpush3.bf16.msra.mxu0 %v3975_v14 }
 0x1a7   : > { %v2761_v19 = vadd.f32 %v2760_v8, %v2759_v7  ;;  %v2762_v20 = vpop.f32.mrb[22].mxu1  ;;  %2807 = vmatprep.subr.bf16.mxu0 %v3978_v15 }
 0x1a8   : > { %v2763_v21 = vpop.f32.mrb[23].mxu1 }
 0x1a9   : > { %v2764_v10 = vadd.f32 %v2763_v21, %v2762_v20 }
 0x1aa   : > { %2808 = vmatpush3.bf16.msra.mxu0 %v3980_v16 }
 0x1ab   : > { %v879_v22 = vpack.c.bf16 %v2764_v10, %v2761_v19  ;;  %3097 = vmatprep.subr.bf16.mxu0 %v3514_v9  ;;  %v3520_v19 = vld [vmem:[#allocation7 + $0x70] sm:$0xff]  }
 0x1ad   : > { %v2765_v12 = vpop.f32.mrb[24].mxu1  ;;  %3090 = vmatmul.mubr.bf16.gmra.mrb[8].mxu0 %v879_v22  ;;  %v3521_v22 = vld [vmem:[#allocation7 + $0x78] sm:$0xff]  }
 0x1ae   : > { %v2766_v13 = vpop.f32.mrb[25].mxu1 }
 0x1af   : > { %v2767_v23 = vadd.f32 %v2766_v13, %v2765_v12  ;;  %v2768_v24 = vpop.f32.mrb[26].mxu1 }
 0x1b0   : > { %v2769_v14 = vpop.f32.mrb[27].mxu1 }
 0x1b1   : > { %v2770_v25 = vadd.f32 %v2769_v14, %v2768_v24 }
 0x1b3   : > { %v880_v26 = vpack.c.bf16 %v2770_v25, %v2767_v23 }
 0x1b5   : > { %v2771_v27 = vpop.f32.mrb[28].mxu1  ;;  %3093 = vmatprep.mubr.bf16.mxu0 %v880_v26 }
 0x1b6   : > { %v2772_v15 = vpop.f32.mrb[29].mxu1 }
 0x1b7   : > { %v2773_v28 = vadd.f32 %v2772_v15, %v2771_v27  ;;  %v2774_v29 = vpop.f32.mrb[30].mxu1 }
 0x1b8   : > { %v2775_v16 = vpop.f32.mrb[31].mxu1 }
 0x1b9   : > { %v2776_v30 = vadd.f32 %v2775_v16, %v2774_v29 }
 0x1bb   : > { %v881_v32 = vpack.c.bf16 %v2776_v30, %v2773_v28 }
 0x1bd   : > { %3094 = vmatmul.mubr.bf16.gmra.mrb[12].mxu0 %v881_v32  ;;  %v2889_v51 = vpop.f32.mrb[32].mxu1 }
 0x1be   : > { %1188 = vmatprep.mubr.bf16.mxu0 %v3456_v31  ;;  %v2890_v52 = vpop.f32.mrb[33].mxu1 }
 0x1bf   : > { %v4106_v53 = vadd.f32 %v2890_v52, %v2889_v51  ;;  %v2892_v54 = vpop.f32.mrb[34].mxu1  ;;  %v4161_v51 = vld [vmem:[#allocation7 + $0xc8] sm:$0xff]  }
 0x1c0   : > { %v2893_v55 = vpop.f32.mrb[35].mxu1 }
 0x1c1   : > { %v4108_v56 = vadd.f32 %v2893_v55, %v2892_v54 }
 0x1c3   : > { %v1633_v57 = vpack.c.bf16 %v4108_v56, %v4106_v53 }
 0x1c5   : > { %1189 = vmatmul.mubr.bf16.vlgmr.msra.gmra.mrb[16].mxu0 %v3454_v33  ;;  %v2895_v58 = vpop.f32.mrb[36].mxu1 }
 0x1c6   : > { %1196 = vmatprep.mubr.bf16.mxu0 %v3460_v34  ;;  %3098 = vmatpush3.bf16.msra.mxu0 %v3514_v9  ;;  %v2896_v59 = vpop.f32.mrb[37].mxu1 }
 0x1c7   : > { %3099 = vmatprep.subr.bf16.mxu0 %v3515_v35  ;;  %v4112_v60 = vadd.f32 %v2896_v59, %v2895_v58  ;;  %v2898_v1 = vpop.f32.mrb[38].mxu1 }
 0x1c8   : > { %v2899_v61 = vpop.f32.mrb[39].mxu1 }
 0x1c9   : > { %v4114_v2 = vadd.f32 %v2899_v61, %v2898_v1 }
 0x1ca   : > { %3100 = vmatpush3.bf16.msra.mxu0 %v3515_v35 }
 0x1cb   : > { %3101 = vmatprep.subr.bf16.mxu0 %v3516_v36  ;;  %v1634_v62 = vpack.c.bf16 %v4114_v2, %v4112_v60 }
 0x1cd   : > { %1197 = vmatmul.mubr.bf16.gmra.mrb[20].mxu0 %v3462_v37  ;;  %v2901_v3 = vpop.f32.mrb[40].mxu1 }
 0x1ce   : > { %1204 = vmatprep.mubr.bf16.mxu0 %v3466_v38  ;;  %3102 = vmatpush3.bf16.msra.mxu0 %v3516_v36  ;;  %v2902_v4 = vpop.f32.mrb[41].mxu1 }
 0x1cf   : > { %3103 = vmatprep.subr.bf16.mxu0 %v3517_v39  ;;  %v4118_v63 = vadd.f32 %v2902_v4, %v2901_v3  ;;  %v2904_v0 = vpop.f32.mrb[42].mxu1  ;;  %v4171_v3 = vld [vmem:[#allocation7 + $0xd0] sm:$0xff]  }
 0x1d0   : > { %v2905_v11 = vpop.f32.mrb[43].mxu1 }
 0x1d1   : > { %v4120_v6 = vadd.f32 %v2905_v11, %v2904_v0 }
 0x1d2   : > { %3104 = vmatpush3.bf16.msra.mxu0 %v3517_v39 }
 0x1d3   : > { %3105 = vmatprep.subr.bf16.mxu0 %v3518_v5  ;;  %v1635_v18 = vpack.c.bf16 %v4120_v6, %v4118_v63 }
 0x1d5   : > { %1205 = vmatmul.mubr.bf16.gmra.mrb[24].mxu0 %v3468_v40  ;;  %v2907_v7 = vpop.f32.mrb[44].mxu1 }
 0x1d6   : > { %1212 = vmatprep.mubr.bf16.mxu0 %v3472_v41  ;;  %3106 = vmatpush3.bf16.msra.mxu0 %v3518_v5  ;;  %v2908_v8 = vpop.f32.mrb[45].mxu1 }
 0x1d7   : > { %3107 = vmatprep.subr.bf16.mxu0 %v3519_v17  ;;  %v4124_v20 = vadd.f32 %v2908_v8, %v2907_v7  ;;  %v2910_v9 = vpop.f32.mrb[46].mxu1 }
 0x1d8   : > { %v2911_v21 = vpop.f32.mrb[47].mxu1 }
 0x1d9   : > { %v4126_v10 = vadd.f32 %v2911_v21, %v2910_v9 }
 0x1da   : > { %3108 = vmatpush3.bf16.msra.mxu0 %v3519_v17 }
 0x1db   : > { %3109 = vmatprep.subr.bf16.mxu0 %v3520_v19  ;;  %v1636_v12 = vpack.c.bf16 %v4126_v10, %v4124_v20  ;;  %v4269_v10 = vld [vmem:[%s4353_s4] ss:$0 sm:$0xff] }
 0x1dd   : > { %1213 = vmatmul.mubr.bf16.gmra.mrb[28].mxu0 %v3474_v42  ;;  %v2913_v13 = vpop.f32.mrb[48].mxu1  ;;  %v4148_v42 = vld [vmem:[#allocation7 + $0x80] sm:$0xff]  }
 0x1de   : > { %1220 = vmatprep.mubr.bf16.mxu0 %v3478_v43  ;;  %3110 = vmatpush3.bf16.msra.mxu0 %v3520_v19  ;;  %v2914_v23 = vpop.f32.mrb[49].mxu1  ;;  %v4150_v43 = vld [vmem:[#allocation7 + $0xc0] sm:$0xff]   ;;  %v4181_v19 = vld [vmem:[#allocation7 + $0xd8] sm:$0xff]  }
 0x1df   : > { %3111 = vmatprep.subr.bf16.mxu0 %v3521_v22  ;;  %v4130_v24 = vadd.f32 %v2914_v23, %v2913_v13  ;;  %v2916_v14 = vpop.f32.mrb[50].mxu1  ;;  %3193 = vmatprep.subr.bf16.mxu1 %v4150_v43 }
 0x1e0   : > { %v2917_v25 = vpop.f32.mrb[51].mxu1  ;;  %3201 = vmatpush3.bf16.msra.mxu1 %v4150_v43 }
 0x1e1   : > { %v4132_v26 = vadd.f32 %v2917_v25, %v2916_v14  ;;  %3194 = vmatprep.subr.bf16.mxu1 %v4161_v51  ;;  %v4189_v14 = vld [vmem:[#allocation7 + $0xe0] sm:$0xff]  }
 0x1e2   : > { %3112 = vmatpush3.bf16.msra.mxu0 %v3521_v22 }
 0x1e3   : > { %v1637_v27 = vpack.c.bf16 %v4132_v26, %v4130_v24  ;;  %3129 = vmatprep.subr.bf16.mxu0 %v4148_v42 }
 0x1e4   : > { %3202 = vmatpush3.bf16.msra.mxu1 %v4161_v51 }
 0x1e5   : > { %1221 = vmatmul.mubr.bf16.gmra.mrb[32].mxu0 %v3480_v44  ;;  %v2919_v15 = vpop.f32.mrb[52].mxu1  ;;  %3195 = vmatprep.subr.bf16.mxu1 %v4171_v3 }
 0x1e6   : > { %1228 = vmatprep.mubr.bf16.mxu0 %v3484_v45  ;;  %v2920_v28 = vpop.f32.mrb[53].mxu1 }
 0x1e7   : > { %v4136_v29 = vadd.f32 %v2920_v28, %v2919_v15  ;;  %v2922_v16 = vpop.f32.mrb[54].mxu1 }
 0x1e8   : > { %v2923_v30 = vpop.f32.mrb[55].mxu1  ;;  %3203 = vmatpush3.bf16.msra.mxu1 %v4171_v3 }
 0x1e9   : > { %v4138_v31 = vadd.f32 %v2923_v30, %v2922_v16  ;;  %3196 = vmatprep.subr.bf16.mxu1 %v4181_v19 }
 0x1eb   : > { %v1638_v32 = vpack.c.bf16 %v4138_v31, %v4136_v29 }
 0x1ec   : > { %3204 = vmatpush3.bf16.msra.mxu1 %v4181_v19 }
 0x1ed   : > { %1229 = vmatmul.mubr.bf16.gmra.mrb[36].mxu0 %v3486_v46  ;;  %v2925_v33 = vpop.f32.mrb[56].mxu1  ;;  %3197 = vmatprep.subr.bf16.mxu1 %v4189_v14 }
 0x1ee   : > { %1236 = vmatprep.mubr.bf16.mxu0 %v3490_v47  ;;  %v2926_v34 = vpop.f32.mrb[57].mxu1 }
 0x1ef   : > { %v4142_v35 = vadd.f32 %v2926_v34, %v2925_v33  ;;  %v2928_v36 = vpop.f32.mrb[58].mxu1 }
 0x1f0   : > { %v2929_v37 = vpop.f32.mrb[59].mxu1  ;;  %3205 = vmatpush3.bf16.msra.mxu1 %v4189_v14 }
 0x1f1   : > { %v4144_v38 = vadd.f32 %v2929_v37, %v2928_v36  ;;  %v4201_v36 = vld [vmem:[#allocation7 + $0xe8] sm:$0xff]  }
 0x1f2   : > { %3198 = vmatprep.subr.bf16.mxu1 %v4201_v36 }
 0x1f3   : > { %v1639_v39 = vpack.c.bf16 %v4144_v38, %v4142_v35 }
 0x1f4   : > { %3206 = vmatpush3.bf16.msra.mxu1 %v4201_v36 }
 0x1f5   : > { %1237 = vmatmul.mubr.bf16.gmra.mrb[40].mxu0 %v3492_v48  ;;  %v2931_v40 = vpop.f32.mrb[60].mxu1 }
 0x1f6   : > { %1244 = vmatprep.mubr.bf16.mxu0 %v3496_v49  ;;  %v2932_v41 = vpop.f32.mrb[61].mxu1 }
 0x1f7   : > { %v4152_v44 = vadd.f32 %v2932_v41, %v2931_v40  ;;  %v2934_v45 = vpop.f32.mrb[62].mxu1 }
 0x1f8   : > { %v2935_v46 = vpop.f32.mrb[63].mxu1 }
 0x1f9   : > { %v4156_v47 = vadd.f32 %v2935_v46, %v2934_v45 }
 0x1fb   : > { %v1640_v48 = vpack.c.bf16 %v4156_v47, %v4152_v44 }
 0x1fd   : > { %1245 = vmatmul.mubr.bf16.gmra.mrb[44].mxu0 %v3498_v50  ;;  %v2969_v49 = vpop.f32.mrb[64].mxu1 }
 0x1fe   : > { %v2970_v50 = vpop.f32.mrb[65].mxu1 }
 0x1ff   : > { %v4163_v52 = vadd.f32 %v2970_v50, %v2969_v49  ;;  %v2972_v54 = vpop.f32.mrb[66].mxu1  ;;  %v4205_v49 = vld [vmem:[#allocation7 + $0xf0] sm:$0xff]  }
 0x200   : > { %v2973_v55 = vpop.f32.mrb[67].mxu1  ;;  %3199 = vmatprep.subr.bf16.mxu1 %v4205_v49 }
 0x201   : > { %v4166_v58 = vadd.f32 %v2973_v55, %v2972_v54  ;;  %3207 = vmatpush3.bf16.msra.mxu1 %v4205_v49 }
 0x203   : > { %v2013_v59 = vpack.c.bf16 %v4166_v58, %v4163_v52 }
 0x205   : > { %v2975_v1 = vpop.f32.mrb[68].mxu1 }
 0x206   : > { %v2976_v61 = vpop.f32.mrb[69].mxu1 }
 0x207   : > { %v4173_v4 = vadd.f32 %v2976_v61, %v2975_v1  ;;  %v2978_v0 = vpop.f32.mrb[70].mxu1 }
 0x208   : > { %v2979_v5 = vpop.f32.mrb[71].mxu1 }
 0x209   : > { %v4176_v11 = vadd.f32 %v2979_v5, %v2978_v0  ;;  %v4209_v5 = vld [vmem:[#allocation7 + $0xf8] sm:$0xff]  }
 0x20a   : > { %3200 = vmatprep.subr.bf16.mxu1 %v4209_v5 }
 0x20b   : > { %v2014_v17 = vpack.c.bf16 %v4176_v11, %v4173_v4  ;;  %3208 = vmatpush3.bf16.msra.mxu1 %v4209_v5 }
 0x20d   : > { %v2981_v7 = vpop.f32.mrb[72].mxu1 }
 0x20e   : > { %v2982_v8 = vpop.f32.mrb[73].mxu1 }
 0x20f   : > { %v4183_v9 = vadd.f32 %v2982_v8, %v2981_v7  ;;  %v2984_v21 = vpop.f32.mrb[74].mxu1 }
 0x210   : > { %v2985_v22 = vpop.f32.mrb[75].mxu1 }
 0x211   : > { %v4186_v13 = vadd.f32 %v2985_v22, %v2984_v21 }
 0x213   : > { %v4380_v53 = vpack.c.bf16 %v4186_v13, %v4183_v9 }
 0x215   : > { %v2987_v23 = vpop.f32.mrb[76].mxu1 }
 0x216   : > { %v2988_v25 = vpop.f32.mrb[77].mxu1 }
 0x217   : > { %v4193_v28 = vadd.f32 %v2988_v25, %v2987_v23  ;;  %v2990_v16 = vpop.f32.mrb[78].mxu1 }
 0x218   : > { %v2991_v30 = vpop.f32.mrb[79].mxu1 }
 0x219   : > { %v4197_v33 = vadd.f32 %v2991_v30, %v2990_v16 }
 0x21b   : > { %v4381_v56 = vpack.c.bf16 %v4197_v33, %v4193_v28 }
 0x21d   : > { %v2993_v37 = vpop.f32.mrb[80].mxu1 }
 0x21e   : > { %v2994_v40 = vpop.f32.mrb[81].mxu1 }
 0x21f   : > { %v2995_v41 = vadd.f32 %v2994_v40, %v2993_v37  ;;  %v2996_v45 = vpop.f32.mrb[82].mxu1 }
 0x220   : > { %v2997_v46 = vpop.f32.mrb[83].mxu1 }
 0x221   : > { %v2998_v50 = vadd.f32 %v2997_v46, %v2996_v45 }
 0x223   : > { %v2017_v1 = vpack.c.bf16 %v2998_v50, %v2995_v41 }
 0x225   : > { %v2999_v54 = vpop.f32.mrb[84].mxu1  ;;  %3185 = vmatprep.mubr.bf16.mxu1 %v2017_v1 }
 0x226   : > { %v3000_v55 = vpop.f32.mrb[85].mxu1 }
 0x227   : > { %v3001_v61 = vadd.f32 %v3000_v55, %v2999_v54  ;;  %v3002_v0 = vpop.f32.mrb[86].mxu1 }
 0x228   : > { %v3003_v7 = vpop.f32.mrb[87].mxu1 }
 0x229   : > { %v3004_v8 = vadd.f32 %v3003_v7, %v3002_v0 }
 0x22b   : > { %v2018_v23 = vpack.c.bf16 %v3004_v8, %v3001_v61 }
 0x22d   : > { %v3005_v21 = vpop.f32.mrb[88].mxu1  ;;  %3186 = vmatmul.mubr.bf16.vlgmr.msra.gmra.mrb[96].mxu1 %v2018_v23 }
 0x22e   : > { %v3006_v22 = vpop.f32.mrb[89].mxu1 }
 0x22f   : > { %v3007_v25 = vadd.f32 %v3006_v22, %v3005_v21  ;;  %v3008_v16 = vpop.f32.mrb[90].mxu1 }
 0x230   : > { %v3009_v30 = vpop.f32.mrb[91].mxu1 }
 0x231   : > { %v3010_v37 = vadd.f32 %v3009_v30, %v3008_v16 }
 0x233   : > { %v2019_v45 = vpack.c.bf16 %v3010_v37, %v3007_v25 }
 0x235   : > { %3189 = vmatprep.mubr.bf16.mxu1 %v2019_v45 }
 0x267   : > { %v3011_v40 = vpop.f32.mrb[92].mxu1 }
 0x268   : > { %v3012_v41 = vpop.f32.mrb[93].mxu1 }
 0x269   : > { %v3013_v46 = vadd.f32 %v3012_v41, %v3011_v40  ;;  %v3014_v50 = vpop.f32.mrb[94].mxu1  ;;  %v3524_v41 = vld [vmem:[#allocation7 + $0x88] sm:$0xff]  }
 0x26a   : > { %v3015_v54 = vpop.f32.mrb[95].mxu1 }
 0x26b   : > { %v3016_v55 = vadd.f32 %v3015_v54, %v3014_v50 }
 0x26d   : > { %v2020_v1 = vpack.c.bf16 %v3016_v55, %v3013_v46  ;;  %v3525_v55 = vld [vmem:[#allocation7 + $0x90] sm:$0xff]  }
 0x26f   : > { %3190 = vmatmul.mubr.bf16.gmra.mrb[100].mxu1 %v2020_v1 }
 0x298   : > { %v2809_v0 = vpop.f32.mrb[16].mxu0 }
 0x299   : > { %v2810_v7 = vpop.f32.mrb[17].mxu0 }
 0x29a   : > { %v2811_v34 = vadd.f32 %v2810_v7, %v2809_v0  ;;  %v2812_v15 = vpop.f32.mrb[18].mxu0  ;;  %v3527_v0 = vld [vmem:[#allocation7 + $0x98] sm:$0xff]  }
 0x29b   : > { %v2813_v61 = vpop.f32.mrb[19].mxu0 }
 0x29c   : > { %v2814_v8 = vadd.f32 %v2813_v61, %v2812_v15 }
 0x29e   : > { %v1253_v21 = vpack.c.bf16 %v2814_v8, %v2811_v34 }
 0x2a0   : > { %v2815_v22 = vpop.f32.mrb[20].mxu0  ;;  %3113 = vmatprep.mubr.bf16.mxu0 %v1253_v21 }
 0x2a1   : > { %v2816_v16 = vpop.f32.mrb[21].mxu0 }
 0x2a2   : > { %v2817_v23 = vadd.f32 %v2816_v16, %v2815_v22  ;;  %v2818_v30 = vpop.f32.mrb[22].mxu0  ;;  %v3528_v22 = vld [vmem:[#allocation7 + $0xa0] sm:$0xff]  }
 0x2a3   : > { %v2819_v25 = vpop.f32.mrb[23].mxu0 }
 0x2a4   : > { %v2820_v37 = vadd.f32 %v2819_v25, %v2818_v30  ;;  %v3530_v30 = vld [vmem:[#allocation7 + $0xa8] sm:$0xff]  }
 0x2a6   : > { %v1254_v40 = vpack.c.bf16 %v2820_v37, %v2817_v23 }
 0x2a8   : > { %v2821_v50 = vpop.f32.mrb[24].mxu0  ;;  %3114 = vmatmul.mubr.bf16.vlgmr.msra.gmra.mrb[0].mxu0 %v1254_v40 }
 0x2a9   : > { %v2822_v45 = vpop.f32.mrb[25].mxu0  ;;  %3130 = vmatpush3.bf16.msra.mxu0 %v4148_v42 }
 0x2aa   : > { %v2823_v46 = vadd.f32 %v2822_v45, %v2821_v50  ;;  %v2824_v54 = vpop.f32.mrb[26].mxu0  ;;  %3131 = vmatprep.subr.bf16.mxu0 %v3524_v41  ;;  %v3531_v50 = vld [vmem:[#allocation7 + $0xb0] sm:$0xff]  }
 0x2ab   : > { %v2825_v15 = vpop.f32.mrb[27].mxu0 }
 0x2ac   : > { %v2826_v34 = vadd.f32 %v2825_v15, %v2824_v54 }
 0x2ad   : > { %3132 = vmatpush3.bf16.msra.mxu0 %v3524_v41 }
 0x2ae   : > { %v1255_v1 = vpack.c.bf16 %v2826_v34, %v2823_v46  ;;  %3133 = vmatprep.subr.bf16.mxu0 %v3525_v55 }
 0x2b0   : > { %v2827_v7 = vpop.f32.mrb[28].mxu0  ;;  %3117 = vmatprep.mubr.bf16.mxu0 %v1255_v1 }
 0x2b1   : > { %v2828_v61 = vpop.f32.mrb[29].mxu0  ;;  %3134 = vmatpush3.bf16.msra.mxu0 %v3525_v55  ;;  %v3533_v55 = vld [vmem:[#allocation7 + $0xb8] sm:$0xff]  }
 0x2b2   : > { %v2829_v8 = vadd.f32 %v2828_v61, %v2827_v7  ;;  %v2830_v21 = vpop.f32.mrb[30].mxu0  ;;  %3135 = vmatprep.subr.bf16.mxu0 %v3527_v0 }
 0x2b3   : > { %v2831_v16 = vpop.f32.mrb[31].mxu0 }
 0x2b4   : > { %v2832_v42 = vadd.f32 %v2831_v16, %v2830_v21 }
 0x2b5   : > { %3136 = vmatpush3.bf16.msra.mxu0 %v3527_v0 }
 0x2b6   : > { %v1256_v23 = vpack.c.bf16 %v2832_v42, %v2829_v8  ;;  %3137 = vmatprep.subr.bf16.mxu0 %v3528_v22 }
 0x2b8   : > { %v2833_v25 = vpop.f32.mrb[32].mxu0  ;;  %3118 = vmatmul.mubr.bf16.gmra.mrb[4].mxu0 %v1256_v23 }
 0x2b9   : > { %v2834_v37 = vpop.f32.mrb[33].mxu0  ;;  %3138 = vmatpush3.bf16.msra.mxu0 %v3528_v22 }
 0x2ba   : > { %v2835_v40 = vadd.f32 %v2834_v37, %v2833_v25  ;;  %v2836_v41 = vpop.f32.mrb[34].mxu0  ;;  %3139 = vmatprep.subr.bf16.mxu0 %v3530_v30 }
 0x2bb   : > { %v2837_v45 = vpop.f32.mrb[35].mxu0 }
 0x2bc   : > { %v2838_v46 = vadd.f32 %v2837_v45, %v2836_v41 }
 0x2bd   : > { %3140 = vmatpush3.bf16.msra.mxu0 %v3530_v30 }
 0x2be   : > { %v1257_v54 = vpack.c.bf16 %v2838_v46, %v2835_v40  ;;  %3141 = vmatprep.subr.bf16.mxu0 %v3531_v50 }
 0x2c0   : > { %v2839_v15 = vpop.f32.mrb[36].mxu0  ;;  %3121 = vmatprep.mubr.bf16.mxu0 %v1257_v54 }
 0x2c1   : > { %v2840_v34 = vpop.f32.mrb[37].mxu0  ;;  %3142 = vmatpush3.bf16.msra.mxu0 %v3531_v50 }
 0x2c2   : > { %v2841_v1 = vadd.f32 %v2840_v34, %v2839_v15  ;;  %v2842_v0 = vpop.f32.mrb[38].mxu0  ;;  %3143 = vmatprep.subr.bf16.mxu0 %v3533_v55 }
 0x2c3   : > { %v2843_v7 = vpop.f32.mrb[39].mxu0 }
 0x2c4   : > { %v2844_v61 = vadd.f32 %v2843_v7, %v2842_v0 }
 0x2c5   : > { %3144 = vmatpush3.bf16.msra.mxu0 %v3533_v55 }
 0x2c6   : > { %v1258_v8 = vpack.c.bf16 %v2844_v61, %v2841_v1  ;;  %3161 = vmatprep.subr.bf16.mxu0 %v4150_v43 }
 0x2c8   : > { %v2845_v21 = vpop.f32.mrb[40].mxu0  ;;  %3122 = vmatmul.mubr.bf16.gmra.mrb[8].mxu0 %v1258_v8 }
 0x2c9   : > { %v2846_v22 = vpop.f32.mrb[41].mxu0 }
 0x2ca   : > { %v2847_v16 = vadd.f32 %v2846_v22, %v2845_v21  ;;  %v2848_v42 = vpop.f32.mrb[42].mxu0 }
 0x2cb   : > { %v2849_v23 = vpop.f32.mrb[43].mxu0 }
 0x2cc   : > { %v2850_v30 = vadd.f32 %v2849_v23, %v2848_v42 }
 0x2ce   : > { %v1259_v25 = vpack.c.bf16 %v2850_v30, %v2847_v16 }
 0x2d0   : > { %v2851_v37 = vpop.f32.mrb[44].mxu0  ;;  %3125 = vmatprep.mubr.bf16.mxu0 %v1259_v25 }
 0x2d1   : > { %v2852_v40 = vpop.f32.mrb[45].mxu0 }
 0x2d2   : > { %v2853_v41 = vadd.f32 %v2852_v40, %v2851_v37  ;;  %v2854_v50 = vpop.f32.mrb[46].mxu0 }
 0x2d3   : > { %v2855_v45 = vpop.f32.mrb[47].mxu0 }
 0x2d4   : > { %v2856_v46 = vadd.f32 %v2855_v45, %v2854_v50 }
 0x2d6   : > { %v1260_v54 = vpack.c.bf16 %v2856_v46, %v2853_v41 }
 0x2d8   : > { %3126 = vmatmul.mubr.bf16.gmra.mrb[12].mxu0 %v1260_v54 }
 0x2d9   : > { %3145 = vmatprep.mubr.bf16.mxu0 %v1633_v57 }
 0x2e0   : > { %3146 = vmatmul.mubr.bf16.vlgmr.msra.gmra.mrb[0].mxu0 %v1634_v62 }
 0x2e1   : > { %3162 = vmatpush3.bf16.msra.mxu0 %v4150_v43  ;;  %3149 = vmatprep.mubr.bf16.mxu0 %v1635_v18 }
 0x2e2   : > { %3163 = vmatprep.subr.bf16.mxu0 %v4161_v51 }
 0x2e5   : > { %3164 = vmatpush3.bf16.msra.mxu0 %v4161_v51 }
 0x2e6   : > { %3165 = vmatprep.subr.bf16.mxu0 %v4171_v3 }
 0x2e8   : > { %3150 = vmatmul.mubr.bf16.gmra.mrb[4].mxu0 %v1636_v12 }
 0x2e9   : > { %3166 = vmatpush3.bf16.msra.mxu0 %v4171_v3  ;;  %3153 = vmatprep.mubr.bf16.mxu0 %v1637_v27 }
 0x2ea   : > { %3167 = vmatprep.subr.bf16.mxu0 %v4181_v19 }
 0x2ed   : > { %3168 = vmatpush3.bf16.msra.mxu0 %v4181_v19 }
 0x2ee   : > { %3169 = vmatprep.subr.bf16.mxu0 %v4189_v14 }
 0x2f0   : > { %3154 = vmatmul.mubr.bf16.gmra.mrb[8].mxu0 %v1638_v32 }
 0x2f1   : > { %3170 = vmatpush3.bf16.msra.mxu0 %v4189_v14  ;;  %3157 = vmatprep.mubr.bf16.mxu0 %v1639_v39 }
 0x2f2   : > { %3171 = vmatprep.subr.bf16.mxu0 %v4201_v36 }
 0x2f5   : > { %3172 = vmatpush3.bf16.msra.mxu0 %v4201_v36 }
 0x2f6   : > { %3173 = vmatprep.subr.bf16.mxu0 %v4205_v49 }
 0x2f8   : > { %3158 = vmatmul.mubr.bf16.gmra.mrb[12].mxu0 %v1640_v48 }
 0x2f9   : > { %3174 = vmatpush3.bf16.msra.mxu0 %v4205_v49  ;;  %3177 = vmatprep.mubr.bf16.mxu0 %v2013_v59 }
 0x2fa   : > { %3175 = vmatprep.subr.bf16.mxu0 %v4209_v5 }
 0x2fd   : > { %3176 = vmatpush3.bf16.msra.mxu0 %v4209_v5 }
 0x300   : > { %3178 = vmatmul.mubr.bf16.vlgmr.msra.gmra.mrb[0].mxu0 %v2014_v17  ;;  %v3187_v57 = vpop.f32.mrb[96].mxu1 }
 0x301   : > { %3181 = vmatprep.mubr.bf16.mxu0 %v4380_v53  ;;  %v2152_v60 = vpop.f32.mrb[97].mxu1 }
 0x302   : > { %v3188_v2 = vpop.f32.mrb[98].mxu1 }
 0x303   : > { %v2155_v62 = vpop.f32.mrb[99].mxu1 }
 0x308   : > { %3182 = vmatmul.mubr.bf16.gmra.mrb[4].mxu0 %v4381_v56 }
 0x342   : > { %v3191_v63 = vpop.f32.mrb[100].mxu1 }
 0x343   : > { %v2168_v6 = vpop.f32.mrb[101].mxu1 }
 0x344   : > { %v3192_v18 = vpop.f32.mrb[102].mxu1 }
 0x345   : > { %v2171_v20 = vpop.f32.mrb[103].mxu1 }
 0x3c3   : > { %v3155_v12 = vpop.f32.mrb[8].mxu0 }
 0x3c4   : > { %v3217_v24 = vadd.f32 %v3155_v12, %v4269_v10  ;;  %v1772_v26 = vpop.f32.mrb[9].mxu0 }
 0x3c5   : > { %v3219_v27 = vadd.f32 %v4269_v10, %v1772_v26  ;;  %v3156_v29 = vpop.f32.mrb[10].mxu0 }
 0x3c6   : > { %v3221_v31 = vadd.f32 %v3156_v29, %v4269_v10  ;;  %v3218_v32 = vadd.f32 %v3217_v24, %v3187_v57  ;;  %v1775_v35 = vpop.f32.mrb[11].mxu0 }
 0x3c7   : > { %v3223_v38 = vadd.f32 %v4269_v10, %v1775_v35  ;;  %v3220_v39 = vadd.f32 %v3219_v27, %v2152_v60 }
 0x3c8   : > { %v3222_v43 = vadd.f32 %v3221_v31, %v3188_v2  ;;  %v2209_v47 = vmax.f32 %v3218_v32, 0.0 }
 0x3c9   : > { %v3224_v44 = vadd.f32 %v3223_v38, %v2155_v62  ;;  %v2207_v51 = vmax.f32 %v3220_v39, 0.0 }
 0x3ca   : > { %v2210_v48 = vmax.f32 %v3222_v43, 0.0 }
 0x3cb   : > { %v2208_v52 = vmax.f32 %v3224_v44, 0.0  ;;  %v3159_v58 = vpop.f32.mrb[12].mxu0 }
 0x3cc   : > { %v2678_v59 = vpack.c.bf16 %v2210_v48, %v2209_v47  ;;  %v3225_v3 = vadd.f32 %v3159_v58, %v4269_v10  ;;  %v1788_v4 = vpop.f32.mrb[13].mxu0 }
 0x3cd   : > { %v2673_v11 = vpack.c.bf16 %v2208_v52, %v2207_v51  ;;  %v3227_v17 = vadd.f32 %v4269_v10, %v1788_v4  ;;  %v3160_v19 = vpop.f32.mrb[14].mxu0 }
 0x3ce   : > { %2694 = vst [vmem:[%s4278_s8 + $0x28] sm:$0xff] %v2678_v59   ;;  %v3229_v9 = vadd.f32 %v3160_v19, %v4269_v10  ;;  %v3226_v13 = vadd.f32 %v3225_v3, %v3191_v63  ;;  %v1791_v14 = vpop.f32.mrb[15].mxu0 }
 0x3cf   : > { %2693 = vst [vmem:[%s4278_s8 + $0x20] sm:$0xff] %v2673_v11   ;;  %v3231_v28 = vadd.f32 %v4269_v10, %v1791_v14  ;;  %v3228_v33 = vadd.f32 %v3227_v17, %v2168_v6 }
 0x3d0   : > { %v3230_v36 = vadd.f32 %v3229_v9, %v3192_v18  ;;  %v2213_v5 = vmax.f32 %v3226_v13, 0.0 }
 0x3d1   : > { %v3232_v49 = vadd.f32 %v3231_v28, %v2171_v20  ;;  %v2211_v15 = vmax.f32 %v3228_v33, 0.0 }
 0x3d2   : > { %v2214_v55 = vmax.f32 %v3230_v36, 0.0 }
 0x3d3   : > { %v2212_v34 = vmax.f32 %v3232_v49, 0.0  ;;  %v3179_v1 = vpop.f32.mrb[0].mxu0 }
 0x3d4   : > { %v2688_v0 = vpack.c.bf16 %v2214_v55, %v2213_v5  ;;  %v3209_v7 = vadd.f32 %v3179_v1, %v4269_v10  ;;  %v2120_v61 = vpop.f32.mrb[1].mxu0 }
 0x3d5   : > { %v2683_v8 = vpack.c.bf16 %v2212_v34, %v2211_v15  ;;  %v3210_v21 = vadd.f32 %v4269_v10, %v2120_v61  ;;  %v3180_v22 = vpop.f32.mrb[2].mxu0 }
 0x3d6   : > { %2696 = vst [vmem:[%s4278_s8 + $0x38] sm:$0xff] %v2688_v0   ;;  %v3211_v16 = vadd.f32 %v3180_v22, %v4269_v10  ;;  %v2123_v42 = vpop.f32.mrb[3].mxu0  ;;  %v2201_v30 = vmax.f32 %v3209_v7, 0.0 }
 0x3d7   : > { %2695 = vst [vmem:[%s4278_s8 + $0x30] sm:$0xff] %v2683_v8   ;;  %v3212_v23 = vadd.f32 %v4269_v10, %v2123_v42  ;;  %v2199_v37 = vmax.f32 %v3210_v21, 0.0 }
 0x3d8   : > { %v2202_v25 = vmax.f32 %v3211_v16, 0.0 }
 0x3d9   : > { %v2200_v40 = vmax.f32 %v3212_v23, 0.0 }
 0x3da   : > { %v2658_v41 = vpack.c.bf16 %v2202_v25, %v2201_v30 }
 0x3db   : > { %v2653_v50 = vpack.c.bf16 %v2200_v40, %v2199_v37  ;;  %v3183_v45 = vpop.f32.mrb[4].mxu0 }
 0x3dc   : > { %2690 = vst [vmem:[%s4278_s8 + $0x8] sm:$0xff] %v2658_v41   ;;  %v3213_v46 = vadd.f32 %v3183_v45, %v4269_v10  ;;  %v2136_v54 = vpop.f32.mrb[5].mxu0 }
 0x3dd   : > { %2654 = vst [vmem:[%s4278_s8] sm:$0xff] %v2653_v50   ;;  %v3214_v53 = vadd.f32 %v4269_v10, %v2136_v54  ;;  %v3184_v56 = vpop.f32.mrb[6].mxu0 }
 0x3de   : > { %v3215_v57 = vadd.f32 %v3184_v56, %v4269_v10  ;;  %v2139_v60 = vpop.f32.mrb[7].mxu0  ;;  %v2205_v62 = vmax.f32 %v3213_v46, 0.0 }
 0x3df   : > { %v3216_v2 = vadd.f32 %v4269_v10, %v2139_v60  ;;  %v2203_v6 = vmax.f32 %v3214_v53, 0.0 }
 0x3e0   : > { %v2206_v63 = vmax.f32 %v3215_v57, 0.0 }
 0x3e1   : > { %v2204_v18 = vmax.f32 %v3216_v2, 0.0 }
 0x3e2   : > { %v2668_v20 = vpack.c.bf16 %v2206_v63, %v2205_v62 }
 0x3e3   : > { %v2663_v12 = vpack.c.bf16 %v2204_v18, %v2203_v6 }
 0x3e4   : > { %2692 = vst [vmem:[%s4278_s8 + $0x18] sm:$0xff] %v2668_v20  }
 0x3e5   : > { %2691 = vst [vmem:[%s4278_s8 + $0x10] sm:$0xff] %v2663_v12  }
 0x3e6   : > { %3635 = shalt.err (!%p3632_p3)
}
 0x3e7   : > { %s3636_s25 = scalar_lea.hbm %s4303_s10, 1024  ;;  %s3640_s7 = scalar_lea.hbm %s4354_s5, 2048 }
 0x3e8   : > { %p3637_p5 = scmp.ne.s32.totalorder %s4303_s10, %s3636_s25  ;;  %p3641_p12 = scmp.lt.u32.totalorder %s4303_s10, %s4354_s5 }
 0x3e9   : > { %p3642_p13 = scmp.lt.u32.totalorder %s3640_s7, %s3636_s25  ;;  %p3644_p8 = scmp.lt.u32.totalorder %s3636_s25, %s4303_s10 }
 0x3ea   : > { %p3638_p6 = pnand %p3637_p5, %p4382_p7 }
 0x3eb   : > { %p3643_p0 = por %p3642_p13, %p3641_p12 }
 0x3ec   : > { %p3639_p11 = pneg %p3638_p6 }
 0x3ed   : > { %p3645_p9 = por %p3644_p8, %p3643_p0 }
 0x3ef   : > { %p3646_p10 = pnand %p3645_p9, %p3639_p11 }
 0x3f1   : > { %3649 = shalt.err (!%p3646_p10)
}
 0x3f2   : > { %s3710_s17 = smov 64   ;;  %s3711_s26 = smov 4  }
 0x3f3   : > { %3310 = dma.vmem_to_hbm [thread:$0]  (%p4382_p7), %s4298_s9, 1024, %s4303_s10, %s2296_s27, %s3710_s17, %s3710_s17, %s3711_s26  }
 0x3f4 PF: > { %s2324_s8 = sand.u32 1, %s3684_s18   ;;  %p4383_p1 = scmp.ne.s32.totalorder %s4368_s6, 0 }
 0x3f5   : > { %s2325_s12 = scalar_lea.sflag [#allocation4], %s2324_s8 }
 0x3f6   : > { %p3323_p2 = pnand %p2418_p4, %p4383_p1 }
 0x3f8   : > { %3679 = dma.done.wait (!%p3323_p2), %s2325_s12, 1024  }
 0x3f9   : > { %3681 = vsyncadd (!%p3323_p2), %s2325_s12, 4294966272  ;;  %s4384_s21 = sld [smem:[#allocation18_spill]]  ;;  %s4385_s1 = sld [smem:[#allocation19_spill]] }
 0x3fa   : > { %s4386_s18 = smov %s3688_s19  ;;  %s4387_s19 = smov %s3692_s20 }
 0x3ff   : > { %p20_p3 = scmp.ge.s32.totalorder %s4384_s21, 4   ;;  %s4388_s20 = smov %s4385_s1 }
 0x401   :  { %22 = sbr.rel (!%p20_p3) target bundleno = 9 (0x9), region = 109 }
 0x408   :  { %2330 = vsyncpa [#allocation3], 1 }
 0x409   :  { %2332 = vsyncpa [#allocation3 + $0x1], 1 }
 0x40a   :  { %2333 = vsyncpa [#allocation6], 1 }
 0x40b   :  { %2334 = vsyncpa [#allocation9], 1 }
 0x40c   :  { %2335 = vsyncpa [#allocation4], 1 }
 0x40d   :  { %2337 = vsyncpa [#allocation4 + $0x1], 1 }

</bundles_post_ra>
